<compile_context>
chip_gen: v6e
topology: v6e:2x2x1
jax: 0.10.0
libtpu: 0.0.40
codegen_flags: <defaults>
</compile_context>

<pallas_src>
import math
from functools import partial

import jax
import jax.numpy as jnp
from jax.experimental import pallas as pl
from jax.experimental.pallas import tpu as pltpu

_PI = math.pi
_TWO_PI_SQ = 2.0 * math.pi ** 2
_SQRT2_PI = math.sqrt(2.0) * math.pi  # (sqrt(2)*pi*sin(pi*x)) * (sqrt(2)*pi*sin(pi*y)) = 2*pi^2*sin*sin

# Odd Taylor coefficients of sqrt(2)*pi * sin(pi*r), |r| <= 0.5, degree 11.
# Truncation <= sqrt(2)*pi * (pi/2)^13 / 13! ~ 2.5e-7 absolute -- far inside the
# 1e-4 tolerance, and the scale is folded in at zero runtime cost.
_C1 = _SQRT2_PI * _PI
_C3 = -_SQRT2_PI * _PI ** 3 / 6.0
_C5 = _SQRT2_PI * _PI ** 5 / 120.0
_C7 = -_SQRT2_PI * _PI ** 7 / 5040.0
_C9 = _SQRT2_PI * _PI ** 9 / 362880.0
_C11 = -_SQRT2_PI * _PI ** 11 / 39916800.0

_LANES = 128
_MAX_TILE_ROWS = 4096        # 2 MiB f32 input tile; (in + out) * 2 buffers = 8 MiB VMEM
_MIN_PALLAS_POINTS = 32768   # approximate crossover vs. the fused jnp path; measure to tune
_VMEM_LIMIT_BYTES = 32 * 1024 * 1024


def _sinpi_scaled_kernel(v_ref, o_ref):
    """Elementwise sqrt(2)*pi*sin(pi*v) on the interleaved (x0,y0,x1,y1,...) slab."""
    v = v_ref[...]
    # Range reduction: v = n + r, |r| <= 0.5 (floor-based round; exact in f32).
    n = jnp.floor(v + 0.5)
    r = v - n
    # sign = (-1)^n, folded into r since the polynomial below is odd.
    half = n * 0.5
    sgn = 1.0 - 4.0 * (half - jnp.floor(half))   # +1 if n even, -1 if n odd
    r = r * sgn
    r2 = r * r
    # Horner, degree-11 odd polynomial (pure VALU work; no EUP/XLU needed).
    p = _C11
    p = p * r2 + _C9
    p = p * r2 + _C7
    p = p * r2 + _C5
    p = p * r2 + _C3
    p = p * r2 + _C1
    o_ref[...] = p * r


def _pick_tile_rows(rows: int, max_tile_rows: int) -> int:
    """Tile policy: one maximal tile on single-TC chips when it fits; otherwise
    >= 4 roughly equal grid steps so v7x's two TensorCores stay balanced."""
    max_tile_rows = max(8, max_tile_rows)
    steps = pl.cdiv(rows, max_tile_rows)
    if 1 < steps < 4:
        steps = 4
    tile = pl.cdiv(rows, steps)
    return pl.cdiv(tile, 8) * 8  # sublane multiple


def _sinsin_jnp(pts: jax.Array) -> jax.Array:
    x = pts[:, 0:1]
    y = pts[:, 1:2]
    return (_TWO_PI_SQ * jnp.sin(x * _PI) * jnp.sin(y * _PI)).astype(pts.dtype)


@partial(jax.jit, static_argnames=("max_tile_rows", "min_pallas_points"))
def sinsin(pts: jax.Array, *, max_tile_rows: int = _MAX_TILE_ROWS,
           min_pallas_points: int = _MIN_PALLAS_POINTS) -> jax.Array:
    """pts: [N, 2] float array with columns (x, y). Returns [N, 1] feature."""
    assert pts.ndim == 2 and pts.shape[1] == 2, "pts must be [N, 2] with columns (x, y)"
    n = pts.shape[0]
    dtype = pts.dtype

    # Fallbacks: non-f32 dtypes (kernel path is f32-only) and small inputs where
    # launch/pipeline overhead dominates.
    if dtype != jnp.float32 or n < min_pallas_points or n < 64:
        return _sinsin_jnp(pts)

    # 64-point-aligned prefix: its flattened view is an exact multiple of 128, so
    # the lane-dense slab below is a pure bitcast of pts (no pad, no gather).
    n_main = (n // 64) * 64
    flat = pts[:n_main].reshape(-1)              # x0, y0, x1, y1, ...
    rows = flat.shape[0] // _LANES               # == n_main // 64, exact
    slab = flat.reshape(rows, _LANES)

    tile_rows = _pick_tile_rows(rows, max_tile_rows)
    grid = (pl.cdiv(rows, tile_rows),)           # ragged last block handled by Pallas
    block = pl.BlockSpec((tile_rows, _LANES), lambda i: (i, 0))

    s = pl.pallas_call(
        _sinpi_scaled_kernel,
        out_shape=jax.ShapeDtypeStruct((rows, _LANES), jnp.float32),
        grid=grid,
        in_specs=[block],
        out_specs=block,
        compiler_params=pltpu.CompilerParams(
            dimension_semantics=("parallel",),
            vmem_limit_bytes=_VMEM_LIMIT_BYTES,
        ),
    )(slab)

    # Single fused, memory-bound XLA epilogue: pair sqrt(2)*pi*sin(pi*x_i) with
    # sqrt(2)*pi*sin(pi*y_i) -> 2*pi^2*sin(pi*x_i)*sin(pi*y_i), emit [n_main, 1].
    sp = s.reshape(n_main, 2)
    out_main = (sp[:, 0:1] * sp[:, 1:2]).astype(dtype)

    if n_main == n:
        return out_main

    # < 64-point ragged tail via plain jnp (negligible work; avoids jnp.pad's
    # full-input copy).
    out_tail = _sinsin_jnp(pts[n_main:])
    return jnp.concatenate([out_main, out_tail], axis=0)


def sinsin_ref(pts: jax.Array) -> jax.Array:
    x = pts[:, 0:1]
    y = pts[:, 1:2]
    return _TWO_PI_SQ * jnp.sin(x * _PI) * jnp.sin(y * _PI)


if __name__ == "__main__":
    key = jax.random.PRNGKey(0)
    k1, k2, k3, k4 = jax.random.split(key, 4)

    # Case 1: aligned N on the typical [0, 1) PINN domain; single-tile grid.
    n1 = 65536
    pts1 = jax.random.uniform(k1, (n1, 2), dtype=jnp.float32)
    out1 = jax.block_until_ready(sinsin(pts1))
    assert out1.shape == (n1, 1), out1.shape
    assert jnp.allclose(out1, sinsin_ref(pts1), atol=1e-4, rtol=1e-4), "mismatch (aligned)"

    # Case 2: ragged N, values in [-1, 2) to exercise range reduction + sign parity;
    # prefix kernel + jnp tail.
    n2 = 70003
    pts2 = jax.random.uniform(k2, (n2, 2), dtype=jnp.float32, minval=-1.0, maxval=2.0)
    out2 = jax.block_until_ready(sinsin(pts2))
    assert out2.shape == (n2, 1), out2.shape
    assert jnp.allclose(out2, sinsin_ref(pts2), atol=1e-4, rtol=1e-4), "mismatch (ragged)"

    # Case 3: multi-step grid (small max_tile_rows keeps the demo shape small while
    # exercising the >= 4 balanced "parallel" steps path).
    n3 = 65536
    pts3 = jax.random.uniform(k3, (n3, 2), dtype=jnp.float32)
    out3 = jax.block_until_ready(sinsin(pts3, max_tile_rows=256))
    assert out3.shape == (n3, 1), out3.shape
    assert jnp.allclose(out3, sinsin_ref(pts3), atol=1e-4, rtol=1e-4), "mismatch (multi-step)"

    # Case 4: tiny N -> plain-jnp fallback path.
    pts4 = jax.random.uniform(k4, (7, 2), dtype=jnp.float32)
    out4 = jax.block_until_ready(sinsin(pts4))
    assert out4.shape == (7, 1), out4.shape
    assert jnp.allclose(out4, sinsin_ref(pts4), atol=1e-4, rtol=1e-4), "mismatch (fallback)"

    print("KERNEL_OK")
</pallas_src>

<mosaic_0001>
module attributes {stable_mosaic.version = 11 : i64} {
  func.func @_sinpi_scaled_kernel(%arg0: i32, %arg1: memref<1024x128xf32, #tpu.memory_space<vmem>>, %arg2: memref<1024x128xf32, #tpu.memory_space<vmem>>) attributes {dimension_semantics = [#tpu.dimension_semantics<parallel>], iteration_bounds = array<i64: 1>, scalar_prefetch = 0 : i64, scratch_operands = 0 : i64, tpu.core_type = #tpu.core_type<tc>, window_params = [{transform_indices = @transform_0, window_bounds = array<i64: 1024, 128>}, {transform_indices = @transform_1, window_bounds = array<i64: 1024, 128>}]} {
    %c0 = arith.constant 0 : index
    %c0_0 = arith.constant 0 : index
    %0 = vector.load %arg1[%c0, %c0_0] : memref<1024x128xf32, #tpu.memory_space<vmem>>, vector<1024x128xf32>
    %cst = arith.constant 5.000000e-01 : f32
    %1 = vector.broadcast %cst : f32 to vector<1024x128xf32>
    %2 = arith.addf %0, %1 : vector<1024x128xf32>
    %3 = math.floor %2 : vector<1024x128xf32>
    %4 = arith.subf %0, %3 : vector<1024x128xf32>
    %cst_1 = arith.constant 5.000000e-01 : f32
    %5 = vector.broadcast %cst_1 : f32 to vector<1024x128xf32>
    %6 = arith.mulf %3, %5 : vector<1024x128xf32>
    %7 = math.floor %6 : vector<1024x128xf32>
    %8 = arith.subf %6, %7 : vector<1024x128xf32>
    %cst_2 = arith.constant 4.000000e+00 : f32
    %9 = vector.broadcast %cst_2 : f32 to vector<1024x128xf32>
    %10 = arith.mulf %9, %8 : vector<1024x128xf32>
    %cst_3 = arith.constant 1.000000e+00 : f32
    %11 = vector.broadcast %cst_3 : f32 to vector<1024x128xf32>
    %12 = arith.subf %11, %10 : vector<1024x128xf32>
    %13 = arith.mulf %4, %12 : vector<1024x128xf32>
    %14 = arith.mulf %13, %13 : vector<1024x128xf32>
    %cst_4 = arith.constant -0.0327459611 : f32
    %15 = vector.broadcast %cst_4 : f32 to vector<1024x128xf32>
    %16 = arith.mulf %15, %14 : vector<1024x128xf32>
    %cst_5 = arith.constant 0.364964545 : f32
    %17 = vector.broadcast %cst_5 : f32 to vector<1024x128xf32>
    %18 = arith.addf %16, %17 : vector<1024x128xf32>
    %19 = arith.mulf %18, %14 : vector<1024x128xf32>
    %cst_6 = arith.constant -2.66246223 : f32
    %20 = vector.broadcast %cst_6 : f32 to vector<1024x128xf32>
    %21 = arith.addf %19, %20 : vector<1024x128xf32>
    %22 = arith.mulf %21, %14 : vector<1024x128xf32>
    %cst_7 = arith.constant 11.33008 : f32
    %23 = vector.broadcast %cst_7 : f32 to vector<1024x128xf32>
    %24 = arith.addf %22, %23 : vector<1024x128xf32>
    %25 = arith.mulf %24, %14 : vector<1024x128xf32>
    %cst_8 = arith.constant -22.9595432 : f32
    %26 = vector.broadcast %cst_8 : f32 to vector<1024x128xf32>
    %27 = arith.addf %25, %26 : vector<1024x128xf32>
    %28 = arith.mulf %27, %14 : vector<1024x128xf32>
    %cst_9 = arith.constant 13.9577284 : f32
    %29 = vector.broadcast %cst_9 : f32 to vector<1024x128xf32>
    %30 = arith.addf %28, %29 : vector<1024x128xf32>
    %31 = arith.mulf %30, %13 : vector<1024x128xf32>
    %c0_10 = arith.constant 0 : index
    %c0_11 = arith.constant 0 : index
    %32 = vector.load %arg2[%c0_10, %c0_11] : memref<1024x128xf32, #tpu.memory_space<vmem>>, vector<1024x128xf32>
    tpu.vector_store %arg2[%c0_10, %c0_11], %31 {strides = array<i32>} : memref<1024x128xf32, #tpu.memory_space<vmem>>, vector<1024x128xf32>,
    return
  }
  func.func @transform_0(%arg0: i32) -> (i32, i32) {
    %c0_i32 = arith.constant 0 : i32
    %c0_i32_0 = arith.constant 0 : i32
    return %arg0, %c0_i32 : i32, i32
  }
  func.func @transform_1(%arg0: i32) -> (i32, i32) {
    %c0_i32 = arith.constant 0 : i32
    %c0_i32_0 = arith.constant 0 : i32
    return %arg0, %c0_i32 : i32, i32
  }
}

</mosaic_0001>

<bundles_post_ra>
// kernel: sinsin.1
= control target key start
LH: loop header
LB: loop body
LE: loop exit
PB: predicated region body
PF: predicated region fallthrough
CT: control target
= control target key end

     0   :  { %s5297_s0 = inlined_call_operand.vmem [shape: f32[1024,128], index: 0, kind: input, shape index: {}]   ;;  %s5298_s1 = inlined_call_operand.vmem [shape: f32[1024,128], index: 1, kind: output, shape index: {}]  }
   0x1   :  { %v8_v0 = vld [vmem:[%s5297_s0] sm:$0xff]  ;;  %v9_v1 = vld [vmem:[%s5297_s0 + $0x8] sm:$0xff]  ;;  %v10_v2 = vld [vmem:[%s5297_s0 + $0x10] sm:$0xff] }
   0x2   :  { %v136_v3 = vadd.f32 0.5, %v8_v0  ;;  %v137_v4 = vadd.f32 0.5, %v9_v1  ;;  %v138_v5 = vadd.f32 0.5, %v10_v2  ;;  %v11_v6 = vld [vmem:[%s5297_s0 + $0x18] sm:$0xff]  ;;  %v12_v7 = vld [vmem:[%s5297_s0 + $0x20] sm:$0xff]  ;;  %v13_v8 = vld [vmem:[%s5297_s0 + $0x28] sm:$0xff] }
   0x3   :  { %v139_v9 = vadd.f32 0.5, %v11_v6  ;;  %v140_v10 = vadd.f32 0.5, %v12_v7  ;;  %v141_v11 = vadd.f32 0.5, %v13_v8  ;;  %v14_v12 = vld [vmem:[%s5297_s0 + $0x30] sm:$0xff]  ;;  %v2990_v13 = vld [vmem:[%s5297_s0 + $0x38] sm:$0xff] }
   0x4   :  { %v264_v14 = vfloor.f32 %v136_v3  ;;  %v265_v15 = vfloor.f32 %v137_v4  ;;  %v266_v16 = vfloor.f32 %v138_v5  ;;  %v142_v20 = vadd.f32 0.5, %v14_v12 }
   0x5   :  { %v267_v17 = vfloor.f32 %v139_v9  ;;  %v268_v18 = vfloor.f32 %v140_v10  ;;  %v269_v19 = vfloor.f32 %v141_v11  ;;  %v2993_v24 = vadd.f32 0.5, %v2990_v13 }
   0x6   :  { %v392_v21 = vsub.f32 %v8_v0, %v264_v14  ;;  %v520_v22 = vmul.f32 0.5, %v264_v14  ;;  %v521_v23 = vmul.f32 0.5, %v265_v15  ;;  %v393_v25 = vsub.f32 %v9_v1, %v265_v15 }
   0x7   :  { %v394_v26 = vsub.f32 %v10_v2, %v266_v16  ;;  %v522_v27 = vmul.f32 0.5, %v266_v16  ;;  %v523_v28 = vmul.f32 0.5, %v267_v17  ;;  %v395_v31 = vsub.f32 %v11_v6, %v267_v17 }
   0x8   :  { %v648_v29 = vfloor.f32 %v520_v22  ;;  %v649_v30 = vfloor.f32 %v521_v23  ;;  %v524_v32 = vmul.f32 0.5, %v268_v18  ;;  %v396_v35 = vsub.f32 %v12_v7, %v268_v18 }
   0x9   :  { %v650_v33 = vfloor.f32 %v522_v27  ;;  %v651_v34 = vfloor.f32 %v523_v28  ;;  %v525_v36 = vmul.f32 0.5, %v269_v19  ;;  %v270_v40 = vfloor.f32 %v142_v20 }
   0xa   :  { %v776_v37 = vsub.f32 %v520_v22, %v648_v29  ;;  %v777_v38 = vsub.f32 %v521_v23, %v649_v30  ;;  %v652_v39 = vfloor.f32 %v524_v32  ;;  %v397_v43 = vsub.f32 %v13_v8, %v269_v19 }
   0xb   :  { %v778_v41 = vsub.f32 %v522_v27, %v650_v33  ;;  %v779_v42 = vsub.f32 %v523_v28, %v651_v34  ;;  %v653_v44 = vfloor.f32 %v525_v36  ;;  %v271_v48 = vfloor.f32 %v2993_v24 }
   0xc   :  { %v904_v45 = vmul.f32 4.0, %v776_v37  ;;  %v905_v46 = vmul.f32 4.0, %v777_v38  ;;  %v780_v47 = vsub.f32 %v524_v32, %v652_v39  ;;  %v526_v52 = vmul.f32 0.5, %v270_v40 }
   0xd   :  { %v906_v49 = vmul.f32 4.0, %v778_v41  ;;  %v907_v50 = vmul.f32 4.0, %v779_v42  ;;  %v781_v51 = vsub.f32 %v525_v36, %v653_v44  ;;  %v398_v56 = vsub.f32 %v14_v12, %v270_v40 }
   0xe   :  { %v1032_v53 = vsub.f32 1.0, %v904_v45  ;;  %v1033_v54 = vsub.f32 1.0, %v905_v46  ;;  %v908_v55 = vmul.f32 4.0, %v780_v47  ;;  %v654_v60 = vfloor.f32 %v526_v52 }
   0xf   :  { %v1034_v57 = vsub.f32 1.0, %v906_v49  ;;  %v1035_v58 = vsub.f32 1.0, %v907_v50  ;;  %v909_v59 = vmul.f32 4.0, %v781_v51  ;;  %v527_v0 = vmul.f32 0.5, %v271_v48 }
  0x10   :  { %v2996_v61 = vmul.f32 %v1032_v53, %v392_v21  ;;  %v2998_v62 = vmul.f32 %v1033_v54, %v393_v25  ;;  %v1036_v63 = vsub.f32 1.0, %v908_v55  ;;  %v782_v4 = vsub.f32 %v526_v52, %v654_v60 }
  0x11   :  { %v3000_v1 = vmul.f32 %v1034_v57, %v394_v26  ;;  %v3002_v2 = vmul.f32 %v1035_v58, %v395_v31  ;;  %v1037_v3 = vsub.f32 1.0, %v909_v59  ;;  %v655_v8 = vfloor.f32 %v527_v0 }
  0x12   :  { %v3006_v5 = vmul.f32 %v2996_v61, %v2996_v61  ;;  %v3010_v6 = vmul.f32 %v2998_v62, %v2998_v62  ;;  %v3012_v7 = vmul.f32 %v1036_v63, %v396_v35  ;;  %v910_v12 = vmul.f32 4.0, %v782_v4 }
  0x13   :  { %v3016_v9 = vmul.f32 %v3000_v1, %v3000_v1  ;;  %v3020_v10 = vmul.f32 %v3002_v2, %v3002_v2  ;;  %v3022_v11 = vmul.f32 %v1037_v3, %v397_v43  ;;  %v783_v17 = vsub.f32 %v527_v0, %v655_v8 }
  0x14   :  { %v1416_v14 = vmul.f32 -0.03274596, %v3006_v5  ;;  %v1417_v15 = vmul.f32 -0.03274596, %v3010_v6  ;;  %v3028_v16 = vmul.f32 %v3012_v7, %v3012_v7  ;;  %v1038_v21 = vsub.f32 1.0, %v910_v12 }
  0x15   :  { %v1418_v18 = vmul.f32 -0.03274596, %v3016_v9  ;;  %v1419_v19 = vmul.f32 -0.03274596, %v3020_v10  ;;  %v3034_v20 = vmul.f32 %v3022_v11, %v3022_v11  ;;  %v399_v25 = vsub.f32 %v2990_v13, %v271_v48 }
  0x16   :  { %v1544_v22 = vadd.f32 0.36496454, %v1416_v14  ;;  %v1545_v23 = vadd.f32 0.36496454, %v1417_v15  ;;  %v1420_v24 = vmul.f32 -0.03274596, %v3028_v16  ;;  %v3039_v29 = vmul.f32 %v1038_v21, %v398_v56 }
  0x17   :  { %v1546_v26 = vadd.f32 0.36496454, %v1418_v18  ;;  %v1547_v27 = vadd.f32 0.36496454, %v1419_v19  ;;  %v1421_v28 = vmul.f32 -0.03274596, %v3034_v20 }
  0x18   :  { %v1672_v30 = vmul.f32 %v1544_v22, %v3006_v5  ;;  %v1673_v31 = vmul.f32 %v1545_v23, %v3010_v6  ;;  %v1548_v32 = vadd.f32 0.36496454, %v1420_v24  ;;  %v911_v33 = vmul.f32 4.0, %v783_v17 }
  0x19   :  { %v1674_v34 = vmul.f32 %v1546_v26, %v3016_v9  ;;  %v1675_v35 = vmul.f32 %v1547_v27, %v3020_v10  ;;  %v1549_v36 = vadd.f32 0.36496454, %v1421_v28  ;;  %v3047_v13 = vmul.f32 %v3039_v29, %v3039_v29 }
  0x1a   :  { %v1800_v37 = vadd.f32 -2.6624622, %v1672_v30  ;;  %v1801_v38 = vadd.f32 -2.6624622, %v1673_v31  ;;  %v1676_v39 = vmul.f32 %v1548_v32, %v3028_v16  ;;  %v1039_v40 = vsub.f32 1.0, %v911_v33 }
  0x1b   :  { %v1802_v41 = vadd.f32 -2.6624622, %v1674_v34  ;;  %v1803_v42 = vadd.f32 -2.6624622, %v1675_v35  ;;  %v1677_v43 = vmul.f32 %v1549_v36, %v3034_v20  ;;  %v1422_v44 = vmul.f32 -0.03274596, %v3047_v13 }
  0x1c   :  { %v1928_v45 = vmul.f32 %v1800_v37, %v3006_v5  ;;  %v1929_v46 = vmul.f32 %v1801_v38, %v3010_v6  ;;  %v1804_v47 = vadd.f32 -2.6624622, %v1676_v39  ;;  %v3054_v48 = vmul.f32 %v1039_v40, %v399_v25 }
  0x1d   :  { %v1930_v49 = vmul.f32 %v1802_v41, %v3016_v9  ;;  %v1931_v50 = vmul.f32 %v1803_v42, %v3020_v10  ;;  %v1805_v51 = vadd.f32 -2.6624622, %v1677_v43  ;;  %v1550_v52 = vadd.f32 0.36496454, %v1422_v44  ;;  %v16_v41 = vld [vmem:[%s5297_s0 + $0x40] sm:$0xff]  ;;  %v19_v44 = vld [vmem:[%s5297_s0 + $0x58] sm:$0xff] }
  0x1e   :  { %v2056_v53 = vadd.f32 11.33008, %v1928_v45  ;;  %v2057_v54 = vadd.f32 11.33008, %v1929_v46  ;;  %v1932_v55 = vmul.f32 %v1804_v47, %v3028_v16  ;;  %v3061_v56 = vmul.f32 %v3054_v48, %v3054_v48 }
  0x1f   :  { %v2058_v57 = vadd.f32 11.33008, %v1930_v49  ;;  %v2059_v58 = vadd.f32 11.33008, %v1931_v50  ;;  %v1933_v59 = vmul.f32 %v1805_v51, %v3034_v20  ;;  %v1678_v60 = vmul.f32 %v1550_v52, %v3047_v13 }
  0x20   :  { %v2184_v63 = vmul.f32 %v2056_v53, %v3006_v5  ;;  %v2185_v0 = vmul.f32 %v2057_v54, %v3010_v6  ;;  %v2060_v3 = vadd.f32 11.33008, %v1932_v55  ;;  %v1423_v4 = vmul.f32 -0.03274596, %v3061_v56 }
  0x21   :  { %v2186_v8 = vmul.f32 %v2058_v57, %v3016_v9  ;;  %v2187_v12 = vmul.f32 %v2059_v58, %v3020_v10  ;;  %v2061_v14 = vadd.f32 11.33008, %v1933_v59  ;;  %v1806_v15 = vadd.f32 -2.6624622, %v1678_v60 }
  0x22   :  { %v2312_v17 = vadd.f32 -22.959543, %v2184_v63  ;;  %v2313_v18 = vadd.f32 -22.959543, %v2185_v0  ;;  %v2188_v19 = vmul.f32 %v2060_v3, %v3028_v16  ;;  %v1551_v21 = vadd.f32 0.36496454, %v1423_v4 }
  0x23   :  { %v2314_v22 = vadd.f32 -22.959543, %v2186_v8  ;;  %v2315_v23 = vadd.f32 -22.959543, %v2187_v12  ;;  %v2189_v24 = vmul.f32 %v2061_v14, %v3034_v20  ;;  %v1934_v25 = vmul.f32 %v1806_v15, %v3047_v13 }
  0x24   :  { %v2440_v26 = vmul.f32 %v2312_v17, %v3006_v5  ;;  %v2441_v27 = vmul.f32 %v2313_v18, %v3010_v6  ;;  %v2316_v28 = vadd.f32 -22.959543, %v2188_v19  ;;  %v1679_v30 = vmul.f32 %v1551_v21, %v3061_v56  ;;  %v22_v17 = vld [vmem:[%s5297_s0 + $0x70] sm:$0xff] }
  0x25   :  { %v2442_v31 = vmul.f32 %v2314_v22, %v3016_v9  ;;  %v2443_v32 = vmul.f32 %v2315_v23, %v3020_v10  ;;  %v2317_v33 = vadd.f32 -22.959543, %v2189_v24  ;;  %v2062_v34 = vadd.f32 11.33008, %v1934_v25  ;;  %v17_v9 = vld [vmem:[%s5297_s0 + $0x48] sm:$0xff] }
  0x26   :  { %v2568_v35 = vadd.f32 13.957728, %v2440_v26  ;;  %v2569_v36 = vadd.f32 13.957728, %v2441_v27  ;;  %v2444_v37 = vmul.f32 %v2316_v28, %v3028_v16  ;;  %v1807_v38 = vadd.f32 -2.6624622, %v1679_v30 }
  0x27   :  { %v2570_v39 = vadd.f32 13.957728, %v2442_v31  ;;  %v2571_v40 = vadd.f32 13.957728, %v2443_v32  ;;  %v2445_v5 = vmul.f32 %v2317_v33, %v3034_v20  ;;  %v2190_v6 = vmul.f32 %v2062_v34, %v3047_v13  ;;  %v18_v20 = vld [vmem:[%s5297_s0 + $0x50] sm:$0xff] }
  0x28   :  { %v2696_v10 = vmul.f32 %v2568_v35, %v2996_v61  ;;  %v2697_v42 = vmul.f32 %v2569_v36, %v2998_v62  ;;  %v2572_v16 = vadd.f32 13.957728, %v2444_v37  ;;  %v1935_v43 = vmul.f32 %v1807_v38, %v3061_v56  ;;  %v20_v61 = vld [vmem:[%s5297_s0 + $0x60] sm:$0xff] }
  0x29   :  { %v2698_v45 = vmul.f32 %v2570_v39, %v3000_v1  ;;  %v2699_v46 = vmul.f32 %v2571_v40, %v3002_v2  ;;  %v2573_v47 = vadd.f32 13.957728, %v2445_v5  ;;  %v2318_v49 = vadd.f32 -22.959543, %v2190_v6  ;;  %v21_v2 = vld [vmem:[%s5297_s0 + $0x68] sm:$0xff] }
  0x2a   :  { %2824 = vst [vmem:[%s5298_s1] sm:$0xff] %v2696_v10  ;;  %2825 = vst [vmem:[%s5298_s1 + $0x8] sm:$0xff] %v2697_v42  ;;  %v2700_v62 = vmul.f32 %v2572_v16, %v3012_v7  ;;  %v2063_v50 = vadd.f32 11.33008, %v1935_v43  ;;  %v144_v1 = vadd.f32 0.5, %v16_v41  ;;  %v145_v51 = vadd.f32 0.5, %v17_v9 }
  0x2b   :  { %2826 = vst [vmem:[%s5298_s1 + $0x10] sm:$0xff] %v2698_v45  ;;  %2827 = vst [vmem:[%s5298_s1 + $0x18] sm:$0xff] %v2699_v46  ;;  %v2701_v52 = vmul.f32 %v2573_v47, %v3022_v11  ;;  %v2446_v53 = vmul.f32 %v2318_v49, %v3047_v13  ;;  %v146_v7 = vadd.f32 0.5, %v18_v20  ;;  %v147_v54 = vadd.f32 0.5, %v19_v44 }
  0x2c   :  { %2828 = vst [vmem:[%s5298_s1 + $0x20] sm:$0xff] %v2700_v62  ;;  %v2191_v55 = vmul.f32 %v2063_v50, %v3061_v56  ;;  %v272_v57 = vfloor.f32 %v144_v1  ;;  %v273_v58 = vfloor.f32 %v145_v51  ;;  %v148_v59 = vadd.f32 0.5, %v20_v61 }
  0x2d   :  { %2829 = vst [vmem:[%s5298_s1 + $0x28] sm:$0xff] %v2701_v52  ;;  %v2574_v60 = vadd.f32 13.957728, %v2446_v53  ;;  %v274_v63 = vfloor.f32 %v146_v7  ;;  %v275_v11 = vfloor.f32 %v147_v54  ;;  %v149_v0 = vadd.f32 0.5, %v21_v2 }
  0x2e   :  { %v2319_v13 = vadd.f32 -22.959543, %v2191_v55  ;;  %v400_v3 = vsub.f32 %v16_v41, %v272_v57  ;;  %v528_v4 = vmul.f32 0.5, %v272_v57  ;;  %v401_v12 = vsub.f32 %v17_v9, %v273_v58 }
  0x2f   :  { %v2702_v8 = vmul.f32 %v2574_v60, %v3039_v29  ;;  %v529_v14 = vmul.f32 0.5, %v273_v58  ;;  %v530_v15 = vmul.f32 0.5, %v274_v63  ;;  %v402_v21 = vsub.f32 %v18_v20, %v274_v63 }
  0x30   :  { %v2447_v18 = vmul.f32 %v2319_v13, %v3061_v56  ;;  %v656_v19 = vfloor.f32 %v528_v4  ;;  %v531_v22 = vmul.f32 0.5, %v275_v11  ;;  %v276_v25 = vfloor.f32 %v148_v59  ;;  %v3137_v56 = vld [vmem:[%s5297_s0 + $0x78] sm:$0xff] }
  0x31   :  { %2830 = vst [vmem:[%s5298_s1 + $0x30] sm:$0xff] %v2702_v8  ;;  %v657_v23 = vfloor.f32 %v529_v14  ;;  %v658_v24 = vfloor.f32 %v530_v15  ;;  %v277_v29 = vfloor.f32 %v149_v0  ;;  %v150_v30 = vadd.f32 0.5, %v22_v17 }
  0x32   :  { %v2575_v26 = vadd.f32 13.957728, %v2447_v18  ;;  %v784_v27 = vsub.f32 %v528_v4, %v656_v19  ;;  %v659_v28 = vfloor.f32 %v531_v22  ;;  %v403_v33 = vsub.f32 %v19_v44, %v275_v11 }
  0x33   :  { %v785_v31 = vsub.f32 %v529_v14, %v657_v23  ;;  %v786_v32 = vsub.f32 %v530_v15, %v658_v24  ;;  %v532_v34 = vmul.f32 0.5, %v276_v25  ;;  %v404_v38 = vsub.f32 %v20_v61, %v276_v25 }
  0x34   :  { %v2703_v35 = vmul.f32 %v2575_v26, %v3054_v48  ;;  %v912_v36 = vmul.f32 4.0, %v784_v27  ;;  %v787_v37 = vsub.f32 %v531_v22, %v659_v28  ;;  %v533_v6 = vmul.f32 0.5, %v277_v29 }
  0x35   :  { %v913_v39 = vmul.f32 4.0, %v785_v31  ;;  %v914_v40 = vmul.f32 4.0, %v786_v32  ;;  %v660_v5 = vfloor.f32 %v532_v34  ;;  %v278_v10 = vfloor.f32 %v150_v30 }
  0x36   :  { %2831 = vst [vmem:[%s5298_s1 + $0x38] sm:$0xff] %v2703_v35  ;;  %v1040_v41 = vsub.f32 1.0, %v912_v36  ;;  %v915_v9 = vmul.f32 4.0, %v787_v37  ;;  %v3144_v42 = vadd.f32 0.5, %v3137_v56  ;;  %v661_v20 = vfloor.f32 %v533_v6 }
  0x37   :  { %v1041_v16 = vsub.f32 1.0, %v913_v39  ;;  %v1042_v43 = vsub.f32 1.0, %v914_v40  ;;  %v788_v48 = vsub.f32 %v532_v34, %v660_v5  ;;  %v405_v46 = vsub.f32 %v21_v2, %v277_v29 }
  0x38   :  { %v3146_v44 = vmul.f32 %v1040_v41, %v400_v3  ;;  %v1043_v45 = vsub.f32 1.0, %v915_v9  ;;  %v534_v47 = vmul.f32 0.5, %v278_v10  ;;  %v789_v50 = vsub.f32 %v533_v6, %v661_v20 }
  0x39   :  { %v3148_v49 = vmul.f32 %v1041_v16, %v401_v12  ;;  %v3150_v61 = vmul.f32 %v1042_v43, %v402_v21  ;;  %v916_v62 = vmul.f32 4.0, %v788_v48  ;;  %v279_v53 = vfloor.f32 %v3144_v42 }
  0x3a   :  { %v3154_v1 = vmul.f32 %v3146_v44, %v3146_v44  ;;  %v3156_v51 = vmul.f32 %v1043_v45, %v403_v33  ;;  %v662_v52 = vfloor.f32 %v534_v47  ;;  %v917_v55 = vmul.f32 4.0, %v789_v50 }
  0x3b   :  { %v3161_v7 = vmul.f32 %v3148_v49, %v3148_v49  ;;  %v3165_v2 = vmul.f32 %v3150_v61, %v3150_v61  ;;  %v1044_v54 = vsub.f32 1.0, %v916_v62  ;;  %v406_v59 = vsub.f32 %v22_v17, %v278_v10 }
  0x3c   :  { %v1424_v57 = vmul.f32 -0.03274596, %v3154_v1  ;;  %v3170_v58 = vmul.f32 %v3156_v51, %v3156_v51  ;;  %v790_v60 = vsub.f32 %v534_v47, %v662_v52  ;;  %v1045_v13 = vsub.f32 1.0, %v917_v55 }
  0x3d   :  { %v1425_v63 = vmul.f32 -0.03274596, %v3161_v7  ;;  %v1426_v11 = vmul.f32 -0.03274596, %v3165_v2  ;;  %v3174_v0 = vmul.f32 %v1044_v54, %v404_v38  ;;  %v535_v12 = vmul.f32 0.5, %v279_v53 }
  0x3e   :  { %v1552_v3 = vadd.f32 0.36496454, %v1424_v57  ;;  %v1427_v4 = vmul.f32 -0.03274596, %v3170_v58  ;;  %v918_v8 = vmul.f32 4.0, %v790_v60  ;;  %v3181_v17 = vmul.f32 %v1045_v13, %v405_v46 }
  0x3f   :  { %v1553_v14 = vadd.f32 0.36496454, %v1425_v63  ;;  %v1554_v15 = vadd.f32 0.36496454, %v1426_v11  ;;  %v3179_v18 = vmul.f32 %v3174_v0, %v3174_v0  ;;  %v663_v23 = vfloor.f32 %v535_v12 }
  0x40   :  { %v1680_v19 = vmul.f32 %v1552_v3, %v3154_v1  ;;  %v1555_v21 = vadd.f32 0.36496454, %v1427_v4  ;;  %v1046_v22 = vsub.f32 1.0, %v918_v8  ;;  %v3189_v26 = vmul.f32 %v3181_v17, %v3181_v17 }
  0x41   :  { %v1681_v24 = vmul.f32 %v1553_v14, %v3161_v7  ;;  %v1682_v25 = vmul.f32 %v1554_v15, %v3165_v2  ;;  %v1428_v29 = vmul.f32 -0.03274596, %v3179_v18  ;;  %v791_v31 = vsub.f32 %v535_v12, %v663_v23 }
  0x42   :  { %v1808_v27 = vadd.f32 -2.6624622, %v1680_v19  ;;  %v1683_v28 = vmul.f32 %v1555_v21, %v3170_v58  ;;  %v3192_v30 = vmul.f32 %v1046_v22, %v406_v59  ;;  %v1429_v37 = vmul.f32 -0.03274596, %v3189_v26 }
  0x43   :  { %v1809_v32 = vadd.f32 -2.6624622, %v1681_v24  ;;  %v1810_v33 = vadd.f32 -2.6624622, %v1682_v25  ;;  %v1556_v34 = vadd.f32 0.36496454, %v1428_v29  ;;  %v407_v20 = vsub.f32 %v3137_v56, %v279_v53 }
  0x44   :  { %v1936_v35 = vmul.f32 %v1808_v27, %v3154_v1  ;;  %v1811_v36 = vadd.f32 -2.6624622, %v1683_v28  ;;  %v3198_v38 = vmul.f32 %v3192_v30, %v3192_v30  ;;  %v919_v6 = vmul.f32 4.0, %v791_v31  ;;  %v24_v25 = vld [vmem:[%s5297_s0 + $0x80] sm:$0xff] }
  0x45   :  { %v1937_v39 = vmul.f32 %v1809_v32, %v3161_v7  ;;  %v1938_v40 = vmul.f32 %v1810_v33, %v3165_v2  ;;  %v1684_v5 = vmul.f32 %v1556_v34, %v3179_v18  ;;  %v1557_v10 = vadd.f32 0.36496454, %v1429_v37  ;;  %v26_v33 = vld [vmem:[%s5297_s0 + $0x90] sm:$0xff]  ;;  %v27_v37 = vld [vmem:[%s5297_s0 + $0x98] sm:$0xff] }
  0x46   :  { %v2064_v41 = vadd.f32 11.33008, %v1936_v35  ;;  %v1939_v9 = vmul.f32 %v1811_v36, %v3170_v58  ;;  %v1430_v42 = vmul.f32 -0.03274596, %v3198_v38  ;;  %v1047_v55 = vsub.f32 1.0, %v919_v6 }
  0x47   :  { %v2065_v16 = vadd.f32 11.33008, %v1937_v39  ;;  %v2066_v43 = vadd.f32 11.33008, %v1938_v40  ;;  %v1812_v48 = vadd.f32 -2.6624622, %v1684_v5  ;;  %v1685_v47 = vmul.f32 %v1557_v10, %v3189_v26 }
  0x48   :  { %v2192_v45 = vmul.f32 %v2064_v41, %v3154_v1  ;;  %v2067_v46 = vadd.f32 11.33008, %v1939_v9  ;;  %v1558_v62 = vadd.f32 0.36496454, %v1430_v42  ;;  %v3213_v13 = vmul.f32 %v1047_v55, %v407_v20 }
  0x49   :  { %v2193_v50 = vmul.f32 %v2065_v16, %v3161_v7  ;;  %v2194_v52 = vmul.f32 %v2066_v43, %v3165_v2  ;;  %v1940_v54 = vmul.f32 %v1812_v48, %v3179_v18  ;;  %v1813_v60 = vadd.f32 -2.6624622, %v1685_v47 }
  0x4a   :  { %v2320_v57 = vadd.f32 -22.959543, %v2192_v45  ;;  %v2195_v59 = vmul.f32 %v2067_v46, %v3170_v58  ;;  %v1686_v63 = vmul.f32 %v1558_v62, %v3198_v38  ;;  %v3222_v21 = vmul.f32 %v3213_v13, %v3213_v13  ;;  %v28_v62 = vld [vmem:[%s5297_s0 + $0xa0] sm:$0xff] }
  0x4b   :  { %v2321_v56 = vadd.f32 -22.959543, %v2193_v50  ;;  %v2322_v53 = vadd.f32 -22.959543, %v2194_v52  ;;  %v2068_v11 = vadd.f32 11.33008, %v1940_v54  ;;  %v1941_v8 = vmul.f32 %v1813_v60, %v3189_v26 }
  0x4c   :  { %v2448_v3 = vmul.f32 %v2320_v57, %v3154_v1  ;;  %v2323_v4 = vadd.f32 -22.959543, %v2195_v59  ;;  %v1814_v12 = vadd.f32 -2.6624622, %v1686_v63  ;;  %v154_v41 = vadd.f32 0.5, %v26_v33  ;;  %v29_v54 = vld [vmem:[%s5297_s0 + $0xa8] sm:$0xff] }
  0x4d   :  { %v2449_v14 = vmul.f32 %v2321_v56, %v3161_v7  ;;  %v2450_v15 = vmul.f32 %v2322_v53, %v3165_v2  ;;  %v2196_v19 = vmul.f32 %v2068_v11, %v3179_v18  ;;  %v2069_v24 = vadd.f32 11.33008, %v1941_v8 }
  0x4e   :  { %v2576_v22 = vadd.f32 13.957728, %v2448_v3  ;;  %v2451_v23 = vmul.f32 %v2323_v4, %v3170_v58  ;;  %v1942_v1 = vmul.f32 %v1814_v12, %v3198_v38  ;;  %v25_v58 = vld [vmem:[%s5297_s0 + $0x88] sm:$0xff]  ;;  %v155_v42 = vadd.f32 0.5, %v27_v37 }
  0x4f   :  { %v2577_v29 = vadd.f32 13.957728, %v2449_v14  ;;  %v2578_v7 = vadd.f32 13.957728, %v2450_v15  ;;  %v2324_v27 = vadd.f32 -22.959543, %v2196_v19  ;;  %v2197_v31 = vmul.f32 %v2069_v24, %v3189_v26 }
  0x50   :  { %v2704_v2 = vmul.f32 %v2576_v22, %v3146_v44  ;;  %v2579_v28 = vadd.f32 13.957728, %v2451_v23  ;;  %v2070_v32 = vadd.f32 11.33008, %v1942_v1  ;;  %v1431_v44 = vmul.f32 -0.03274596, %v3222_v21 }
  0x51   :  { %v2705_v34 = vmul.f32 %v2577_v29, %v3148_v49  ;;  %v2706_v35 = vmul.f32 %v2578_v7, %v3150_v61  ;;  %v2452_v36 = vmul.f32 %v2324_v27, %v3179_v18  ;;  %v2325_v40 = vadd.f32 -22.959543, %v2197_v31 }
  0x52   :  { %2832 = vst [vmem:[%s5298_s1 + $0x40] sm:$0xff] %v2704_v2  ;;  %v2707_v39 = vmul.f32 %v2579_v28, %v3156_v51  ;;  %v2198_v5 = vmul.f32 %v2070_v32, %v3198_v38  ;;  %v152_v49 = vadd.f32 0.5, %v24_v25  ;;  %v1559_v18 = vadd.f32 0.36496454, %v1431_v44 }
  0x53   :  { %2833 = vst [vmem:[%s5298_s1 + $0x48] sm:$0xff] %v2705_v34  ;;  %2834 = vst [vmem:[%s5298_s1 + $0x50] sm:$0xff] %v2706_v35  ;;  %v2580_v61 = vadd.f32 13.957728, %v2452_v36  ;;  %v153_v6 = vadd.f32 0.5, %v25_v58  ;;  %v2453_v51 = vmul.f32 %v2325_v40, %v3189_v26  ;;  %v282_v20 = vfloor.f32 %v154_v41 }
  0x54   :  { %2835 = vst [vmem:[%s5298_s1 + $0x58] sm:$0xff] %v2707_v39  ;;  %v2326_v9 = vadd.f32 -22.959543, %v2198_v5  ;;  %v280_v10 = vfloor.f32 %v152_v49  ;;  %v1687_v43 = vmul.f32 %v1559_v18, %v3222_v21  ;;  %v283_v56 = vfloor.f32 %v155_v42 }
  0x55   :  { %v2708_v16 = vmul.f32 %v2580_v61, %v3174_v0  ;;  %v281_v48 = vfloor.f32 %v153_v6  ;;  %v2581_v45 = vadd.f32 13.957728, %v2453_v51  ;;  %v538_v59 = vmul.f32 0.5, %v282_v20 }
  0x56   :  { %v2454_v46 = vmul.f32 %v2326_v9, %v3198_v38  ;;  %v536_v47 = vmul.f32 0.5, %v280_v10  ;;  %v1815_v26 = vadd.f32 -2.6624622, %v1687_v43  ;;  %v408_v50 = vsub.f32 %v24_v25, %v280_v10 }
  0x57   :  { %2836 = vst [vmem:[%s5298_s1 + $0x60] sm:$0xff] %v2708_v16  ;;  %v409_v52 = vsub.f32 %v25_v58, %v281_v48  ;;  %v537_v0 = vmul.f32 0.5, %v281_v48  ;;  %v2709_v55 = vmul.f32 %v2581_v45, %v3181_v17  ;;  %v156_v53 = vadd.f32 0.5, %v28_v62  ;;  %v3280_v17 = vld [vmem:[%s5297_s0 + $0xb0] sm:$0xff] }
  0x58   :  { %v2582_v38 = vadd.f32 13.957728, %v2454_v46  ;;  %v664_v57 = vfloor.f32 %v536_v47  ;;  %v1943_v60 = vmul.f32 %v1815_v26, %v3222_v21  ;;  %v666_v4 = vfloor.f32 %v538_v59 }
  0x59   :  { %v665_v63 = vfloor.f32 %v537_v0  ;;  %2837 = vst [vmem:[%s5298_s1 + $0x68] sm:$0xff] %v2709_v55  ;;  %v157_v8 = vadd.f32 0.5, %v29_v54  ;;  %v410_v15 = vsub.f32 %v26_v33, %v282_v20  ;;  %v539_v19 = vmul.f32 0.5, %v283_v56  ;;  %v31_v20 = vld [vmem:[%s5297_s0 + $0xb8] sm:$0xff] }
  0x5a   :  { %v2710_v11 = vmul.f32 %v2582_v38, %v3192_v30  ;;  %v792_v3 = vsub.f32 %v536_v47, %v664_v57  ;;  %v2071_v12 = vadd.f32 11.33008, %v1943_v60  ;;  %v794_v23 = vsub.f32 %v538_v59, %v666_v4 }
  0x5b   :  { %v793_v14 = vsub.f32 %v537_v0, %v665_v63  ;;  %v284_v24 = vfloor.f32 %v156_v53  ;;  %v285_v30 = vfloor.f32 %v157_v8  ;;  %v667_v29 = vfloor.f32 %v539_v19 }
  0x5c   :  { %2838 = vst [vmem:[%s5298_s1 + $0x70] sm:$0xff] %v2710_v11  ;;  %v920_v22 = vmul.f32 4.0, %v792_v3  ;;  %v2199_v1 = vmul.f32 %v2071_v12, %v3222_v21  ;;  %v158_v7 = vadd.f32 0.5, %v3280_v17  ;;  %v922_v2 = vmul.f32 4.0, %v794_v23 }
  0x5d   :  { %v921_v25 = vmul.f32 4.0, %v793_v14  ;;  %v411_v28 = vsub.f32 %v27_v37, %v283_v56  ;;  %v540_v31 = vmul.f32 0.5, %v284_v24  ;;  %v795_v33 = vsub.f32 %v539_v19, %v667_v29 }
  0x5e   :  { %v1048_v27 = vsub.f32 1.0, %v920_v22  ;;  %v2327_v32 = vadd.f32 -22.959543, %v2199_v1  ;;  %v412_v34 = vsub.f32 %v28_v62, %v284_v24  ;;  %v1050_v36 = vsub.f32 1.0, %v922_v2 }
  0x5f   :  { %v1049_v58 = vsub.f32 1.0, %v921_v25  ;;  %v668_v44 = vfloor.f32 %v540_v31  ;;  %v541_v39 = vmul.f32 0.5, %v285_v30  ;;  %v923_v49 = vmul.f32 4.0, %v795_v33 }
  0x60   :  { %v3287_v35 = vmul.f32 %v1048_v27, %v408_v50  ;;  %v2455_v40 = vmul.f32 %v2327_v32, %v3222_v21  ;;  %v286_v61 = vfloor.f32 %v158_v7  ;;  %v3296_v37 = vmul.f32 %v1050_v36, %v410_v15 }
  0x61   :  { %v3290_v5 = vmul.f32 %v1049_v58, %v409_v52  ;;  %v796_v6 = vsub.f32 %v540_v31, %v668_v44  ;;  %v669_v41 = vfloor.f32 %v541_v39  ;;  %v1051_v10 = vsub.f32 1.0, %v923_v49 }
  0x62   :  { %v3294_v18 = vmul.f32 %v3287_v35, %v3287_v35  ;;  %v2583_v51 = vadd.f32 13.957728, %v2455_v40  ;;  %v413_v42 = vsub.f32 %v29_v54, %v285_v30  ;;  %v3305_v16 = vmul.f32 %v3296_v37, %v3296_v37 }
  0x63   :  { %v3300_v9 = vmul.f32 %v3290_v5, %v3290_v5  ;;  %v924_v43 = vmul.f32 4.0, %v796_v6  ;;  %v797_v48 = vsub.f32 %v541_v39, %v669_v41  ;;  %v3312_v47 = vmul.f32 %v1051_v10, %v411_v28 }
  0x64   :  { %v1432_v21 = vmul.f32 -0.03274596, %v3294_v18  ;;  %v2711_v45 = vmul.f32 %v2583_v51, %v3213_v13  ;;  %v542_v62 = vmul.f32 0.5, %v286_v61  ;;  %v1434_v50 = vmul.f32 -0.03274596, %v3305_v16 }
  0x65   :  { %v1433_v46 = vmul.f32 -0.03274596, %v3300_v9  ;;  %v1052_v52 = vsub.f32 1.0, %v924_v43  ;;  %v925_v0 = vmul.f32 4.0, %v797_v48  ;;  %v3320_v55 = vmul.f32 %v3312_v47, %v3312_v47 }
  0x66   :  { %v1560_v26 = vadd.f32 0.36496454, %v1432_v21  ;;  %2839 = vst [vmem:[%s5298_s1 + $0x78] sm:$0xff] %v2711_v45  ;;  %v670_v13 = vfloor.f32 %v542_v62  ;;  %v159_v38 = vadd.f32 0.5, %v31_v20  ;;  %v1562_v59 = vadd.f32 0.36496454, %v1434_v50 }
  0x67   :  { %v1561_v54 = vadd.f32 0.36496454, %v1433_v46  ;;  %v3323_v60 = vmul.f32 %v1052_v52, %v412_v34  ;;  %v1053_v63 = vsub.f32 1.0, %v925_v0  ;;  %v1435_v53 = vmul.f32 -0.03274596, %v3320_v55 }
  0x68   :  { %v1688_v57 = vmul.f32 %v1560_v26, %v3294_v18  ;;  %v798_v11 = vsub.f32 %v542_v62, %v670_v13  ;;  %v287_v3 = vfloor.f32 %v159_v38  ;;  %v1690_v8 = vmul.f32 %v1562_v59, %v3305_v16 }
  0x69   :  { %v1689_v56 = vmul.f32 %v1561_v54, %v3300_v9  ;;  %v3330_v12 = vmul.f32 %v3323_v60, %v3323_v60  ;;  %v3332_v14 = vmul.f32 %v1053_v63, %v413_v42  ;;  %v1563_v19 = vadd.f32 0.36496454, %v1435_v53 }
  0x6a   :  { %v1816_v4 = vadd.f32 -2.6624622, %v1688_v57  ;;  %v414_v22 = vsub.f32 %v3280_v17, %v286_v61  ;;  %v926_v23 = vmul.f32 4.0, %v798_v11  ;;  %v1818_v30 = vadd.f32 -2.6624622, %v1690_v8 }
  0x6b   :  { %v1817_v15 = vadd.f32 -2.6624622, %v1689_v56  ;;  %v1436_v1 = vmul.f32 -0.03274596, %v3330_v12  ;;  %v3339_v25 = vmul.f32 %v3332_v14, %v3332_v14  ;;  %v1691_v7 = vmul.f32 %v1563_v19, %v3320_v55 }
  0x6c   :  { %v1944_v24 = vmul.f32 %v1816_v4, %v3294_v18  ;;  %v1054_v27 = vsub.f32 1.0, %v926_v23  ;;  %v543_v2 = vmul.f32 0.5, %v287_v3  ;;  %v1946_v31 = vmul.f32 %v1818_v30, %v3305_v16  ;;  %v32_v4 = vld [vmem:[%s5297_s0 + $0xc0] sm:$0xff] }
  0x6d   :  { %v1945_v29 = vmul.f32 %v1817_v15, %v3300_v9  ;;  %v1564_v17 = vadd.f32 0.36496454, %v1436_v1  ;;  %v1437_v32 = vmul.f32 -0.03274596, %v3339_v25  ;;  %v1819_v33 = vadd.f32 -2.6624622, %v1691_v7 }
  0x6e   :  { %v2072_v28 = vadd.f32 11.33008, %v1944_v24  ;;  %v3345_v34 = vmul.f32 %v1054_v27, %v414_v22  ;;  %v671_v36 = vfloor.f32 %v543_v2  ;;  %v2074_v39 = vadd.f32 11.33008, %v1946_v31  ;;  %v34_v1 = vld [vmem:[%s5297_s0 + $0xd0] sm:$0xff] }
  0x6f   :  { %v2073_v58 = vadd.f32 11.33008, %v1945_v29  ;;  %v1692_v40 = vmul.f32 %v1564_v17, %v3330_v12  ;;  %v1565_v49 = vadd.f32 0.36496454, %v1437_v32  ;;  %v1947_v6 = vmul.f32 %v1819_v33, %v3320_v55 }
  0x70   :  { %v2200_v44 = vmul.f32 %v2072_v28, %v3294_v18  ;;  %v3353_v41 = vmul.f32 %v3345_v34, %v3345_v34  ;;  %v799_v51 = vsub.f32 %v543_v2, %v671_v36  ;;  %v2202_v42 = vmul.f32 %v2074_v39, %v3305_v16 }
  0x71   :  { %v2201_v61 = vmul.f32 %v2073_v58, %v3300_v9  ;;  %v1820_v21 = vadd.f32 -2.6624622, %v1692_v40  ;;  %v1693_v43 = vmul.f32 %v1565_v49, %v3339_v25  ;;  %v2075_v45 = vadd.f32 11.33008, %v1947_v6 }
  0x72   :  { %v2328_v10 = vadd.f32 -22.959543, %v2200_v44  ;;  %v1438_v46 = vmul.f32 -0.03274596, %v3353_v41  ;;  %v415_v62 = vsub.f32 %v31_v20, %v287_v3  ;;  %v2330_v50 = vadd.f32 -22.959543, %v2202_v42 }
  0x73   :  { %v2329_v48 = vadd.f32 -22.959543, %v2201_v61  ;;  %v1948_v52 = vmul.f32 %v1820_v21, %v3330_v12  ;;  %v1821_v0 = vadd.f32 -2.6624622, %v1693_v43  ;;  %v2203_v13 = vmul.f32 %v2075_v45, %v3320_v55  ;;  %v35_v61 = vld [vmem:[%s5297_s0 + $0xd8] sm:$0xff] }
  0x74   :  { %v2456_v26 = vmul.f32 %v2328_v10, %v3294_v18  ;;  %v1566_v38 = vadd.f32 0.36496454, %v1438_v46  ;;  %v927_v57 = vmul.f32 4.0, %v799_v51  ;;  %v2458_v63 = vmul.f32 %v2330_v50, %v3305_v16  ;;  %v33_v16 = vld [vmem:[%s5297_s0 + $0xc8] sm:$0xff] }
  0x75   :  { %v2457_v54 = vmul.f32 %v2329_v48, %v3300_v9  ;;  %v2076_v56 = vadd.f32 11.33008, %v1948_v52  ;;  %v1949_v53 = vmul.f32 %v1821_v0, %v3339_v25  ;;  %v2331_v20 = vadd.f32 -22.959543, %v2203_v13 }
  0x76   :  { %v2584_v59 = vadd.f32 13.957728, %v2456_v26  ;;  %v1694_v18 = vmul.f32 %v1566_v38, %v3353_v41  ;;  %v1055_v3 = vsub.f32 1.0, %v927_v57  ;;  %v2586_v8 = vadd.f32 13.957728, %v2458_v63  ;;  %v37_v26 = vld [vmem:[%s5297_s0 + $0xe8] sm:$0xff] }
  0x77   :  { %v2585_v11 = vadd.f32 13.957728, %v2457_v54  ;;  %v2204_v15 = vmul.f32 %v2076_v56, %v3330_v12  ;;  %v2077_v19 = vadd.f32 11.33008, %v1949_v53  ;;  %v2459_v23 = vmul.f32 %v2331_v20, %v3320_v55 }
  0x78   :  { %v2712_v9 = vmul.f32 %v2584_v59, %v3287_v35  ;;  %v1822_v24 = vadd.f32 -2.6624622, %v1694_v18  ;;  %v3375_v30 = vmul.f32 %v1055_v3, %v415_v62  ;;  %v2714_v35 = vmul.f32 %v2586_v8, %v3296_v37  ;;  %v36_v62 = vld [vmem:[%s5297_s0 + $0xe0] sm:$0xff] }
  0x79   :  { %v2713_v22 = vmul.f32 %v2585_v11, %v3290_v5  ;;  %v2332_v29 = vadd.f32 -22.959543, %v2204_v15  ;;  %v2205_v7 = vmul.f32 %v2077_v19, %v3339_v25  ;;  %v160_v27 = vadd.f32 0.5, %v32_v4 }
  0x7a   :  { %2840 = vst [vmem:[%s5298_s1 + $0x80] sm:$0xff] %v2712_v9  ;;  %v2587_v5 = vadd.f32 13.957728, %v2459_v23  ;;  %v1950_v55 = vmul.f32 %v1822_v24, %v3353_v41  ;;  %v3391_v2 = vmul.f32 %v3375_v30, %v3375_v30  ;;  %v161_v28 = vadd.f32 0.5, %v33_v16  ;;  %2842 = vst [vmem:[%s5298_s1 + $0x90] sm:$0xff] %v2714_v35 }
  0x7b   :  { %2841 = vst [vmem:[%s5298_s1 + $0x88] sm:$0xff] %v2713_v22  ;;  %v2460_v37 = vmul.f32 %v2332_v29, %v3330_v12  ;;  %v2333_v31 = vadd.f32 -22.959543, %v2205_v7  ;;  %v288_v17 = vfloor.f32 %v160_v27  ;;  %v162_v32 = vadd.f32 0.5, %v34_v1  ;;  %v38_v29 = vld [vmem:[%s5297_s0 + $0xf0] sm:$0xff] }
  0x7c   :  { %v2715_v58 = vmul.f32 %v2587_v5, %v3312_v47  ;;  %v2078_v33 = vadd.f32 11.33008, %v1950_v55  ;;  %v1439_v36 = vmul.f32 -0.03274596, %v3391_v2  ;;  %v289_v44 = vfloor.f32 %v161_v28 }
  0x7d   :  { %v2588_v39 = vadd.f32 13.957728, %v2460_v37  ;;  %v2461_v40 = vmul.f32 %v2333_v31, %v3339_v25  ;;  %v544_v49 = vmul.f32 0.5, %v288_v17  ;;  %v416_v47 = vsub.f32 %v32_v4, %v288_v17 }
  0x7e   :  { %2843 = vst [vmem:[%s5298_s1 + $0x98] sm:$0xff] %v2715_v58  ;;  %v2206_v12 = vmul.f32 %v2078_v33, %v3353_v41  ;;  %v1567_v6 = vadd.f32 0.36496454, %v1439_v36  ;;  %v545_v51 = vmul.f32 0.5, %v289_v44  ;;  %v290_v43 = vfloor.f32 %v162_v32 }
  0x7f   :  { %v2716_v10 = vmul.f32 %v2588_v39, %v3323_v60  ;;  %v2589_v42 = vadd.f32 13.957728, %v2461_v40  ;;  %v672_v21 = vfloor.f32 %v544_v49  ;;  %v163_v46 = vadd.f32 0.5, %v35_v61 }
  0x80   :  { %v2334_v25 = vadd.f32 -22.959543, %v2206_v12  ;;  %v1695_v48 = vmul.f32 %v1567_v6, %v3391_v2  ;;  %v673_v45 = vfloor.f32 %v545_v51  ;;  %v417_v52 = vsub.f32 %v33_v16, %v289_v44 }
  0x81   :  { %2844 = vst [vmem:[%s5298_s1 + $0xa0] sm:$0xff] %v2716_v10  ;;  %v2717_v60 = vmul.f32 %v2589_v42, %v3332_v14  ;;  %v800_v50 = vsub.f32 %v544_v49, %v672_v21  ;;  %v546_v0 = vmul.f32 0.5, %v290_v43  ;;  %v291_v57 = vfloor.f32 %v163_v46 }
  0x82   :  { %v2462_v54 = vmul.f32 %v2334_v25, %v3353_v41  ;;  %v1823_v13 = vadd.f32 -2.6624622, %v1695_v48  ;;  %v801_v38 = vsub.f32 %v545_v51, %v673_v45  ;;  %v164_v56 = vadd.f32 0.5, %v36_v62 }
  0x83   :  { %2845 = vst [vmem:[%s5298_s1 + $0xa8] sm:$0xff] %v2717_v60  ;;  %v928_v59 = vmul.f32 4.0, %v800_v50  ;;  %v674_v63 = vfloor.f32 %v546_v0  ;;  %v165_v53 = vadd.f32 0.5, %v37_v26  ;;  %v418_v18 = vsub.f32 %v34_v1, %v290_v43 }
  0x84   :  { %v2590_v11 = vadd.f32 13.957728, %v2462_v54  ;;  %v1951_v20 = vmul.f32 %v1823_v13, %v3391_v2  ;;  %v929_v14 = vmul.f32 4.0, %v801_v38  ;;  %v547_v9 = vmul.f32 0.5, %v291_v57 }
  0x85   :  { %v1056_v3 = vsub.f32 1.0, %v928_v59  ;;  %v802_v4 = vsub.f32 %v546_v0, %v674_v63  ;;  %v292_v41 = vfloor.f32 %v164_v56  ;;  %v293_v16 = vfloor.f32 %v165_v53 }
  0x86   :  { %v2718_v8 = vmul.f32 %v2590_v11, %v3345_v34  ;;  %v2079_v15 = vadd.f32 11.33008, %v1951_v20  ;;  %v1057_v19 = vsub.f32 1.0, %v929_v14  ;;  %v419_v24 = vsub.f32 %v35_v61, %v291_v57 }
  0x87   :  { %v3425_v22 = vmul.f32 %v1056_v3, %v416_v47  ;;  %v930_v23 = vmul.f32 4.0, %v802_v4  ;;  %v675_v35 = vfloor.f32 %v547_v9  ;;  %v420_v34 = vsub.f32 %v36_v62, %v292_v41  ;;  %v39_v62 = vld [vmem:[%s5297_s0 + $0xf8] sm:$0xff] }
  0x88   :  { %2846 = vst [vmem:[%s5298_s1 + $0xb0] sm:$0xff] %v2718_v8  ;;  %v2207_v1 = vmul.f32 %v2079_v15, %v3391_v2  ;;  %v3434_v7 = vmul.f32 %v1057_v19, %v417_v52  ;;  %v548_v27 = vmul.f32 0.5, %v292_v41  ;;  %v549_v37 = vmul.f32 0.5, %v293_v16 }
  0x89   :  { %v3438_v5 = vmul.f32 %v3425_v22, %v3425_v22  ;;  %v1058_v55 = vsub.f32 1.0, %v930_v23  ;;  %v803_v28 = vsub.f32 %v547_v9, %v675_v35  ;;  %v166_v58 = vadd.f32 0.5, %v38_v29 }
  0x8a   :  { %v2335_v31 = vadd.f32 -22.959543, %v2207_v1  ;;  %v3442_v17 = vmul.f32 %v3434_v7, %v3434_v7  ;;  %v676_v32 = vfloor.f32 %v548_v27  ;;  %v677_v39 = vfloor.f32 %v549_v37 }
  0x8b   :  { %v1440_v33 = vmul.f32 -0.03274596, %v3438_v5  ;;  %v3445_v36 = vmul.f32 %v1058_v55, %v418_v18  ;;  %v931_v44 = vmul.f32 4.0, %v803_v28  ;;  %v294_v12 = vfloor.f32 %v166_v58 }
  0x8c   :  { %v2463_v40 = vmul.f32 %v2335_v31, %v3391_v2  ;;  %v1441_v49 = vmul.f32 -0.03274596, %v3442_v17  ;;  %v804_v61 = vsub.f32 %v548_v27, %v676_v32  ;;  %v805_v10 = vsub.f32 %v549_v37, %v677_v39 }
  0x8d   :  { %v1568_v6 = vadd.f32 0.36496454, %v1440_v33  ;;  %v3451_v47 = vmul.f32 %v3445_v36, %v3445_v36  ;;  %v1059_v51 = vsub.f32 1.0, %v931_v44  ;;  %v421_v25 = vsub.f32 %v37_v26, %v293_v16 }
  0x8e   :  { %v2591_v42 = vadd.f32 13.957728, %v2463_v40  ;;  %v1569_v21 = vadd.f32 0.36496454, %v1441_v49  ;;  %v932_v43 = vmul.f32 4.0, %v804_v61  ;;  %v933_v46 = vmul.f32 4.0, %v805_v10 }
  0x8f   :  { %v1696_v48 = vmul.f32 %v1568_v6, %v3438_v5  ;;  %v1442_v45 = vmul.f32 -0.03274596, %v3451_v47  ;;  %v3455_v2 = vmul.f32 %v1059_v51, %v419_v24  ;;  %v550_v0 = vmul.f32 0.5, %v294_v12 }
  0x90   :  { %v2719_v60 = vmul.f32 %v2591_v42, %v3375_v30  ;;  %v1697_v50 = vmul.f32 %v1569_v21, %v3442_v17  ;;  %v1060_v52 = vsub.f32 1.0, %v932_v43  ;;  %v1061_v38 = vsub.f32 1.0, %v933_v46 }
  0x91   :  { %v1824_v54 = vadd.f32 -2.6624622, %v1696_v48  ;;  %v1570_v13 = vadd.f32 0.36496454, %v1442_v45  ;;  %v3464_v26 = vmul.f32 %v3455_v2, %v3455_v2  ;;  %v678_v63 = vfloor.f32 %v550_v0 }
  0x92   :  { %2847 = vst [vmem:[%s5298_s1 + $0xb8] sm:$0xff] %v2719_v60  ;;  %v1825_v57 = vadd.f32 -2.6624622, %v1697_v50  ;;  %v3469_v59 = vmul.f32 %v1060_v52, %v420_v34  ;;  %v167_v30 = vadd.f32 0.5, %v39_v62  ;;  %v3474_v20 = vmul.f32 %v1061_v38, %v421_v25  ;;  %v40_v25 = vld [vmem:[%s5297_s0 + $0x100] sm:$0xff]  ;;  %v41_v38 = vld [vmem:[%s5297_s0 + $0x108] sm:$0xff] }
  0x93   :  { %v1952_v56 = vmul.f32 %v1824_v54, %v3438_v5  ;;  %v1698_v53 = vmul.f32 %v1570_v13, %v3451_v47  ;;  %v1443_v11 = vmul.f32 -0.03274596, %v3464_v26  ;;  %v806_v3 = vsub.f32 %v550_v0, %v678_v63 }
  0x94   :  { %v1953_v14 = vmul.f32 %v1825_v57, %v3442_v17  ;;  %v3479_v18 = vmul.f32 %v3469_v59, %v3469_v59  ;;  %v295_v4 = vfloor.f32 %v167_v30  ;;  %v3483_v15 = vmul.f32 %v3474_v20, %v3474_v20 }
  0x95   :  { %v2080_v9 = vadd.f32 11.33008, %v1952_v56  ;;  %v1826_v41 = vadd.f32 -2.6624622, %v1698_v53  ;;  %v1571_v8 = vadd.f32 0.36496454, %v1443_v11  ;;  %v422_v23 = vsub.f32 %v38_v29, %v294_v12 }
  0x96   :  { %v2081_v19 = vadd.f32 11.33008, %v1953_v14  ;;  %v1444_v16 = vmul.f32 -0.03274596, %v3479_v18  ;;  %v934_v24 = vmul.f32 4.0, %v806_v3  ;;  %v551_v31 = vmul.f32 0.5, %v295_v4 }
  0x97   :  { %v2208_v35 = vmul.f32 %v2080_v9, %v3438_v5  ;;  %v1954_v1 = vmul.f32 %v1826_v41, %v3451_v47  ;;  %v1699_v34 = vmul.f32 %v1571_v8, %v3464_v26  ;;  %v1445_v27 = vmul.f32 -0.03274596, %v3483_v15 }
  0x98   :  { %v2209_v55 = vmul.f32 %v2081_v19, %v3442_v17  ;;  %v1572_v28 = vadd.f32 0.36496454, %v1444_v16  ;;  %v1062_v37 = vsub.f32 1.0, %v934_v24  ;;  %v423_v44 = vsub.f32 %v39_v62, %v295_v4 }
  0x99   :  { %v2336_v32 = vadd.f32 -22.959543, %v2208_v35  ;;  %v2082_v58 = vadd.f32 11.33008, %v1954_v1  ;;  %v1827_v33 = vadd.f32 -2.6624622, %v1699_v34  ;;  %v679_v51 = vfloor.f32 %v551_v31 }
  0x9a   :  { %v2337_v39 = vadd.f32 -22.959543, %v2209_v55  ;;  %v1700_v29 = vmul.f32 %v1572_v28, %v3479_v18  ;;  %v1573_v40 = vadd.f32 0.36496454, %v1445_v27  ;;  %v3492_v49 = vmul.f32 %v1062_v37, %v422_v23 }
  0x9b   :  { %v2464_v61 = vmul.f32 %v2336_v32, %v3438_v5  ;;  %v2210_v12 = vmul.f32 %v2082_v58, %v3451_v47  ;;  %v1955_v6 = vmul.f32 %v1827_v33, %v3464_v26  ;;  %v807_v46 = vsub.f32 %v551_v31, %v679_v51  ;;  %v43_v32 = vld [vmem:[%s5297_s0 + $0x118] sm:$0xff] }
  0x9c   :  { %v2465_v10 = vmul.f32 %v2337_v39, %v3442_v17  ;;  %v1828_v42 = vadd.f32 -2.6624622, %v1700_v29  ;;  %v1701_v21 = vmul.f32 %v1573_v40, %v3483_v15  ;;  %v3501_v43 = vmul.f32 %v3492_v49, %v3492_v49 }
  0x9d   :  { %v2592_v48 = vadd.f32 13.957728, %v2464_v61  ;;  %v2338_v5 = vadd.f32 -22.959543, %v2210_v12  ;;  %v2083_v45 = vadd.f32 11.33008, %v1955_v6 }
  0x9e   :  { %v2593_v62 = vadd.f32 13.957728, %v2465_v10  ;;  %v1956_v60 = vmul.f32 %v1828_v42, %v3479_v18  ;;  %v1829_v50 = vadd.f32 -2.6624622, %v1701_v21  ;;  %v1446_v17 = vmul.f32 -0.03274596, %v3501_v43 }
  0x9f   :  { %v2720_v52 = vmul.f32 %v2592_v48, %v3425_v22  ;;  %v2466_v0 = vmul.f32 %v2338_v5, %v3451_v47  ;;  %v2211_v54 = vmul.f32 %v2083_v45, %v3464_v26  ;;  %v935_v13 = vmul.f32 4.0, %v807_v46  ;;  %v44_v46 = vld [vmem:[%s5297_s0 + $0x120] sm:$0xff] }
  0xa0   :  { %v2721_v57 = vmul.f32 %v2593_v62, %v3434_v7  ;;  %v2084_v63 = vadd.f32 11.33008, %v1956_v60  ;;  %v1957_v30 = vmul.f32 %v1829_v50, %v3483_v15  ;;  %v1574_v56 = vadd.f32 0.36496454, %v1446_v17  ;;  %v45_v17 = vld [vmem:[%s5297_s0 + $0x128] sm:$0xff] }
  0xa1   :  { %2848 = vst [vmem:[%s5298_s1 + $0xc0] sm:$0xff] %v2720_v52  ;;  %v2594_v22 = vadd.f32 13.957728, %v2466_v0  ;;  %v2339_v53 = vadd.f32 -22.959543, %v2211_v54  ;;  %v1063_v47 = vsub.f32 1.0, %v935_v13 }
  0xa2   :  { %v168_v11 = vadd.f32 0.5, %v40_v25  ;;  %2849 = vst [vmem:[%s5298_s1 + $0xc8] sm:$0xff] %v2721_v57  ;;  %v2212_v14 = vmul.f32 %v2084_v63, %v3479_v18  ;;  %v2085_v3 = vadd.f32 11.33008, %v1957_v30  ;;  %v1702_v7 = vmul.f32 %v1574_v56, %v3501_v43 }
  0xa3   :  { %v169_v4 = vadd.f32 0.5, %v41_v38  ;;  %v2722_v9 = vmul.f32 %v2594_v22, %v3445_v36  ;;  %v2467_v41 = vmul.f32 %v2339_v53, %v3464_v26  ;;  %v3526_v8 = vmul.f32 %v1063_v47, %v423_v44  ;;  %v42_v26 = vld [vmem:[%s5297_s0 + $0x110] sm:$0xff] }
  0xa4   :  { %v296_v19 = vfloor.f32 %v168_v11  ;;  %v2340_v16 = vadd.f32 -22.959543, %v2212_v14  ;;  %v2213_v23 = vmul.f32 %v2085_v3, %v3483_v15  ;;  %v1830_v24 = vadd.f32 -2.6624622, %v1702_v7 }
  0xa5   :  { %v297_v35 = vfloor.f32 %v169_v4  ;;  %2850 = vst [vmem:[%s5298_s1 + $0xd0] sm:$0xff] %v2722_v9  ;;  %v2595_v1 = vadd.f32 13.957728, %v2467_v41  ;;  %v3534_v34 = vmul.f32 %v3526_v8, %v3526_v8  ;;  %v170_v12 = vadd.f32 0.5, %v42_v26 }
  0xa6   :  { %v424_v36 = vsub.f32 %v40_v25, %v296_v19  ;;  %v552_v27 = vmul.f32 0.5, %v296_v19  ;;  %v2468_v55 = vmul.f32 %v2340_v16, %v3479_v18  ;;  %v2341_v28 = vadd.f32 -22.959543, %v2213_v23 }
  0xa7   :  { %v1958_v37 = vmul.f32 %v1830_v24, %v3501_v43  ;;  %v425_v31 = vsub.f32 %v41_v38, %v297_v35  ;;  %v2723_v58 = vmul.f32 %v2595_v1, %v3455_v2  ;;  %v1447_v33 = vmul.f32 -0.03274596, %v3534_v34 }
  0xa8   :  { %v680_v44 = vfloor.f32 %v552_v27  ;;  %v553_v39 = vmul.f32 0.5, %v297_v35  ;;  %v2596_v29 = vadd.f32 13.957728, %v2468_v55  ;;  %v2469_v40 = vmul.f32 %v2341_v28, %v3483_v15 }
  0xa9   :  { %v2086_v61 = vadd.f32 11.33008, %v1958_v37  ;;  %2851 = vst [vmem:[%s5298_s1 + $0xd8] sm:$0xff] %v2723_v58  ;;  %v1575_v18 = vadd.f32 0.36496454, %v1447_v33  ;;  %v171_v10 = vadd.f32 0.5, %v43_v32  ;;  %v298_v25 = vfloor.f32 %v170_v12 }
  0xaa   :  { %v808_v6 = vsub.f32 %v552_v27, %v680_v44  ;;  %v681_v51 = vfloor.f32 %v553_v39  ;;  %v2724_v42 = vmul.f32 %v2596_v29, %v3469_v59  ;;  %v2597_v2 = vadd.f32 13.957728, %v2469_v40  ;;  %v46_v27 = vld [vmem:[%s5297_s0 + $0x130] sm:$0xff] }
  0xab   :  { %v2214_v21 = vmul.f32 %v2086_v61, %v3501_v43  ;;  %v1703_v48 = vmul.f32 %v1575_v18, %v3534_v34  ;;  %v299_v45 = vfloor.f32 %v171_v10  ;;  %v426_v60 = vsub.f32 %v42_v26, %v298_v25 }
  0xac   :  { %v936_v5 = vmul.f32 4.0, %v808_v6  ;;  %v809_v15 = vsub.f32 %v553_v39, %v681_v51  ;;  %2852 = vst [vmem:[%s5298_s1 + $0xe0] sm:$0xff] %v2724_v42  ;;  %v2725_v62 = vmul.f32 %v2597_v2, %v3474_v20  ;;  %v554_v50 = vmul.f32 0.5, %v298_v25 }
  0xad   :  { %v2342_v59 = vadd.f32 -22.959543, %v2214_v21  ;;  %v1831_v52 = vadd.f32 -2.6624622, %v1703_v48  ;;  %v427_v13 = vsub.f32 %v43_v32, %v299_v45  ;;  %v555_v63 = vmul.f32 0.5, %v299_v45 }
  0xae   :  { %v1064_v0 = vsub.f32 1.0, %v936_v5  ;;  %v937_v54 = vmul.f32 4.0, %v809_v15  ;;  %2853 = vst [vmem:[%s5298_s1 + $0xe8] sm:$0xff] %v2725_v62  ;;  %v682_v57 = vfloor.f32 %v554_v50  ;;  %v172_v20 = vadd.f32 0.5, %v44_v46 }
  0xaf   :  { %v2470_v38 = vmul.f32 %v2342_v59, %v3501_v43  ;;  %v1959_v30 = vmul.f32 %v1831_v52, %v3534_v34  ;;  %v173_v53 = vadd.f32 0.5, %v45_v17  ;;  %v683_v14 = vfloor.f32 %v555_v63 }
  0xb0   :  { %v3568_v56 = vmul.f32 %v1064_v0, %v424_v36  ;;  %v1065_v22 = vsub.f32 1.0, %v937_v54  ;;  %v810_v11 = vsub.f32 %v554_v50, %v682_v57  ;;  %v300_v3 = vfloor.f32 %v172_v20 }
  0xb1   :  { %v2598_v47 = vadd.f32 13.957728, %v2470_v38  ;;  %v2087_v7 = vadd.f32 11.33008, %v1959_v30  ;;  %v301_v43 = vfloor.f32 %v173_v53  ;;  %v811_v16 = vsub.f32 %v555_v63, %v683_v14 }
  0xb2   :  { %v3572_v4 = vmul.f32 %v3568_v56, %v3568_v56  ;;  %v3574_v9 = vmul.f32 %v1065_v22, %v425_v31  ;;  %v938_v19 = vmul.f32 4.0, %v810_v11  ;;  %v428_v23 = vsub.f32 %v44_v46, %v300_v3  ;;  %v47_v46 = vld [vmem:[%s5297_s0 + $0x138] sm:$0xff] }
  0xb3   :  { %v2726_v41 = vmul.f32 %v2598_v47, %v3492_v49  ;;  %v2215_v24 = vmul.f32 %v2087_v7, %v3534_v34  ;;  %v556_v36 = vmul.f32 0.5, %v300_v3  ;;  %v939_v26 = vmul.f32 4.0, %v811_v16 }
  0xb4   :  { %v1448_v35 = vmul.f32 -0.03274596, %v3572_v4  ;;  %v3581_v1 = vmul.f32 %v3574_v9, %v3574_v9  ;;  %v1066_v49 = vsub.f32 1.0, %v938_v19  ;;  %v429_v55 = vsub.f32 %v45_v17, %v301_v43 }
  0xb5   :  { %2854 = vst [vmem:[%s5298_s1 + $0xf0] sm:$0xff] %v2726_v41  ;;  %v557_v28 = vmul.f32 0.5, %v301_v43  ;;  %v2343_v37 = vadd.f32 -22.959543, %v2215_v24  ;;  %v684_v58 = vfloor.f32 %v556_v36  ;;  %v1067_v44 = vsub.f32 1.0, %v939_v26 }
  0xb6   :  { %v1576_v31 = vadd.f32 0.36496454, %v1448_v35  ;;  %v1449_v32 = vmul.f32 -0.03274596, %v3581_v1  ;;  %v3590_v33 = vmul.f32 %v1066_v49, %v426_v60  ;;  %v174_v29 = vadd.f32 0.5, %v46_v27 }
  0xb7   :  { %v685_v39 = vfloor.f32 %v557_v28  ;;  %v2471_v40 = vmul.f32 %v2343_v37, %v3534_v34  ;;  %v812_v18 = vsub.f32 %v556_v36, %v684_v58  ;;  %v3598_v51 = vmul.f32 %v1067_v44, %v427_v13 }
  0xb8   :  { %v1704_v61 = vmul.f32 %v1576_v31, %v3572_v4  ;;  %v1577_v12 = vadd.f32 0.36496454, %v1449_v32  ;;  %v3596_v6 = vmul.f32 %v3590_v33, %v3590_v33  ;;  %v302_v42 = vfloor.f32 %v174_v29 }
  0xb9   :  { %v813_v10 = vsub.f32 %v557_v28, %v685_v39  ;;  %v2599_v2 = vadd.f32 13.957728, %v2471_v40  ;;  %v940_v48 = vmul.f32 4.0, %v812_v18  ;;  %v3604_v34 = vmul.f32 %v3598_v51, %v3598_v51 }
  0xba   :  { %v1832_v21 = vadd.f32 -2.6624622, %v1704_v61  ;;  %v1705_v25 = vmul.f32 %v1577_v12, %v3581_v1  ;;  %v1450_v5 = vmul.f32 -0.03274596, %v3596_v6  ;;  %v430_v45 = vsub.f32 %v46_v27, %v302_v42 }
  0xbb   :  { %v941_v15 = vmul.f32 4.0, %v813_v10  ;;  %v2727_v62 = vmul.f32 %v2599_v2, %v3526_v8  ;;  %v1068_v50 = vsub.f32 1.0, %v940_v48  ;;  %v1451_v52 = vmul.f32 -0.03274596, %v3604_v34 }
  0xbc   :  { %v1960_v59 = vmul.f32 %v1832_v21, %v3572_v4  ;;  %v1833_v60 = vadd.f32 -2.6624622, %v1705_v25  ;;  %v1578_v17 = vadd.f32 0.36496454, %v1450_v5  ;;  %v558_v54 = vmul.f32 0.5, %v302_v42  ;;  %v48_v42 = vld [vmem:[%s5297_s0 + $0x140] sm:$0xff] }
  0xbd   :  { %v1069_v0 = vsub.f32 1.0, %v941_v15  ;;  %2855 = vst [vmem:[%s5298_s1 + $0xf8] sm:$0xff] %v2727_v62  ;;  %v3616_v57 = vmul.f32 %v1068_v50, %v428_v23  ;;  %v175_v63 = vadd.f32 0.5, %v47_v46  ;;  %v1579_v20 = vadd.f32 0.36496454, %v1451_v52 }
  0xbe   :  { %v2088_v13 = vadd.f32 11.33008, %v1960_v59  ;;  %v1961_v38 = vmul.f32 %v1833_v60, %v3581_v1  ;;  %v1706_v8 = vmul.f32 %v1578_v17, %v3596_v6  ;;  %v686_v22 = vfloor.f32 %v558_v54 }
  0xbf   :  { %v3619_v30 = vmul.f32 %v1069_v0, %v429_v55  ;;  %v3624_v11 = vmul.f32 %v3616_v57, %v3616_v57  ;;  %v303_v14 = vfloor.f32 %v175_v63  ;;  %v1707_v7 = vmul.f32 %v1579_v20, %v3604_v34 }
  0xc0   :  { %v2216_v53 = vmul.f32 %v2088_v13, %v3572_v4  ;;  %v2089_v47 = vadd.f32 11.33008, %v1961_v38  ;;  %v1834_v3 = vadd.f32 -2.6624622, %v1706_v8  ;;  %v814_v41 = vsub.f32 %v558_v54, %v686_v22 }
  0xc1   :  { %v3629_v43 = vmul.f32 %v3619_v30, %v3619_v30  ;;  %v1452_v23 = vmul.f32 -0.03274596, %v3624_v11  ;;  %v431_v24 = vsub.f32 %v47_v46, %v303_v14  ;;  %v1835_v36 = vadd.f32 -2.6624622, %v1707_v7 }
  0xc2   :  { %v2344_v19 = vadd.f32 -22.959543, %v2216_v53  ;;  %v2217_v16 = vmul.f32 %v2089_v47, %v3581_v1  ;;  %v1962_v35 = vmul.f32 %v1834_v3, %v3596_v6  ;;  %v942_v49 = vmul.f32 4.0, %v814_v41  ;;  %v50_v3 = vld [vmem:[%s5297_s0 + $0x150] sm:$0xff] }
  0xc3   :  { %v1453_v27 = vmul.f32 -0.03274596, %v3629_v43  ;;  %v1580_v28 = vadd.f32 0.36496454, %v1452_v23  ;;  %v559_v37 = vmul.f32 0.5, %v303_v14  ;;  %v1963_v32 = vmul.f32 %v1835_v36, %v3604_v34 }
  0xc4   :  { %v2472_v26 = vmul.f32 %v2344_v19, %v3572_v4  ;;  %v2345_v55 = vadd.f32 -22.959543, %v2217_v16  ;;  %v2090_v31 = vadd.f32 11.33008, %v1962_v35  ;;  %v1070_v44 = vsub.f32 1.0, %v942_v49 }
  0xc5   :  { %v1581_v58 = vadd.f32 0.36496454, %v1453_v27  ;;  %v1708_v40 = vmul.f32 %v1580_v28, %v3624_v11  ;;  %v687_v61 = vfloor.f32 %v559_v37  ;;  %v2091_v18 = vadd.f32 11.33008, %v1963_v32 }
  0xc6   :  { %v2600_v39 = vadd.f32 13.957728, %v2472_v26  ;;  %v2473_v29 = vmul.f32 %v2345_v55, %v3581_v1  ;;  %v2218_v12 = vmul.f32 %v2090_v31, %v3596_v6  ;;  %v3641_v4 = vmul.f32 %v1070_v44, %v430_v45  ;;  %v49_v45 = vld [vmem:[%s5297_s0 + $0x148] sm:$0xff]  ;;  %v51_v26 = vld [vmem:[%s5297_s0 + $0x158] sm:$0xff] }
  0xc7   :  { %v1709_v10 = vmul.f32 %v1581_v58, %v3629_v43  ;;  %v1836_v25 = vadd.f32 -2.6624622, %v1708_v40  ;;  %v815_v48 = vsub.f32 %v559_v37, %v687_v61  ;;  %v2219_v5 = vmul.f32 %v2091_v18, %v3604_v34 }
  0xc8   :  { %v2728_v2 = vmul.f32 %v2600_v39, %v3568_v56  ;;  %v2601_v21 = vadd.f32 13.957728, %v2473_v29  ;;  %v2346_v1 = vadd.f32 -22.959543, %v2218_v12  ;;  %v3650_v46 = vmul.f32 %v3641_v4, %v3641_v4 }
  0xc9   :  { %v1837_v15 = vadd.f32 -2.6624622, %v1709_v10  ;;  %v1964_v62 = vmul.f32 %v1836_v25, %v3624_v11  ;;  %v943_v59 = vmul.f32 4.0, %v815_v48  ;;  %v176_v60 = vadd.f32 0.5, %v48_v42 }
  0xca   :  { %2856 = vst [vmem:[%s5298_s1 + $0x100] sm:$0xff] %v2728_v2  ;;  %v2729_v56 = vmul.f32 %v2601_v21, %v3574_v9  ;;  %v2474_v50 = vmul.f32 %v2346_v1, %v3596_v6  ;;  %v2347_v17 = vadd.f32 -22.959543, %v2219_v5  ;;  %v1454_v0 = vmul.f32 -0.03274596, %v3650_v46 }
  0xcb   :  { %v1965_v52 = vmul.f32 %v1837_v15, %v3629_v43  ;;  %v2092_v54 = vadd.f32 11.33008, %v1964_v62  ;;  %v1071_v13 = vsub.f32 1.0, %v943_v59  ;;  %v304_v38 = vfloor.f32 %v176_v60 }
  0xcc   :  { %2857 = vst [vmem:[%s5298_s1 + $0x108] sm:$0xff] %v2729_v56  ;;  %v177_v63 = vadd.f32 0.5, %v49_v45  ;;  %v2602_v9 = vadd.f32 13.957728, %v2474_v50  ;;  %v2475_v8 = vmul.f32 %v2347_v17, %v3604_v34  ;;  %v1582_v22 = vadd.f32 0.36496454, %v1454_v0 }
  0xcd   :  { %v2093_v20 = vadd.f32 11.33008, %v1965_v52  ;;  %v2220_v6 = vmul.f32 %v2092_v54, %v3624_v11  ;;  %v3668_v53 = vmul.f32 %v1071_v13, %v431_v24  ;;  %v432_v47 = vsub.f32 %v48_v42, %v304_v38  ;;  %v52_v42 = vld [vmem:[%s5297_s0 + $0x160] sm:$0xff] }
  0xce   :  { %v560_v14 = vmul.f32 0.5, %v304_v38  ;;  %v2730_v7 = vmul.f32 %v2602_v9, %v3590_v33  ;;  %v2603_v41 = vadd.f32 13.957728, %v2475_v8  ;;  %v1710_v16 = vmul.f32 %v1582_v22, %v3650_v46 }
  0xcf   :  { %v2221_v19 = vmul.f32 %v2093_v20, %v3629_v43  ;;  %v2348_v34 = vadd.f32 -22.959543, %v2220_v6  ;;  %v3678_v23 = vmul.f32 %v3668_v53, %v3668_v53  ;;  %v305_v35 = vfloor.f32 %v177_v63 }
  0xd0   :  { %v688_v24 = vfloor.f32 %v560_v14  ;;  %2858 = vst [vmem:[%s5298_s1 + $0x110] sm:$0xff] %v2730_v7  ;;  %v2731_v36 = vmul.f32 %v2603_v41, %v3598_v51  ;;  %v1838_v33 = vadd.f32 -2.6624622, %v1710_v16  ;;  %v178_v49 = vadd.f32 0.5, %v50_v3 }
  0xd1   :  { %v2349_v27 = vadd.f32 -22.959543, %v2221_v19  ;;  %v2476_v55 = vmul.f32 %v2348_v34, %v3624_v11  ;;  %v1455_v28 = vmul.f32 -0.03274596, %v3678_v23  ;;  %v433_v31 = vsub.f32 %v49_v45, %v305_v35 }
  0xd2   :  { %v816_v37 = vsub.f32 %v560_v14, %v688_v24  ;;  %2859 = vst [vmem:[%s5298_s1 + $0x118] sm:$0xff] %v2731_v36  ;;  %v1966_v51 = vmul.f32 %v1838_v33, %v3650_v46  ;;  %v561_v58 = vmul.f32 0.5, %v305_v35  ;;  %v306_v44 = vfloor.f32 %v178_v49  ;;  %v54_v33 = vld [vmem:[%s5297_s0 + $0x170] sm:$0xff] }
  0xd3   :  { %v2477_v32 = vmul.f32 %v2349_v27, %v3629_v43  ;;  %v2604_v39 = vadd.f32 13.957728, %v2476_v55  ;;  %v1583_v29 = vadd.f32 0.36496454, %v1455_v28  ;;  %v179_v61 = vadd.f32 0.5, %v51_v26 }
  0xd4   :  { %v944_v40 = vmul.f32 4.0, %v816_v37  ;;  %v2094_v11 = vadd.f32 11.33008, %v1966_v51  ;;  %v689_v18 = vfloor.f32 %v561_v58  ;;  %v434_v10 = vsub.f32 %v50_v3, %v306_v44 }
  0xd5   :  { %v2605_v12 = vadd.f32 13.957728, %v2477_v32  ;;  %v2732_v2 = vmul.f32 %v2604_v39, %v3616_v57  ;;  %v1711_v43 = vmul.f32 %v1583_v29, %v3678_v23  ;;  %v562_v25 = vmul.f32 0.5, %v306_v44  ;;  %v53_v57 = vld [vmem:[%s5297_s0 + $0x168] sm:$0xff] }
  0xd6   :  { %v1072_v21 = vsub.f32 1.0, %v944_v40  ;;  %v2222_v1 = vmul.f32 %v2094_v11, %v3650_v46  ;;  %v817_v5 = vsub.f32 %v561_v58, %v689_v18  ;;  %v307_v15 = vfloor.f32 %v179_v61 }
  0xd7   :  { %v2733_v48 = vmul.f32 %v2605_v12, %v3619_v30  ;;  %2860 = vst [vmem:[%s5298_s1 + $0x120] sm:$0xff] %v2732_v2  ;;  %v1839_v45 = vadd.f32 -2.6624622, %v1711_v43  ;;  %v690_v62 = vfloor.f32 %v562_v25  ;;  %v180_v59 = vadd.f32 0.5, %v52_v42 }
  0xd8   :  { %v3704_v56 = vmul.f32 %v1072_v21, %v432_v47  ;;  %v2350_v30 = vadd.f32 -22.959543, %v2222_v1  ;;  %v945_v60 = vmul.f32 4.0, %v817_v5  ;;  %v435_v50 = vsub.f32 %v51_v26, %v307_v15 }
  0xd9   :  { %2861 = vst [vmem:[%s5298_s1 + $0x128] sm:$0xff] %v2733_v48  ;;  %v563_v17 = vmul.f32 0.5, %v307_v15  ;;  %v1967_v52 = vmul.f32 %v1839_v45, %v3678_v23  ;;  %v818_v54 = vsub.f32 %v562_v25, %v690_v62  ;;  %v308_v13 = vfloor.f32 %v180_v59  ;;  %v55_v25 = vld [vmem:[%s5297_s0 + $0x178] sm:$0xff] }
  0xda   :  { %v3715_v0 = vmul.f32 %v3704_v56, %v3704_v56  ;;  %v2478_v38 = vmul.f32 %v2350_v30, %v3650_v46  ;;  %v1073_v63 = vsub.f32 1.0, %v945_v60  ;;  %v181_v8 = vadd.f32 0.5, %v53_v57 }
  0xdb   :  { %v691_v9 = vfloor.f32 %v563_v17  ;;  %v2095_v20 = vadd.f32 11.33008, %v1967_v52  ;;  %v946_v6 = vmul.f32 4.0, %v818_v54  ;;  %v436_v47 = vsub.f32 %v52_v42, %v308_v13 }
  0xdc   :  { %v1456_v22 = vmul.f32 -0.03274596, %v3715_v0  ;;  %v2606_v14 = vadd.f32 13.957728, %v2478_v38  ;;  %v3719_v3 = vmul.f32 %v1073_v63, %v433_v31  ;;  %v564_v41 = vmul.f32 0.5, %v308_v13 }
  0xdd   :  { %v819_v7 = vsub.f32 %v563_v17, %v691_v9  ;;  %v2223_v19 = vmul.f32 %v2095_v20, %v3678_v23  ;;  %v1074_v34 = vsub.f32 1.0, %v946_v6  ;;  %v309_v24 = vfloor.f32 %v181_v8 }
  0xde   :  { %v1584_v16 = vadd.f32 0.36496454, %v1456_v22  ;;  %v2734_v46 = vmul.f32 %v2606_v14, %v3641_v4  ;;  %v3725_v35 = vmul.f32 %v3719_v3, %v3719_v3  ;;  %v692_v27 = vfloor.f32 %v564_v41 }
  0xdf   :  { %v947_v36 = vmul.f32 4.0, %v819_v7  ;;  %v2351_v49 = vadd.f32 -22.959543, %v2223_v19  ;;  %v3731_v55 = vmul.f32 %v1074_v34, %v434_v10  ;;  %v437_v28 = vsub.f32 %v53_v57, %v309_v24 }
  0xe0   :  { %v1712_v26 = vmul.f32 %v1584_v16, %v3715_v0  ;;  %2862 = vst [vmem:[%s5298_s1 + $0x130] sm:$0xff] %v2734_v46  ;;  %v1457_v4 = vmul.f32 -0.03274596, %v3725_v35  ;;  %v820_v31 = vsub.f32 %v564_v41, %v692_v27  ;;  %v565_v32 = vmul.f32 0.5, %v309_v24 }
  0xe1   :  { %v1075_v37 = vsub.f32 1.0, %v947_v36  ;;  %v2479_v51 = vmul.f32 %v2351_v49, %v3678_v23  ;;  %v3740_v44 = vmul.f32 %v3731_v55, %v3731_v55  ;;  %v182_v39 = vadd.f32 0.5, %v54_v33 }
  0xe2   :  { %v1840_v58 = vadd.f32 -2.6624622, %v1712_v26  ;;  %v1585_v29 = vadd.f32 0.36496454, %v1457_v4  ;;  %v948_v61 = vmul.f32 4.0, %v820_v31  ;;  %v693_v12 = vfloor.f32 %v565_v32 }
  0xe3   :  { %v3742_v40 = vmul.f32 %v1075_v37, %v435_v50  ;;  %v2607_v11 = vadd.f32 13.957728, %v2479_v51  ;;  %v1458_v10 = vmul.f32 -0.03274596, %v3740_v44  ;;  %v310_v42 = vfloor.f32 %v182_v39  ;;  %v56_v37 = vld [vmem:[%s5297_s0 + $0x180] sm:$0xff] }
  0xe4   :  { %v1968_v18 = vmul.f32 %v1840_v58, %v3715_v0  ;;  %v1713_v2 = vmul.f32 %v1585_v29, %v3725_v35  ;;  %v1076_v43 = vsub.f32 1.0, %v948_v61  ;;  %v821_v21 = vsub.f32 %v565_v32, %v693_v12 }
  0xe5   :  { %v3749_v23 = vmul.f32 %v3742_v40, %v3742_v40  ;;  %v2735_v48 = vmul.f32 %v2607_v11, %v3668_v53  ;;  %v1586_v5 = vadd.f32 0.36496454, %v1458_v10  ;;  %v438_v15 = vsub.f32 %v54_v33, %v310_v42 }
  0xe6   :  { %v2096_v1 = vadd.f32 11.33008, %v1968_v18  ;;  %v1841_v45 = vadd.f32 -2.6624622, %v1713_v2  ;;  %v3756_v59 = vmul.f32 %v1076_v43, %v436_v47  ;;  %v949_v57 = vmul.f32 4.0, %v821_v21 }
  0xe7   :  { %v1459_v62 = vmul.f32 -0.03274596, %v3749_v23  ;;  %2863 = vst [vmem:[%s5298_s1 + $0x138] sm:$0xff] %v2735_v48  ;;  %v1714_v60 = vmul.f32 %v1586_v5, %v3740_v44  ;;  %v566_v50 = vmul.f32 0.5, %v310_v42  ;;  %v183_v17 = vadd.f32 0.5, %v55_v25  ;;  %v57_v5 = vld [vmem:[%s5297_s0 + $0x188] sm:$0xff] }
  0xe8   :  { %v2224_v30 = vmul.f32 %v2096_v1, %v3715_v0  ;;  %v1969_v53 = vmul.f32 %v1841_v45, %v3725_v35  ;;  %v3766_v54 = vmul.f32 %v3756_v59, %v3756_v59  ;;  %v1077_v13 = vsub.f32 1.0, %v949_v57 }
  0xe9   :  { %v1587_v52 = vadd.f32 0.36496454, %v1459_v62  ;;  %v1842_v63 = vadd.f32 -2.6624622, %v1714_v60  ;;  %v694_v9 = vfloor.f32 %v566_v50  ;;  %v311_v8 = vfloor.f32 %v183_v17 }
  0xea   :  { %v2352_v38 = vadd.f32 -22.959543, %v2224_v30  ;;  %v2097_v20 = vadd.f32 11.33008, %v1969_v53  ;;  %v1460_v6 = vmul.f32 -0.03274596, %v3766_v54  ;;  %v3770_v47 = vmul.f32 %v1077_v13, %v437_v28 }
  0xeb   :  { %v1715_v22 = vmul.f32 %v1587_v52, %v3749_v23  ;;  %v1970_v7 = vmul.f32 %v1842_v63, %v3740_v44  ;;  %v822_v41 = vsub.f32 %v566_v50, %v694_v9  ;;  %v439_v19 = vsub.f32 %v55_v25, %v311_v8 }
  0xec   :  { %v2480_v14 = vmul.f32 %v2352_v38, %v3715_v0  ;;  %v2225_v16 = vmul.f32 %v2097_v20, %v3725_v35  ;;  %v1588_v24 = vadd.f32 0.36496454, %v1460_v6  ;;  %v3777_v46 = vmul.f32 %v3770_v47, %v3770_v47 }
  0xed   :  { %v1843_v34 = vadd.f32 -2.6624622, %v1715_v22  ;;  %v2098_v27 = vadd.f32 11.33008, %v1970_v7  ;;  %v950_v33 = vmul.f32 4.0, %v822_v41  ;;  %v567_v49 = vmul.f32 0.5, %v311_v8 }
  0xee   :  { %v2608_v36 = vadd.f32 13.957728, %v2480_v14  ;;  %v2353_v26 = vadd.f32 -22.959543, %v2225_v16  ;;  %v1716_v0 = vmul.f32 %v1588_v24, %v3766_v54  ;;  %v1461_v4 = vmul.f32 -0.03274596, %v3777_v46 }
  0xef   :  { %v1971_v28 = vmul.f32 %v1843_v34, %v3749_v23  ;;  %v2226_v32 = vmul.f32 %v2098_v27, %v3740_v44  ;;  %v1078_v51 = vsub.f32 1.0, %v950_v33  ;;  %v695_v58 = vfloor.f32 %v567_v49  ;;  %v59_v24 = vld [vmem:[%s5297_s0 + $0x198] sm:$0xff] }
  0xf0   :  { %v2736_v31 = vmul.f32 %v2608_v36, %v3704_v56  ;;  %v2481_v39 = vmul.f32 %v2353_v26, %v3725_v35  ;;  %v1844_v61 = vadd.f32 -2.6624622, %v1716_v0  ;;  %v1589_v12 = vadd.f32 0.36496454, %v1461_v4 }
  0xf1   :  { %v2099_v29 = vadd.f32 11.33008, %v1971_v28  ;;  %v2354_v11 = vadd.f32 -22.959543, %v2226_v32  ;;  %v3791_v18 = vmul.f32 %v1078_v51, %v438_v15  ;;  %v823_v10 = vsub.f32 %v567_v49, %v695_v58  ;;  %v60_v51 = vld [vmem:[%s5297_s0 + $0x1a0] sm:$0xff] }
  0xf2   :  { %2864 = vst [vmem:[%s5298_s1 + $0x140] sm:$0xff] %v2736_v31  ;;  %v184_v42 = vadd.f32 0.5, %v56_v37  ;;  %v2609_v2 = vadd.f32 13.957728, %v2481_v39  ;;  %v1972_v43 = vmul.f32 %v1844_v61, %v3766_v54  ;;  %v1717_v21 = vmul.f32 %v1589_v12, %v3777_v46 }
  0xf3   :  { %v2227_v56 = vmul.f32 %v2099_v29, %v3749_v23  ;;  %v2482_v35 = vmul.f32 %v2354_v11, %v3740_v44  ;;  %v3799_v25 = vmul.f32 %v3791_v18, %v3791_v18  ;;  %v951_v48 = vmul.f32 4.0, %v823_v10 }
  0xf4   :  { %v312_v1 = vfloor.f32 %v184_v42  ;;  %v2737_v15 = vmul.f32 %v2609_v2, %v3719_v3  ;;  %v2100_v62 = vadd.f32 11.33008, %v1972_v43  ;;  %v1845_v57 = vadd.f32 -2.6624622, %v1717_v21  ;;  %v58_v3 = vld [vmem:[%s5297_s0 + $0x190] sm:$0xff] }
  0xf5   :  { %v2355_v45 = vadd.f32 -22.959543, %v2227_v56  ;;  %v2610_v30 = vadd.f32 13.957728, %v2482_v35  ;;  %v1462_v60 = vmul.f32 -0.03274596, %v3799_v25 }
  0xf6   :  { %v1079_v50 = vsub.f32 1.0, %v951_v48  ;;  %2865 = vst [vmem:[%s5298_s1 + $0x148] sm:$0xff] %v2737_v15  ;;  %v2228_v17 = vmul.f32 %v2100_v62, %v3766_v54  ;;  %v1973_v53 = vmul.f32 %v1845_v57, %v3777_v46  ;;  %v568_v52 = vmul.f32 0.5, %v312_v1  ;;  %v3852_v48 = vld [vmem:[%s5297_s0 + $0x1a8] sm:$0xff] }
  0xf7   :  { %v2483_v44 = vmul.f32 %v2355_v45, %v3749_v23  ;;  %v2738_v13 = vmul.f32 %v2610_v30, %v3731_v55  ;;  %v1590_v38 = vadd.f32 0.36496454, %v1462_v60  ;;  %v185_v9 = vadd.f32 0.5, %v57_v5 }
  0xf8   :  { %v3816_v63 = vmul.f32 %v1079_v50, %v439_v19  ;;  %v2356_v20 = vadd.f32 -22.959543, %v2228_v17  ;;  %v2101_v22 = vadd.f32 11.33008, %v1973_v53  ;;  %v696_v6 = vfloor.f32 %v568_v52 }
  0xf9   :  { %v2611_v8 = vadd.f32 13.957728, %v2483_v44  ;;  %2866 = vst [vmem:[%s5298_s1 + $0x150] sm:$0xff] %v2738_v13  ;;  %v1718_v23 = vmul.f32 %v1590_v38, %v3799_v25  ;;  %v313_v7 = vfloor.f32 %v185_v9  ;;  %v186_v55 = vadd.f32 0.5, %v58_v3 }
  0xfa   :  { %v3824_v14 = vmul.f32 %v3816_v63, %v3816_v63  ;;  %v2484_v19 = vmul.f32 %v2356_v20, %v3766_v54  ;;  %v2229_v16 = vmul.f32 %v2101_v22, %v3777_v46  ;;  %v824_v34 = vsub.f32 %v568_v52, %v696_v6 }
  0xfb   :  { %v2739_v41 = vmul.f32 %v2611_v8, %v3742_v40  ;;  %v1846_v36 = vadd.f32 -2.6624622, %v1718_v23  ;;  %v440_v33 = vsub.f32 %v56_v37, %v312_v1  ;;  %v569_v49 = vmul.f32 0.5, %v313_v7 }
  0xfc   :  { %v1463_v27 = vmul.f32 -0.03274596, %v3824_v14  ;;  %v2612_v26 = vadd.f32 13.957728, %v2484_v19  ;;  %v2357_v40 = vadd.f32 -22.959543, %v2229_v16  ;;  %v314_v54 = vfloor.f32 %v186_v55 }
  0xfd   :  { %2867 = vst [vmem:[%s5298_s1 + $0x158] sm:$0xff] %v2739_v41  ;;  %v952_v28 = vmul.f32 4.0, %v824_v34  ;;  %v1974_v0 = vmul.f32 %v1846_v36, %v3799_v25  ;;  %v697_v31 = vfloor.f32 %v569_v49  ;;  %v187_v32 = vadd.f32 0.5, %v59_v24 }
  0xfe   :  { %v1591_v4 = vadd.f32 0.36496454, %v1463_v27  ;;  %v2740_v37 = vmul.f32 %v2612_v26, %v3756_v59  ;;  %v2485_v58 = vmul.f32 %v2357_v40, %v3777_v46  ;;  %v441_v29 = vsub.f32 %v57_v5, %v313_v7  ;;  %v62_v27 = vld [vmem:[%s5297_s0 + $0x1b0] sm:$0xff] }
  0xff   :  { %v1080_v39 = vsub.f32 1.0, %v952_v28  ;;  %v2102_v61 = vadd.f32 11.33008, %v1974_v0  ;;  %v825_v11 = vsub.f32 %v569_v49, %v697_v31  ;;  %v570_v10 = vmul.f32 0.5, %v314_v54 }
 0x100   :  { %v1719_v12 = vmul.f32 %v1591_v4, %v3824_v14  ;;  %2868 = vst [vmem:[%s5298_s1 + $0x160] sm:$0xff] %v2740_v37  ;;  %v2613_v42 = vadd.f32 13.957728, %v2485_v58  ;;  %v315_v56 = vfloor.f32 %v187_v32  ;;  %v188_v43 = vadd.f32 0.5, %v60_v51 }
 0x101   :  { %v3846_v2 = vmul.f32 %v1080_v39, %v440_v33  ;;  %v2230_v59 = vmul.f32 %v2102_v61, %v3799_v25  ;;  %v953_v46 = vmul.f32 4.0, %v825_v11  ;;  %v698_v35 = vfloor.f32 %v570_v10 }
 0x102   :  { %v1847_v21 = vadd.f32 -2.6624622, %v1719_v12  ;;  %v2741_v1 = vmul.f32 %v2613_v42, %v3770_v47  ;;  %v442_v15 = vsub.f32 %v58_v3, %v314_v54  ;;  %v571_v45 = vmul.f32 0.5, %v315_v56 }
 0x103   :  { %v3857_v5 = vmul.f32 %v3846_v2, %v3846_v2  ;;  %v2358_v62 = vadd.f32 -22.959543, %v2230_v59  ;;  %v1081_v30 = vsub.f32 1.0, %v953_v46  ;;  %v826_v60 = vsub.f32 %v570_v10, %v698_v35  ;;  %v63_v59 = vld [vmem:[%s5297_s0 + $0x1b8] sm:$0xff] }
 0x104   :  { %v1975_v57 = vmul.f32 %v1847_v21, %v3824_v14  ;;  %2869 = vst [vmem:[%s5298_s1 + $0x168] sm:$0xff] %v2741_v1  ;;  %v699_v44 = vfloor.f32 %v571_v45  ;;  %v316_v17 = vfloor.f32 %v188_v43  ;;  %v189_v47 = vadd.f32 0.5, %v3852_v48 }
 0x105   :  { %v1464_v50 = vmul.f32 -0.03274596, %v3857_v5  ;;  %v2486_v53 = vmul.f32 %v2358_v62, %v3799_v25  ;;  %v3866_v3 = vmul.f32 %v1081_v30, %v441_v29  ;;  %v954_v13 = vmul.f32 4.0, %v826_v60 }
 0x106   :  { %v2103_v52 = vadd.f32 11.33008, %v1975_v57  ;;  %v443_v9 = vsub.f32 %v59_v24, %v315_v56  ;;  %v827_v8 = vsub.f32 %v571_v45, %v699_v44  ;;  %v572_v20 = vmul.f32 0.5, %v316_v17 }
 0x107   :  { %v1592_v38 = vadd.f32 0.36496454, %v1464_v50  ;;  %v2614_v22 = vadd.f32 13.957728, %v2486_v53  ;;  %v3871_v23 = vmul.f32 %v3866_v3, %v3866_v3  ;;  %v1082_v7 = vsub.f32 1.0, %v954_v13 }
 0x108   :  { %v2231_v6 = vmul.f32 %v2103_v52, %v3824_v14  ;;  %v955_v41 = vmul.f32 4.0, %v827_v8  ;;  %v700_v25 = vfloor.f32 %v572_v20  ;;  %v317_v19 = vfloor.f32 %v189_v47 }
 0x109   :  { %v1720_v55 = vmul.f32 %v1592_v38, %v3857_v5  ;;  %v2742_v16 = vmul.f32 %v2614_v22, %v3791_v18  ;;  %v1465_v24 = vmul.f32 -0.03274596, %v3871_v23  ;;  %v3876_v36 = vmul.f32 %v1082_v7, %v442_v15 }
 0x10a   :  { %v2359_v34 = vadd.f32 -22.959543, %v2231_v6  ;;  %v1083_v49 = vsub.f32 1.0, %v955_v41  ;;  %v444_v26 = vsub.f32 %v60_v51, %v316_v17  ;;  %v828_v40 = vsub.f32 %v572_v20, %v700_v25 }
 0x10b   :  { %v1848_v33 = vadd.f32 -2.6624622, %v1720_v55  ;;  %2870 = vst [vmem:[%s5298_s1 + $0x170] sm:$0xff] %v2742_v16  ;;  %v1593_v18 = vadd.f32 0.36496454, %v1465_v24  ;;  %v3887_v54 = vmul.f32 %v3876_v36, %v3876_v36  ;;  %v573_v0 = vmul.f32 0.5, %v317_v19 }
 0x10c   :  { %v2487_v28 = vmul.f32 %v2359_v34, %v3824_v14  ;;  %v3890_v31 = vmul.f32 %v1083_v49, %v443_v9  ;;  %v956_v32 = vmul.f32 4.0, %v828_v40  ;;  %v190_v37 = vadd.f32 0.5, %v62_v27  ;;  %v64_v34 = vld [vmem:[%s5297_s0 + $0x1c0] sm:$0xff] }
 0x10d   :  { %v1976_v4 = vmul.f32 %v1848_v33, %v3857_v5  ;;  %v1721_v58 = vmul.f32 %v1593_v18, %v3871_v23  ;;  %v1466_v39 = vmul.f32 -0.03274596, %v3887_v54  ;;  %v701_v29 = vfloor.f32 %v573_v0 }
 0x10e   :  { %v2615_v51 = vadd.f32 13.957728, %v2487_v28  ;;  %v3896_v14 = vmul.f32 %v3890_v31, %v3890_v31  ;;  %v1084_v12 = vsub.f32 1.0, %v956_v32  ;;  %v318_v11 = vfloor.f32 %v190_v37 }
 0x10f   :  { %v2104_v61 = vadd.f32 11.33008, %v1976_v4  ;;  %v1849_v42 = vadd.f32 -2.6624622, %v1721_v58  ;;  %v1594_v56 = vadd.f32 0.36496454, %v1466_v39  ;;  %v829_v43 = vsub.f32 %v573_v0, %v701_v29 }
 0x110   :  { %v2743_v10 = vmul.f32 %v2615_v51, %v3816_v63  ;;  %v1467_v46 = vmul.f32 -0.03274596, %v3896_v14  ;;  %v3904_v35 = vmul.f32 %v1084_v12, %v444_v26  ;;  %v445_v1 = vsub.f32 %v3852_v48, %v317_v19 }
 0x111   :  { %v2232_v21 = vmul.f32 %v2104_v61, %v3857_v5  ;;  %v1977_v63 = vmul.f32 %v1849_v42, %v3871_v23  ;;  %v1722_v15 = vmul.f32 %v1594_v56, %v3887_v54  ;;  %v957_v45 = vmul.f32 4.0, %v829_v43 }
 0x112   :  { %2871 = vst [vmem:[%s5298_s1 + $0x178] sm:$0xff] %v2743_v10  ;;  %v574_v62 = vmul.f32 0.5, %v318_v11  ;;  %v1595_v30 = vadd.f32 0.36496454, %v1467_v46  ;;  %v3914_v60 = vmul.f32 %v3904_v35, %v3904_v35  ;;  %v191_v50 = vadd.f32 0.5, %v63_v59 }
 0x113   :  { %v2360_v57 = vadd.f32 -22.959543, %v2232_v21  ;;  %v2105_v44 = vadd.f32 11.33008, %v1977_v63  ;;  %v1850_v17 = vadd.f32 -2.6624622, %v1722_v15  ;;  %v446_v41 = vsub.f32 %v62_v27, %v318_v11 }
 0x114   :  { %v1085_v48 = vsub.f32 1.0, %v957_v45  ;;  %v702_v47 = vfloor.f32 %v574_v62  ;;  %v1723_v52 = vmul.f32 %v1595_v30, %v3896_v14  ;;  %v1468_v13 = vmul.f32 -0.03274596, %v3914_v60  ;;  %v65_v63 = vld [vmem:[%s5297_s0 + $0x1c8] sm:$0xff] }
 0x115   :  { %v2488_v53 = vmul.f32 %v2360_v57, %v3857_v5  ;;  %v319_v38 = vfloor.f32 %v191_v50  ;;  %v2233_v9 = vmul.f32 %v2105_v44, %v3871_v23  ;;  %v1978_v8 = vmul.f32 %v1850_v17, %v3887_v54 }
 0x116   :  { %v3921_v20 = vmul.f32 %v1085_v48, %v445_v1  ;;  %v830_v22 = vsub.f32 %v574_v62, %v702_v47  ;;  %v1851_v7 = vadd.f32 -2.6624622, %v1723_v52  ;;  %v1596_v55 = vadd.f32 0.36496454, %v1468_v13 }
 0x117   :  { %v2616_v6 = vadd.f32 13.957728, %v2488_v53  ;;  %v2361_v25 = vadd.f32 -22.959543, %v2233_v9  ;;  %v2106_v19 = vadd.f32 11.33008, %v1978_v8  ;;  %v447_v46 = vsub.f32 %v63_v59, %v319_v38 }
 0x118   :  { %v3925_v5 = vmul.f32 %v3921_v20, %v3921_v20  ;;  %v958_v16 = vmul.f32 4.0, %v830_v22  ;;  %v1979_v33 = vmul.f32 %v1851_v7, %v3896_v14  ;;  %v1724_v49 = vmul.f32 %v1596_v55, %v3914_v60  ;;  %v66_v59 = vld [vmem:[%s5297_s0 + $0x1d0] sm:$0xff]  ;;  %v67_v55 = vld [vmem:[%s5297_s0 + $0x1d8] sm:$0xff] }
 0x119   :  { %v2744_v24 = vmul.f32 %v2616_v6, %v3846_v2  ;;  %v575_v26 = vmul.f32 0.5, %v319_v38  ;;  %v2489_v27 = vmul.f32 %v2361_v25, %v3871_v23  ;;  %v2234_v40 = vmul.f32 %v2106_v19, %v3887_v54 }
 0x11a   :  { %v1469_v28 = vmul.f32 -0.03274596, %v3925_v5  ;;  %v1086_v18 = vsub.f32 1.0, %v958_v16  ;;  %v2107_v0 = vadd.f32 11.33008, %v1979_v33  ;;  %v192_v2 = vadd.f32 0.5, %v64_v34 }
 0x11b   :  { %2872 = vst [vmem:[%s5298_s1 + $0x180] sm:$0xff] %v2744_v24  ;;  %v1852_v4 = vadd.f32 -2.6624622, %v1724_v49  ;;  %v703_v32 = vfloor.f32 %v575_v26  ;;  %v2617_v37 = vadd.f32 13.957728, %v2489_v27  ;;  %v193_v48 = vadd.f32 0.5, %v65_v63 }
 0x11c   :  { %v2362_v51 = vadd.f32 -22.959543, %v2234_v40  ;;  %v1597_v58 = vadd.f32 0.36496454, %v1469_v28  ;;  %v3939_v39 = vmul.f32 %v1086_v18, %v446_v41  ;;  %v2235_v23 = vmul.f32 %v2107_v0, %v3896_v14  ;;  %v68_v28 = vld [vmem:[%s5297_s0 + $0x1e0] sm:$0xff] }
 0x11d   :  { %v1980_v29 = vmul.f32 %v1852_v4, %v3914_v60  ;;  %v831_v61 = vsub.f32 %v575_v26, %v703_v32  ;;  %v320_v12 = vfloor.f32 %v192_v2  ;;  %v2745_v11 = vmul.f32 %v2617_v37, %v3866_v3 }
 0x11e   :  { %v2490_v10 = vmul.f32 %v2362_v51, %v3887_v54  ;;  %v1725_v42 = vmul.f32 %v1597_v58, %v3925_v5  ;;  %v3948_v56 = vmul.f32 %v3939_v39, %v3939_v39  ;;  %v2363_v43 = vadd.f32 -22.959543, %v2235_v23 }
 0x11f   :  { %v2108_v21 = vadd.f32 11.33008, %v1980_v29  ;;  %v959_v1 = vmul.f32 4.0, %v831_v61  ;;  %2873 = vst [vmem:[%s5298_s1 + $0x188] sm:$0xff] %v2745_v11  ;;  %v576_v30 = vmul.f32 0.5, %v320_v12  ;;  %v321_v9 = vfloor.f32 %v193_v48 }
 0x120   :  { %v2618_v3 = vadd.f32 13.957728, %v2490_v10  ;;  %v1853_v54 = vadd.f32 -2.6624622, %v1725_v42  ;;  %v1470_v15 = vmul.f32 -0.03274596, %v3948_v56  ;;  %v2491_v45 = vmul.f32 %v2363_v43, %v3896_v14 }
 0x121   :  { %v2236_v62 = vmul.f32 %v2108_v21, %v3914_v60  ;;  %v1087_v57 = vsub.f32 1.0, %v959_v1  ;;  %v704_v13 = vfloor.f32 %v576_v30  ;;  %v194_v8 = vadd.f32 0.5, %v66_v59 }
 0x122   :  { %v2746_v50 = vmul.f32 %v2618_v3, %v3876_v36  ;;  %v1981_v44 = vmul.f32 %v1853_v54, %v3925_v5  ;;  %v1598_v17 = vadd.f32 0.36496454, %v1470_v15  ;;  %v2619_v47 = vadd.f32 13.957728, %v2491_v45 }
 0x123   :  { %v2364_v53 = vadd.f32 -22.959543, %v2236_v62  ;;  %v3964_v52 = vmul.f32 %v1087_v57, %v447_v46  ;;  %v832_v7 = vsub.f32 %v576_v30, %v704_v13  ;;  %v448_v19 = vsub.f32 %v64_v34, %v320_v12  ;;  %v69_v46 = vld [vmem:[%s5297_s0 + $0x1e8] sm:$0xff] }
 0x124   :  { %2874 = vst [vmem:[%s5298_s1 + $0x190] sm:$0xff] %v2746_v50  ;;  %v2109_v14 = vadd.f32 11.33008, %v1981_v44  ;;  %v1726_v38 = vmul.f32 %v1598_v17, %v3948_v56  ;;  %v2747_v36 = vmul.f32 %v2619_v47, %v3890_v31  ;;  %v577_v16 = vmul.f32 0.5, %v321_v9 }
 0x125   :  { %v2492_v22 = vmul.f32 %v2364_v53, %v3914_v60  ;;  %v3974_v6 = vmul.f32 %v3964_v52, %v3964_v52  ;;  %v960_v24 = vmul.f32 4.0, %v832_v7  ;;  %v322_v33 = vfloor.f32 %v194_v8 }
 0x126   :  { %v2237_v41 = vmul.f32 %v2109_v14, %v3925_v5  ;;  %v1854_v25 = vadd.f32 -2.6624622, %v1726_v38  ;;  %2875 = vst [vmem:[%s5298_s1 + $0x198] sm:$0xff] %v2747_v36  ;;  %v705_v27 = vfloor.f32 %v577_v16  ;;  %v195_v40 = vadd.f32 0.5, %v67_v55 }
 0x127   :  { %v2620_v31 = vadd.f32 13.957728, %v2492_v22  ;;  %v1471_v60 = vmul.f32 -0.03274596, %v3974_v6  ;;  %v1088_v0 = vsub.f32 1.0, %v960_v24  ;;  %v449_v4 = vsub.f32 %v65_v63, %v321_v9 }
 0x128   :  { %v2365_v49 = vadd.f32 -22.959543, %v2237_v41  ;;  %v1982_v26 = vmul.f32 %v1854_v25, %v3948_v56  ;;  %v833_v37 = vsub.f32 %v577_v16, %v705_v27  ;;  %v578_v51 = vmul.f32 0.5, %v322_v33  ;;  %v70_v25 = vld [vmem:[%s5297_s0 + $0x1f0] sm:$0xff] }
 0x129   :  { %v2748_v34 = vmul.f32 %v2620_v31, %v3904_v35  ;;  %v1599_v18 = vadd.f32 0.36496454, %v1471_v60  ;;  %v3994_v23 = vmul.f32 %v1088_v0, %v448_v19  ;;  %v323_v29 = vfloor.f32 %v195_v40 }
 0x12a   :  { %v2493_v32 = vmul.f32 %v2365_v49, %v3925_v5  ;;  %v2110_v2 = vadd.f32 11.33008, %v1982_v26  ;;  %v196_v61 = vadd.f32 0.5, %v68_v28  ;;  %v961_v11 = vmul.f32 4.0, %v833_v37 }
 0x12b   :  { %2876 = vst [vmem:[%s5298_s1 + $0x1a0] sm:$0xff] %v2748_v34  ;;  %v1727_v58 = vmul.f32 %v1599_v18, %v3974_v6  ;;  %v706_v10 = vfloor.f32 %v578_v51  ;;  %v3999_v5 = vmul.f32 %v3994_v23, %v3994_v23  ;;  %v450_v43 = vsub.f32 %v66_v59, %v322_v33 }
 0x12c   :  { %v2621_v12 = vadd.f32 13.957728, %v2493_v32  ;;  %v2238_v35 = vmul.f32 %v2110_v2, %v3948_v56  ;;  %v579_v21 = vmul.f32 0.5, %v323_v29  ;;  %v1089_v3 = vsub.f32 1.0, %v961_v11 }
 0x12d   :  { %v1855_v42 = vadd.f32 -2.6624622, %v1727_v58  ;;  %v834_v54 = vsub.f32 %v578_v51, %v706_v10  ;;  %v1472_v45 = vmul.f32 -0.03274596, %v3999_v5  ;;  %v324_v57 = vfloor.f32 %v196_v61 }
 0x12e   :  { %v2749_v1 = vmul.f32 %v2621_v12, %v3921_v20  ;;  %v2366_v63 = vadd.f32 -22.959543, %v2238_v35  ;;  %v707_v62 = vfloor.f32 %v579_v21  ;;  %v4011_v59 = vmul.f32 %v1089_v3, %v449_v4  ;;  %v71_v12 = vld [vmem:[%s5297_s0 + $0x1f8] sm:$0xff] }
 0x12f   :  { %v1983_v15 = vmul.f32 %v1855_v42, %v3974_v6  ;;  %v962_v50 = vmul.f32 4.0, %v834_v54  ;;  %v197_v44 = vadd.f32 0.5, %v69_v46  ;;  %v1600_v17 = vadd.f32 0.36496454, %v1472_v45 }
 0x130   :  { %2877 = vst [vmem:[%s5298_s1 + $0x1a8] sm:$0xff] %v2749_v1  ;;  %v2494_v30 = vmul.f32 %v2366_v63, %v3948_v56  ;;  %v451_v48 = vsub.f32 %v67_v55, %v323_v29  ;;  %v835_v47 = vsub.f32 %v579_v21, %v707_v62  ;;  %v4015_v13 = vmul.f32 %v4011_v59, %v4011_v59 }
 0x131   :  { %v2111_v20 = vadd.f32 11.33008, %v1983_v15  ;;  %v1090_v14 = vsub.f32 1.0, %v962_v50  ;;  %v580_v38 = vmul.f32 0.5, %v324_v57  ;;  %v1728_v8 = vmul.f32 %v1600_v17, %v3999_v5 }
 0x132   :  { %v2622_v53 = vadd.f32 13.957728, %v2494_v30  ;;  %v963_v56 = vmul.f32 4.0, %v835_v47  ;;  %v325_v36 = vfloor.f32 %v197_v44  ;;  %v1473_v7 = vmul.f32 -0.03274596, %v4015_v13 }
 0x133   :  { %v2239_v9 = vmul.f32 %v2111_v20, %v3974_v6  ;;  %v4021_v41 = vmul.f32 %v1090_v14, %v450_v43  ;;  %v708_v55 = vfloor.f32 %v580_v38  ;;  %v1856_v16 = vadd.f32 -2.6624622, %v1728_v8 }
 0x134   :  { %v2750_v22 = vmul.f32 %v2622_v53, %v3939_v39  ;;  %v1091_v31 = vsub.f32 1.0, %v963_v56  ;;  %v452_v60 = vsub.f32 %v68_v28, %v324_v57  ;;  %v1601_v24 = vadd.f32 0.36496454, %v1473_v7 }
 0x135   :  { %v2367_v19 = vadd.f32 -22.959543, %v2239_v9  ;;  %v4031_v39 = vmul.f32 %v4021_v41, %v4021_v41  ;;  %v836_v33 = vsub.f32 %v580_v38, %v708_v55  ;;  %v581_v49 = vmul.f32 0.5, %v325_v36 }
 0x136   :  { %2878 = vst [vmem:[%s5298_s1 + $0x1b0] sm:$0xff] %v2750_v22  ;;  %v1984_v27 = vmul.f32 %v1856_v16, %v3999_v5  ;;  %v4035_v40 = vmul.f32 %v1091_v31, %v451_v48  ;;  %v198_v34 = vadd.f32 0.5, %v70_v25  ;;  %v1729_v28 = vmul.f32 %v1601_v24, %v4015_v13 }
 0x137   :  { %v2495_v26 = vmul.f32 %v2367_v19, %v3974_v6  ;;  %v1474_v18 = vmul.f32 -0.03274596, %v4031_v39  ;;  %v964_v0 = vmul.f32 4.0, %v836_v33  ;;  %v709_v4 = vfloor.f32 %v581_v49 }
 0x138   :  { %v2112_v2 = vadd.f32 11.33008, %v1984_v27  ;;  %v4041_v37 = vmul.f32 %v4035_v40, %v4035_v40  ;;  %v326_v51 = vfloor.f32 %v198_v34  ;;  %v1857_v58 = vadd.f32 -2.6624622, %v1729_v28 }
 0x139   :  { %v2623_v32 = vadd.f32 13.957728, %v2495_v26  ;;  %v1602_v6 = vadd.f32 0.36496454, %v1474_v18  ;;  %v1092_v29 = vsub.f32 1.0, %v964_v0  ;;  %v837_v61 = vsub.f32 %v581_v49, %v709_v4 }
 0x13a   :  { %v2240_v11 = vmul.f32 %v2112_v2, %v3999_v5  ;;  %v1475_v10 = vmul.f32 -0.03274596, %v4041_v37  ;;  %v453_v42 = vsub.f32 %v69_v46, %v325_v36  ;;  %v1985_v43 = vmul.f32 %v1857_v58, %v4015_v13 }
 0x13b   :  { %v2751_v35 = vmul.f32 %v2623_v32, %v3964_v52  ;;  %v1730_v21 = vmul.f32 %v1602_v6, %v4031_v39  ;;  %v4051_v1 = vmul.f32 %v1092_v29, %v452_v60  ;;  %v965_v63 = vmul.f32 4.0, %v837_v61 }
 0x13c   :  { %v2368_v3 = vadd.f32 -22.959543, %v2240_v11  ;;  %v1603_v54 = vadd.f32 0.36496454, %v1475_v10  ;;  %v582_v15 = vmul.f32 0.5, %v326_v51  ;;  %v199_v52 = vadd.f32 0.5, %v71_v12 }
 0x13d   :  { %2879 = vst [vmem:[%s5298_s1 + $0x1b8] sm:$0xff] %v2751_v35  ;;  %v2113_v45 = vadd.f32 11.33008, %v1985_v43  ;;  %v1858_v62 = vadd.f32 -2.6624622, %v1730_v21  ;;  %v4058_v46 = vmul.f32 %v4051_v1, %v4051_v1  ;;  %v1093_v57 = vsub.f32 1.0, %v965_v63 }
 0x13e   :  { %v2496_v30 = vmul.f32 %v2368_v3, %v3999_v5  ;;  %v1731_v50 = vmul.f32 %v1603_v54, %v4041_v37  ;;  %v710_v44 = vfloor.f32 %v582_v15  ;;  %v327_v20 = vfloor.f32 %v199_v52  ;;  %v4070_v5 = vld [vmem:[%s5297_s0 + $0x200] sm:$0xff]  ;;  %v73_v10 = vld [vmem:[%s5297_s0 + $0x208] sm:$0xff]  ;;  %v74_v54 = vld [vmem:[%s5297_s0 + $0x210] sm:$0xff] }
 0x13f   :  { %v2241_v17 = vmul.f32 %v2113_v45, %v4015_v13  ;;  %v1986_v48 = vmul.f32 %v1858_v62, %v4031_v39  ;;  %v1476_v47 = vmul.f32 -0.03274596, %v4058_v46  ;;  %v4065_v53 = vmul.f32 %v1093_v57, %v453_v42 }
 0x140   :  { %v2624_v14 = vadd.f32 13.957728, %v2496_v30  ;;  %v1859_v38 = vadd.f32 -2.6624622, %v1731_v50  ;;  %v454_v9 = vsub.f32 %v70_v25, %v326_v51  ;;  %v838_v8 = vsub.f32 %v582_v15, %v710_v44 }
 0x141   :  { %v2369_v56 = vadd.f32 -22.959543, %v2241_v17  ;;  %v2114_v36 = vadd.f32 11.33008, %v1986_v48  ;;  %v1604_v22 = vadd.f32 0.36496454, %v1476_v47  ;;  %v4074_v7 = vmul.f32 %v4065_v53, %v4065_v53 }
 0x142   :  { %v2752_v55 = vmul.f32 %v2624_v14, %v3994_v23  ;;  %v1987_v19 = vmul.f32 %v1859_v38, %v4041_v37  ;;  %v966_v16 = vmul.f32 4.0, %v838_v8  ;;  %v583_v31 = vmul.f32 0.5, %v327_v20 }
 0x143   :  { %v2497_v25 = vmul.f32 %v2369_v56, %v4015_v13  ;;  %v2242_v60 = vmul.f32 %v2114_v36, %v4031_v39  ;;  %v1732_v24 = vmul.f32 %v1604_v22, %v4058_v46  ;;  %v1477_v33 = vmul.f32 -0.03274596, %v4074_v7 }
 0x144   :  { %2880 = vst [vmem:[%s5298_s1 + $0x1c0] sm:$0xff] %v2752_v55  ;;  %v2115_v49 = vadd.f32 11.33008, %v1987_v19  ;;  %v1094_v26 = vsub.f32 1.0, %v966_v16  ;;  %v711_v27 = vfloor.f32 %v583_v31  ;;  %v200_v23 = vadd.f32 0.5, %v4070_v5 }
 0x145   :  { %v2625_v34 = vadd.f32 13.957728, %v2497_v25  ;;  %v2370_v28 = vadd.f32 -22.959543, %v2242_v60  ;;  %v1860_v18 = vadd.f32 -2.6624622, %v1732_v24  ;;  %v455_v0 = vsub.f32 %v71_v12, %v327_v20 }
 0x146   :  { %v2243_v13 = vmul.f32 %v2115_v49, %v4041_v37  ;;  %v1605_v4 = vadd.f32 0.36496454, %v1477_v33  ;;  %v4087_v32 = vmul.f32 %v1094_v26, %v454_v9  ;;  %v839_v2 = vsub.f32 %v583_v31, %v711_v27  ;;  %v75_v9 = vld [vmem:[%s5297_s0 + $0x218] sm:$0xff]  ;;  %v76_v26 = vld [vmem:[%s5297_s0 + $0x220] sm:$0xff] }
 0x147   :  { %v2753_v51 = vmul.f32 %v2625_v34, %v4011_v59  ;;  %v2498_v58 = vmul.f32 %v2370_v28, %v4031_v39  ;;  %v1988_v6 = vmul.f32 %v1860_v18, %v4058_v46  ;;  %v328_v29 = vfloor.f32 %v200_v23 }
 0x148   :  { %v2371_v61 = vadd.f32 -22.959543, %v2243_v13  ;;  %v1733_v35 = vmul.f32 %v1605_v4, %v4074_v7  ;;  %v4095_v11 = vmul.f32 %v4087_v32, %v4087_v32  ;;  %v967_v12 = vmul.f32 4.0, %v839_v2 }
 0x149   :  { %2881 = vst [vmem:[%s5298_s1 + $0x1c8] sm:$0xff] %v2753_v51  ;;  %v2626_v59 = vadd.f32 13.957728, %v2498_v58  ;;  %v2116_v39 = vadd.f32 11.33008, %v1988_v6  ;;  %v584_v42 = vmul.f32 0.5, %v328_v29  ;;  %v456_v56 = vsub.f32 %v4070_v5, %v328_v29 }
 0x14a   :  { %v2499_v43 = vmul.f32 %v2371_v61, %v4041_v37  ;;  %v1861_v21 = vadd.f32 -2.6624622, %v1733_v35  ;;  %v1478_v63 = vmul.f32 -0.03274596, %v4095_v11  ;;  %v1095_v3 = vsub.f32 1.0, %v967_v12 }
 0x14b   :  { %v2754_v15 = vmul.f32 %v2626_v59, %v4021_v41  ;;  %v2244_v52 = vmul.f32 %v2116_v39, %v4058_v46  ;;  %v712_v45 = vfloor.f32 %v584_v42  ;;  %v201_v62 = vadd.f32 0.5, %v73_v10 }
 0x14c   :  { %v2627_v57 = vadd.f32 13.957728, %v2499_v43  ;;  %v1989_v30 = vmul.f32 %v1861_v21, %v4074_v7  ;;  %v1606_v50 = vadd.f32 0.36496454, %v1478_v63  ;;  %v4111_v44 = vmul.f32 %v1095_v3, %v455_v0 }
 0x14d   :  { %2882 = vst [vmem:[%s5298_s1 + $0x1d0] sm:$0xff] %v2754_v15  ;;  %v2372_v37 = vadd.f32 -22.959543, %v2244_v52  ;;  %v840_v20 = vsub.f32 %v584_v42, %v712_v45  ;;  %v329_v17 = vfloor.f32 %v201_v62  ;;  %v202_v48 = vadd.f32 0.5, %v74_v54 }
 0x14e   :  { %v2755_v41 = vmul.f32 %v2627_v57, %v4035_v40  ;;  %v2117_v47 = vadd.f32 11.33008, %v1989_v30  ;;  %v1734_v14 = vmul.f32 %v1606_v50, %v4095_v11  ;;  %v4120_v38 = vmul.f32 %v4111_v44, %v4111_v44 }
 0x14f   :  { %v2500_v8 = vmul.f32 %v2372_v37, %v4058_v46  ;;  %v968_v36 = vmul.f32 4.0, %v840_v20  ;;  %v585_v22 = vmul.f32 0.5, %v329_v17  ;;  %v330_v16 = vfloor.f32 %v202_v48 }
 0x150   :  { %2883 = vst [vmem:[%s5298_s1 + $0x1d8] sm:$0xff] %v2755_v41  ;;  %v2245_v40 = vmul.f32 %v2117_v47, %v4074_v7  ;;  %v1862_v55 = vadd.f32 -2.6624622, %v1734_v14  ;;  %v1479_v19 = vmul.f32 -0.03274596, %v4120_v38  ;;  %v203_v24 = vadd.f32 0.5, %v75_v9 }
 0x151   :  { %v2628_v31 = vadd.f32 13.957728, %v2500_v8  ;;  %v1096_v25 = vsub.f32 1.0, %v968_v36  ;;  %v713_v60 = vfloor.f32 %v585_v22  ;;  %v457_v49 = vsub.f32 %v73_v10, %v329_v17 }
 0x152   :  { %v2373_v33 = vadd.f32 -22.959543, %v2245_v40  ;;  %v1990_v46 = vmul.f32 %v1862_v55, %v4095_v11  ;;  %v1607_v5 = vadd.f32 0.36496454, %v1479_v19  ;;  %v586_v28 = vmul.f32 0.5, %v330_v16 }
 0x153   :  { %v2756_v27 = vmul.f32 %v2628_v31, %v4051_v1  ;;  %v4137_v23 = vmul.f32 %v1096_v25, %v456_v56  ;;  %v841_v34 = vsub.f32 %v585_v22, %v713_v60  ;;  %v331_v4 = vfloor.f32 %v203_v24  ;;  %v78_v25 = vld [vmem:[%s5297_s0 + $0x230] sm:$0xff] }
 0x154   :  { %v2501_v18 = vmul.f32 %v2373_v33, %v4074_v7  ;;  %v2118_v0 = vadd.f32 11.33008, %v1990_v46  ;;  %v1735_v13 = vmul.f32 %v1607_v5, %v4120_v38  ;;  %v714_v1 = vfloor.f32 %v586_v28 }
 0x155   :  { %2884 = vst [vmem:[%s5298_s1 + $0x1e0] sm:$0xff] %v2756_v27  ;;  %v4146_v2 = vmul.f32 %v4137_v23, %v4137_v23  ;;  %v969_v51 = vmul.f32 4.0, %v841_v34  ;;  %v204_v58 = vadd.f32 0.5, %v76_v26  ;;  %v458_v7 = vsub.f32 %v74_v54, %v330_v16  ;;  %v77_v54 = vld [vmem:[%s5297_s0 + $0x228] sm:$0xff] }
 0x156   :  { %v2629_v6 = vadd.f32 13.957728, %v2501_v18  ;;  %v2246_v29 = vmul.f32 %v2118_v0, %v4095_v11  ;;  %v1863_v61 = vadd.f32 -2.6624622, %v1735_v13  ;;  %v842_v10 = vsub.f32 %v586_v28, %v714_v1 }
 0x157   :  { %v1480_v35 = vmul.f32 -0.03274596, %v4146_v2  ;;  %v1097_v12 = vsub.f32 1.0, %v969_v51  ;;  %v587_v59 = vmul.f32 0.5, %v331_v4  ;;  %v332_v21 = vfloor.f32 %v204_v58 }
 0x158   :  { %v2757_v39 = vmul.f32 %v2629_v6, %v4065_v53  ;;  %v2374_v42 = vadd.f32 -22.959543, %v2246_v29  ;;  %v1991_v43 = vmul.f32 %v1863_v61, %v4120_v38  ;;  %v970_v15 = vmul.f32 4.0, %v842_v10 }
 0x159   :  { %v1608_v63 = vadd.f32 0.36496454, %v1480_v35  ;;  %v4152_v3 = vmul.f32 %v1097_v12, %v457_v49  ;;  %v715_v52 = vfloor.f32 %v587_v59  ;;  %v459_v62 = vsub.f32 %v75_v9, %v331_v4  ;;  %v79_v12 = vld [vmem:[%s5297_s0 + $0x238] sm:$0xff] }
 0x15a   :  { %2885 = vst [vmem:[%s5298_s1 + $0x1e8] sm:$0xff] %v2757_v39  ;;  %v2502_v45 = vmul.f32 %v2374_v42, %v4095_v11  ;;  %v2119_v53 = vadd.f32 11.33008, %v1991_v43  ;;  %v588_v57 = vmul.f32 0.5, %v332_v21  ;;  %v1098_v37 = vsub.f32 1.0, %v970_v15 }
 0x15b   :  { %v1736_v30 = vmul.f32 %v1608_v63, %v4146_v2  ;;  %v4164_v50 = vmul.f32 %v4152_v3, %v4152_v3  ;;  %v843_v20 = vsub.f32 %v587_v59, %v715_v52  ;;  %v205_v47 = vadd.f32 0.5, %v77_v54 }
 0x15c   :  { %v2630_v17 = vadd.f32 13.957728, %v2502_v45  ;;  %v2247_v48 = vmul.f32 %v2119_v53, %v4120_v38  ;;  %v716_v41 = vfloor.f32 %v588_v57  ;;  %v4168_v11 = vmul.f32 %v1098_v37, %v458_v7 }
 0x15d   :  { %v1864_v14 = vadd.f32 -2.6624622, %v1736_v30  ;;  %v1481_v8 = vmul.f32 -0.03274596, %v4164_v50  ;;  %v971_v9 = vmul.f32 4.0, %v843_v20  ;;  %v333_v40 = vfloor.f32 %v205_v47 }
 0x15e   :  { %v2758_v56 = vmul.f32 %v2630_v17, %v4087_v32  ;;  %v2375_v36 = vadd.f32 -22.959543, %v2247_v48  ;;  %v844_v22 = vsub.f32 %v588_v57, %v716_v41  ;;  %v4174_v16 = vmul.f32 %v4168_v11, %v4168_v11  ;;  %v80_v48 = vld [vmem:[%s5297_s0 + $0x240] sm:$0xff] }
 0x15f   :  { %v1992_v55 = vmul.f32 %v1864_v14, %v4146_v2  ;;  %v1609_v19 = vadd.f32 0.36496454, %v1481_v8  ;;  %v1099_v31 = vsub.f32 1.0, %v971_v9  ;;  %v460_v60 = vsub.f32 %v76_v26, %v332_v21 }
 0x160   :  { %2886 = vst [vmem:[%s5298_s1 + $0x1f0] sm:$0xff] %v2758_v56  ;;  %v2503_v32 = vmul.f32 %v2375_v36, %v4120_v38  ;;  %v972_v24 = vmul.f32 4.0, %v844_v22  ;;  %v589_v33 = vmul.f32 0.5, %v333_v40  ;;  %v1482_v49 = vmul.f32 -0.03274596, %v4174_v16 }
 0x161   :  { %v2120_v46 = vadd.f32 11.33008, %v1992_v55  ;;  %v1737_v5 = vmul.f32 %v1609_v19, %v4164_v50  ;;  %v4185_v27 = vmul.f32 %v1099_v31, %v459_v62  ;;  %v206_v0 = vadd.f32 0.5, %v78_v25 }
 0x162   :  { %v2631_v34 = vadd.f32 13.957728, %v2503_v32  ;;  %v1100_v28 = vsub.f32 1.0, %v972_v24  ;;  %v717_v18 = vfloor.f32 %v589_v33  ;;  %v1610_v51 = vadd.f32 0.36496454, %v1482_v49 }
 0x163   :  { %v2248_v13 = vmul.f32 %v2120_v46, %v4146_v2  ;;  %v1865_v4 = vadd.f32 -2.6624622, %v1737_v5  ;;  %v4190_v38 = vmul.f32 %v4185_v27, %v4185_v27  ;;  %v334_v6 = vfloor.f32 %v206_v0 }
 0x164   :  { %v2759_v26 = vmul.f32 %v2631_v34, %v4111_v44  ;;  %v4193_v1 = vmul.f32 %v1100_v28, %v460_v60  ;;  %v845_v58 = vsub.f32 %v589_v33, %v717_v18  ;;  %v1738_v7 = vmul.f32 %v1610_v51, %v4174_v16  ;;  %v81_v51 = vld [vmem:[%s5297_s0 + $0x248] sm:$0xff] }
 0x165   :  { %v2376_v29 = vadd.f32 -22.959543, %v2248_v13  ;;  %v1993_v61 = vmul.f32 %v1865_v4, %v4164_v50  ;;  %v1483_v35 = vmul.f32 -0.03274596, %v4190_v38  ;;  %v461_v10 = vsub.f32 %v77_v54, %v333_v40 }
 0x166   :  { %2887 = vst [vmem:[%s5298_s1 + $0x1f8] sm:$0xff] %v2759_v26  ;;  %v4206_v44 = vmul.f32 %v4193_v1, %v4193_v1  ;;  %v973_v59 = vmul.f32 4.0, %v845_v58  ;;  %v590_v39 = vmul.f32 0.5, %v334_v6  ;;  %v1866_v21 = vadd.f32 -2.6624622, %v1738_v7 }
 0x167   :  { %v2504_v42 = vmul.f32 %v2376_v29, %v4146_v2  ;;  %v2121_v43 = vadd.f32 11.33008, %v1993_v61  ;;  %v1611_v63 = vadd.f32 0.36496454, %v1483_v35  ;;  %v207_v53 = vadd.f32 0.5, %v79_v12 }
 0x168   :  { %v1484_v15 = vmul.f32 -0.03274596, %v4206_v44  ;;  %v1101_v52 = vsub.f32 1.0, %v973_v59  ;;  %v718_v45 = vfloor.f32 %v590_v39  ;;  %v1994_v30 = vmul.f32 %v1866_v21, %v4174_v16 }
 0x169   :  { %v2632_v62 = vadd.f32 13.957728, %v2504_v42  ;;  %v2249_v57 = vmul.f32 %v2121_v43, %v4164_v50  ;;  %v1739_v37 = vmul.f32 %v1611_v63, %v4190_v38  ;;  %v335_v2 = vfloor.f32 %v207_v53  ;;  %v82_v42 = vld [vmem:[%s5297_s0 + $0x250] sm:$0xff] }
 0x16a   :  { %v1612_v54 = vadd.f32 0.36496454, %v1484_v15  ;;  %v4213_v20 = vmul.f32 %v1101_v52, %v461_v10  ;;  %v846_v17 = vsub.f32 %v590_v39, %v718_v45  ;;  %v2122_v14 = vadd.f32 11.33008, %v1994_v30 }
 0x16b   :  { %v2760_v41 = vmul.f32 %v2632_v62, %v4137_v23  ;;  %v2377_v47 = vadd.f32 -22.959543, %v2249_v57  ;;  %v1867_v8 = vadd.f32 -2.6624622, %v1739_v37  ;;  %v462_v36 = vsub.f32 %v78_v25, %v334_v6 }
 0x16c   :  { %v1740_v9 = vmul.f32 %v1612_v54, %v4206_v44  ;;  %v4222_v56 = vmul.f32 %v4213_v20, %v4213_v20  ;;  %v974_v22 = vmul.f32 4.0, %v846_v17  ;;  %v2250_v55 = vmul.f32 %v2122_v14, %v4174_v16 }
 0x16d   :  { %2888 = vst [vmem:[%s5298_s1 + $0x200] sm:$0xff] %v2760_v41  ;;  %v2505_v40 = vmul.f32 %v2377_v47, %v4164_v50  ;;  %v1995_v23 = vmul.f32 %v1867_v8, %v4190_v38  ;;  %v591_v19 = vmul.f32 0.5, %v335_v2  ;;  %v208_v24 = vadd.f32 0.5, %v80_v48 }
 0x16e   :  { %v1868_v31 = vadd.f32 -2.6624622, %v1740_v9  ;;  %v1485_v32 = vmul.f32 -0.03274596, %v4222_v56  ;;  %v1102_v60 = vsub.f32 1.0, %v974_v22  ;;  %v463_v29 = vsub.f32 %v79_v12, %v335_v2  ;;  %v83_v2 = vld [vmem:[%s5297_s0 + $0x258] sm:$0xff] }
 0x16f   :  { %v2633_v33 = vadd.f32 13.957728, %v2505_v40  ;;  %v2378_v46 = vadd.f32 -22.959543, %v2250_v55  ;;  %v2123_v25 = vadd.f32 11.33008, %v1995_v23  ;;  %v719_v5 = vfloor.f32 %v591_v19 }
 0x170   :  { %v1996_v49 = vmul.f32 %v1868_v31, %v4206_v44  ;;  %v1613_v34 = vadd.f32 0.36496454, %v1485_v32  ;;  %v4232_v28 = vmul.f32 %v1102_v60, %v462_v36  ;;  %v336_v50 = vfloor.f32 %v208_v24  ;;  %v4279_v23 = vld [vmem:[%s5297_s0 + $0x260] sm:$0xff] }
 0x171   :  { %v2761_v18 = vmul.f32 %v2633_v33, %v4152_v3  ;;  %v2506_v0 = vmul.f32 %v2378_v46, %v4174_v16  ;;  %v2251_v13 = vmul.f32 %v2123_v25, %v4190_v38  ;;  %v847_v4 = vsub.f32 %v591_v19, %v719_v5 }
 0x172   :  { %v2124_v26 = vadd.f32 11.33008, %v1996_v49  ;;  %v1741_v58 = vmul.f32 %v1613_v34, %v4222_v56  ;;  %v4243_v6 = vmul.f32 %v4232_v28, %v4232_v28  ;;  %v592_v7 = vmul.f32 0.5, %v336_v50 }
 0x173   :  { %2889 = vst [vmem:[%s5298_s1 + $0x208] sm:$0xff] %v2761_v18  ;;  %v2634_v3 = vadd.f32 13.957728, %v2506_v0  ;;  %v2379_v16 = vadd.f32 -22.959543, %v2251_v13  ;;  %v975_v61 = vmul.f32 4.0, %v847_v4  ;;  %v464_v17 = vsub.f32 %v80_v48, %v336_v50 }
 0x174   :  { %v2252_v35 = vmul.f32 %v2124_v26, %v4206_v44  ;;  %v1869_v10 = vadd.f32 -2.6624622, %v1741_v58  ;;  %v1486_v59 = vmul.f32 -0.03274596, %v4243_v6  ;;  %v209_v39 = vadd.f32 0.5, %v81_v51 }
 0x175   :  { %v2762_v12 = vmul.f32 %v2634_v3, %v4168_v11  ;;  %v2507_v43 = vmul.f32 %v2379_v16, %v4190_v38  ;;  %v1103_v21 = vsub.f32 1.0, %v975_v61  ;;  %v720_v63 = vfloor.f32 %v592_v7 }
 0x176   :  { %v2380_v15 = vadd.f32 -22.959543, %v2252_v35  ;;  %v1997_v52 = vmul.f32 %v1869_v10, %v4222_v56  ;;  %v1614_v45 = vadd.f32 0.36496454, %v1486_v59  ;;  %v337_v53 = vfloor.f32 %v209_v39 }
 0x177   :  { %2890 = vst [vmem:[%s5298_s1 + $0x210] sm:$0xff] %v2762_v12  ;;  %v2635_v62 = vadd.f32 13.957728, %v2507_v43  ;;  %v4259_v57 = vmul.f32 %v1103_v21, %v463_v29  ;;  %v848_v30 = vsub.f32 %v592_v7, %v720_v63  ;;  %v210_v37 = vadd.f32 0.5, %v82_v42 }
 0x178   :  { %v2508_v11 = vmul.f32 %v2380_v15, %v4206_v44  ;;  %v2125_v54 = vadd.f32 11.33008, %v1997_v52  ;;  %v1742_v38 = vmul.f32 %v1614_v45, %v4243_v6  ;;  %v593_v8 = vmul.f32 0.5, %v337_v53 }
 0x179   :  { %v2763_v41 = vmul.f32 %v2635_v62, %v4185_v27  ;;  %v4269_v47 = vmul.f32 %v4259_v57, %v4259_v57  ;;  %v976_v14 = vmul.f32 4.0, %v848_v30  ;;  %v338_v22 = vfloor.f32 %v210_v37 }
 0x17a   :  { %v2636_v9 = vadd.f32 13.957728, %v2508_v11  ;;  %v2253_v36 = vmul.f32 %v2125_v54, %v4222_v56  ;;  %v1870_v44 = vadd.f32 -2.6624622, %v1742_v38  ;;  %v721_v55 = vfloor.f32 %v593_v8 }
 0x17b   :  { %2891 = vst [vmem:[%s5298_s1 + $0x218] sm:$0xff] %v2763_v41  ;;  %v1487_v48 = vmul.f32 -0.03274596, %v4269_v47  ;;  %v1104_v40 = vsub.f32 1.0, %v976_v14  ;;  %v211_v27 = vadd.f32 0.5, %v83_v2  ;;  %v465_v60 = vsub.f32 %v81_v51, %v337_v53 }
 0x17c   :  { %v2764_v19 = vmul.f32 %v2636_v9, %v4193_v1  ;;  %v2381_v31 = vadd.f32 -22.959543, %v2253_v36  ;;  %v1998_v32 = vmul.f32 %v1870_v44, %v4243_v6  ;;  %v849_v46 = vsub.f32 %v593_v8, %v721_v55 }
 0x17d   :  { %v1615_v24 = vadd.f32 0.36496454, %v1487_v48  ;;  %v4283_v33 = vmul.f32 %v1104_v40, %v464_v17  ;;  %v594_v25 = vmul.f32 0.5, %v338_v22  ;;  %v339_v34 = vfloor.f32 %v211_v27  ;;  %v86_v40 = vld [vmem:[%s5297_s0 + $0x270] sm:$0xff] }
 0x17e   :  { %2892 = vst [vmem:[%s5298_s1 + $0x220] sm:$0xff] %v2764_v19  ;;  %v2509_v5 = vmul.f32 %v2381_v31, %v4222_v56  ;;  %v2126_v49 = vadd.f32 11.33008, %v1998_v32  ;;  %v212_v50 = vadd.f32 0.5, %v4279_v23  ;;  %v977_v0 = vmul.f32 4.0, %v849_v46 }
 0x17f   :  { %v1743_v1 = vmul.f32 %v1615_v24, %v4269_v47  ;;  %v4293_v18 = vmul.f32 %v4283_v33, %v4283_v33  ;;  %v722_v13 = vfloor.f32 %v594_v25  ;;  %v466_v26 = vsub.f32 %v82_v42, %v338_v22  ;;  %v85_v42 = vld [vmem:[%s5297_s0 + $0x268] sm:$0xff] }
 0x180   :  { %v2637_v4 = vadd.f32 13.957728, %v2509_v5  ;;  %v2254_v51 = vmul.f32 %v2126_v49, %v4243_v6  ;;  %v595_v58 = vmul.f32 0.5, %v339_v34  ;;  %v1105_v3 = vsub.f32 1.0, %v977_v0 }
 0x181   :  { %v1871_v29 = vadd.f32 -2.6624622, %v1743_v1  ;;  %v1488_v56 = vmul.f32 -0.03274596, %v4293_v18  ;;  %v850_v16 = vsub.f32 %v594_v25, %v722_v13  ;;  %v340_v10 = vfloor.f32 %v212_v50 }
 0x182   :  { %v2765_v61 = vmul.f32 %v2637_v4, %v4213_v20  ;;  %v2382_v7 = vadd.f32 -22.959543, %v2254_v51  ;;  %v723_v35 = vfloor.f32 %v595_v58  ;;  %v4299_v12 = vmul.f32 %v1105_v3, %v465_v60 }
 0x183   :  { %v1999_v59 = vmul.f32 %v1871_v29, %v4269_v47  ;;  %v1616_v39 = vadd.f32 0.36496454, %v1488_v56  ;;  %v978_v43 = vmul.f32 4.0, %v850_v16  ;;  %v467_v20 = vsub.f32 %v83_v2, %v339_v34  ;;  %v87_v56 = vld [vmem:[%s5297_s0 + $0x278] sm:$0xff] }
 0x184   :  { %2893 = vst [vmem:[%s5298_s1 + $0x228] sm:$0xff] %v2765_v61  ;;  %v2510_v21 = vmul.f32 %v2382_v7, %v4243_v6  ;;  %v851_v63 = vsub.f32 %v595_v58, %v723_v35  ;;  %v596_v15 = vmul.f32 0.5, %v340_v10  ;;  %v4311_v53 = vmul.f32 %v4299_v12, %v4299_v12 }
 0x185   :  { %v2127_v52 = vadd.f32 11.33008, %v1999_v59  ;;  %v1744_v45 = vmul.f32 %v1616_v39, %v4293_v18  ;;  %v1106_v62 = vsub.f32 1.0, %v978_v43  ;;  %v213_v54 = vadd.f32 0.5, %v85_v42 }
 0x186   :  { %v2638_v30 = vadd.f32 13.957728, %v2510_v21  ;;  %v979_v37 = vmul.f32 4.0, %v851_v63  ;;  %v724_v11 = vfloor.f32 %v596_v15  ;;  %v1489_v6 = vmul.f32 -0.03274596, %v4311_v53 }
 0x187   :  { %v2255_v38 = vmul.f32 %v2127_v52, %v4269_v47  ;;  %v1872_v17 = vadd.f32 -2.6624622, %v1744_v45  ;;  %v4315_v2 = vmul.f32 %v1106_v62, %v466_v26  ;;  %v341_v9 = vfloor.f32 %v213_v54 }
 0x188   :  { %v2766_v41 = vmul.f32 %v2638_v30, %v4232_v28  ;;  %v1107_v14 = vsub.f32 1.0, %v979_v37  ;;  %v852_v8 = vsub.f32 %v596_v15, %v724_v11  ;;  %v1617_v22 = vadd.f32 0.36496454, %v1489_v6 }
 0x189   :  { %v2383_v36 = vadd.f32 -22.959543, %v2255_v38  ;;  %v2000_v44 = vmul.f32 %v1872_v17, %v4293_v18  ;;  %v4321_v48 = vmul.f32 %v4315_v2, %v4315_v2  ;;  %v468_v55 = vsub.f32 %v4279_v23, %v340_v10 }
 0x18a   :  { %2894 = vst [vmem:[%s5298_s1 + $0x230] sm:$0xff] %v2766_v41  ;;  %v4329_v28 = vmul.f32 %v1107_v14, %v467_v20  ;;  %v980_v27 = vmul.f32 4.0, %v852_v8  ;;  %v597_v19 = vmul.f32 0.5, %v341_v9  ;;  %v1745_v60 = vmul.f32 %v1617_v22, %v4311_v53 }
 0x18b   :  { %v2511_v31 = vmul.f32 %v2383_v36, %v4269_v47  ;;  %v2128_v32 = vadd.f32 11.33008, %v2000_v44  ;;  %v1490_v24 = vmul.f32 -0.03274596, %v4321_v48  ;;  %v214_v49 = vadd.f32 0.5, %v86_v40  ;;  %v88_v44 = vld [vmem:[%s5297_s0 + $0x280] sm:$0xff] }
 0x18c   :  { %v4337_v46 = vmul.f32 %v4329_v28, %v4329_v28  ;;  %v1108_v25 = vsub.f32 1.0, %v980_v27  ;;  %v725_v5 = vfloor.f32 %v597_v19  ;;  %v1873_v23 = vadd.f32 -2.6624622, %v1745_v60 }
 0x18d   :  { %v2639_v34 = vadd.f32 13.957728, %v2511_v31  ;;  %v2256_v50 = vmul.f32 %v2128_v32, %v4293_v18  ;;  %v1618_v1 = vadd.f32 0.36496454, %v1490_v24  ;;  %v342_v4 = vfloor.f32 %v214_v49  ;;  %v89_v49 = vld [vmem:[%s5297_s0 + $0x288] sm:$0xff] }
 0x18e   :  { %v1491_v0 = vmul.f32 -0.03274596, %v4337_v46  ;;  %v4341_v47 = vmul.f32 %v1108_v25, %v468_v55  ;;  %v853_v13 = vsub.f32 %v597_v19, %v725_v5  ;;  %v2001_v58 = vmul.f32 %v1873_v23, %v4311_v53 }
 0x18f   :  { %v2767_v51 = vmul.f32 %v2639_v34, %v4259_v57  ;;  %v2384_v26 = vadd.f32 -22.959543, %v2256_v50  ;;  %v1746_v29 = vmul.f32 %v1618_v1, %v4321_v48  ;;  %v469_v61 = vsub.f32 %v85_v42, %v341_v9 }
 0x190   :  { %v1619_v3 = vadd.f32 0.36496454, %v1491_v0  ;;  %v4351_v16 = vmul.f32 %v4341_v47, %v4341_v47  ;;  %v981_v7 = vmul.f32 4.0, %v853_v13  ;;  %v2129_v35 = vadd.f32 11.33008, %v2001_v58 }
 0x191   :  { %2895 = vst [vmem:[%s5298_s1 + $0x238] sm:$0xff] %v2767_v51  ;;  %v2512_v57 = vmul.f32 %v2384_v26, %v4293_v18  ;;  %v1874_v10 = vadd.f32 -2.6624622, %v1746_v29  ;;  %v598_v59 = vmul.f32 0.5, %v342_v4  ;;  %v215_v20 = vadd.f32 0.5, %v87_v56 }
 0x192   :  { %v1747_v39 = vmul.f32 %v1619_v3, %v4337_v46  ;;  %v1492_v43 = vmul.f32 -0.03274596, %v4351_v16  ;;  %v1109_v21 = vsub.f32 1.0, %v981_v7  ;;  %v2257_v15 = vmul.f32 %v2129_v35, %v4311_v53 }
 0x193   :  { %v2640_v63 = vadd.f32 13.957728, %v2512_v57  ;;  %v2002_v42 = vmul.f32 %v1874_v10, %v4321_v48  ;;  %v726_v52 = vfloor.f32 %v598_v59  ;;  %v343_v18 = vfloor.f32 %v215_v20 }
 0x194   :  { %v1875_v45 = vadd.f32 -2.6624622, %v1747_v39  ;;  %v1620_v62 = vadd.f32 0.36496454, %v1492_v43  ;;  %v4361_v30 = vmul.f32 %v1109_v21, %v469_v61  ;;  %v2385_v11 = vadd.f32 -22.959543, %v2257_v15 }
 0x195   :  { %v2768_v37 = vmul.f32 %v2640_v63, %v4283_v33  ;;  %v2130_v54 = vadd.f32 11.33008, %v2002_v42  ;;  %v854_v38 = vsub.f32 %v598_v59, %v726_v52  ;;  %v470_v14 = vsub.f32 %v86_v40, %v342_v4  ;;  %v90_v61 = vld [vmem:[%s5297_s0 + $0x290] sm:$0xff] }
 0x196   :  { %v2003_v17 = vmul.f32 %v1875_v45, %v4337_v46  ;;  %v1748_v6 = vmul.f32 %v1620_v62, %v4351_v16  ;;  %v4368_v41 = vmul.f32 %v4361_v30, %v4361_v30  ;;  %v2513_v8 = vmul.f32 %v2385_v11, %v4311_v53 }
 0x197   :  { %2896 = vst [vmem:[%s5298_s1 + $0x240] sm:$0xff] %v2768_v37  ;;  %v2258_v33 = vmul.f32 %v2130_v54, %v4321_v48  ;;  %v982_v9 = vmul.f32 4.0, %v854_v38  ;;  %v599_v36 = vmul.f32 0.5, %v343_v18  ;;  %v471_v19 = vsub.f32 %v87_v56, %v343_v18 }
 0x198   :  { %v2131_v22 = vadd.f32 11.33008, %v2003_v17  ;;  %v1876_v55 = vadd.f32 -2.6624622, %v1748_v6  ;;  %v1493_v27 = vmul.f32 -0.03274596, %v4368_v41 }
 0x199   :  { %v2641_v40 = vadd.f32 13.957728, %v2513_v8  ;;  %v2386_v31 = vadd.f32 -22.959543, %v2258_v33  ;;  %v1110_v32 = vsub.f32 1.0, %v982_v9  ;;  %v727_v60 = vfloor.f32 %v599_v36  ;;  %v4427_v9 = vld [vmem:[%s5297_s0 + $0x2a0] sm:$0xff] }
 0x19a   :  { %v2259_v24 = vmul.f32 %v2131_v22, %v4337_v46  ;;  %v2004_v53 = vmul.f32 %v1876_v55, %v4351_v16  ;;  %v1621_v25 = vadd.f32 0.36496454, %v1493_v27  ;;  %v216_v5 = vadd.f32 0.5, %v88_v44 }
 0x19b   :  { %v2769_v34 = vmul.f32 %v2641_v40, %v4299_v12  ;;  %v2514_v50 = vmul.f32 %v2386_v31, %v4321_v48  ;;  %v4386_v23 = vmul.f32 %v1110_v32, %v470_v14  ;;  %v855_v1 = vsub.f32 %v599_v36, %v727_v60 }
 0x19c   :  { %v2387_v0 = vadd.f32 -22.959543, %v2259_v24  ;;  %v2132_v13 = vadd.f32 11.33008, %v2004_v53  ;;  %v1749_v4 = vmul.f32 %v1621_v25, %v4368_v41  ;;  %v344_v51 = vfloor.f32 %v216_v5 }
 0x19d   :  { %2897 = vst [vmem:[%s5298_s1 + $0x248] sm:$0xff] %v2769_v34  ;;  %v2642_v26 = vadd.f32 13.957728, %v2514_v50  ;;  %v4394_v58 = vmul.f32 %v4386_v23, %v4386_v23  ;;  %v983_v12 = vmul.f32 4.0, %v855_v1  ;;  %v217_v29 = vadd.f32 0.5, %v89_v49 }
 0x19e   :  { %v2515_v48 = vmul.f32 %v2387_v0, %v4337_v46  ;;  %v2260_v56 = vmul.f32 %v2132_v13, %v4351_v16  ;;  %v1877_v3 = vadd.f32 -2.6624622, %v1749_v4  ;;  %v600_v10 = vmul.f32 0.5, %v344_v51 }
 0x19f   :  { %v2770_v7 = vmul.f32 %v2642_v26, %v4315_v2  ;;  %v1494_v57 = vmul.f32 -0.03274596, %v4394_v58  ;;  %v1111_v35 = vsub.f32 1.0, %v983_v12  ;;  %v345_v21 = vfloor.f32 %v217_v29  ;;  %v91_v2 = vld [vmem:[%s5297_s0 + $0x298] sm:$0xff] }
 0x1a0   :  { %v2643_v59 = vadd.f32 13.957728, %v2515_v48  ;;  %v2388_v39 = vadd.f32 -22.959543, %v2260_v56  ;;  %v2005_v43 = vmul.f32 %v1877_v3, %v4368_v41  ;;  %v728_v63 = vfloor.f32 %v600_v10 }
 0x1a1   :  { %2898 = vst [vmem:[%s5298_s1 + $0x250] sm:$0xff] %v2770_v7  ;;  %v1622_v46 = vadd.f32 0.36496454, %v1494_v57  ;;  %v4407_v20 = vmul.f32 %v1111_v35, %v471_v19  ;;  %v218_v15 = vadd.f32 0.5, %v90_v61  ;;  %v472_v62 = vsub.f32 %v88_v44, %v344_v51  ;;  %v93_v57 = vld [vmem:[%s5297_s0 + $0x2a8] sm:$0xff] }
 0x1a2   :  { %v2771_v42 = vmul.f32 %v2643_v59, %v4329_v28  ;;  %v2516_v52 = vmul.f32 %v2388_v39, %v4351_v16  ;;  %v2133_v45 = vadd.f32 11.33008, %v2005_v43  ;;  %v856_v11 = vsub.f32 %v600_v10, %v728_v63 }
 0x1a3   :  { %v1750_v18 = vmul.f32 %v1622_v46, %v4394_v58  ;;  %v4417_v37 = vmul.f32 %v4407_v20, %v4407_v20  ;;  %v601_v54 = vmul.f32 0.5, %v345_v21  ;;  %v346_v28 = vfloor.f32 %v218_v15 }
 0x1a4   :  { %2899 = vst [vmem:[%s5298_s1 + $0x258] sm:$0xff] %v2771_v42  ;;  %v2644_v38 = vadd.f32 13.957728, %v2516_v52  ;;  %v2261_v17 = vmul.f32 %v2133_v45, %v4368_v41  ;;  %v219_v6 = vadd.f32 0.5, %v91_v2  ;;  %v984_v8 = vmul.f32 4.0, %v856_v11 }
 0x1a5   :  { %v1878_v16 = vadd.f32 -2.6624622, %v1750_v18  ;;  %v1495_v14 = vmul.f32 -0.03274596, %v4417_v37  ;;  %v729_v33 = vfloor.f32 %v601_v54  ;;  %v473_v22 = vsub.f32 %v89_v49, %v345_v21 }
 0x1a6   :  { %v2772_v36 = vmul.f32 %v2644_v38, %v4341_v47  ;;  %v2389_v44 = vadd.f32 -22.959543, %v2261_v17  ;;  %v602_v55 = vmul.f32 0.5, %v346_v28  ;;  %v1112_v40 = vsub.f32 1.0, %v984_v8  ;;  %v94_v17 = vld [vmem:[%s5297_s0 + $0x2b0] sm:$0xff] }
 0x1a7   :  { %v2006_v27 = vmul.f32 %v1878_v16, %v4394_v58  ;;  %v1623_v19 = vadd.f32 0.36496454, %v1495_v14  ;;  %v857_v31 = vsub.f32 %v601_v54, %v729_v33  ;;  %v347_v24 = vfloor.f32 %v219_v6 }
 0x1a8   :  { %2900 = vst [vmem:[%s5298_s1 + $0x260] sm:$0xff] %v2772_v36  ;;  %v2517_v32 = vmul.f32 %v2389_v44, %v4368_v41  ;;  %v730_v60 = vfloor.f32 %v602_v55  ;;  %v220_v53 = vadd.f32 0.5, %v4427_v9  ;;  %v4437_v5 = vmul.f32 %v1112_v40, %v472_v62 }
 0x1a9   :  { %v2134_v25 = vadd.f32 11.33008, %v2006_v27  ;;  %v1751_v47 = vmul.f32 %v1623_v19, %v4417_v37  ;;  %v985_v49 = vmul.f32 4.0, %v857_v31  ;;  %v474_v50 = vsub.f32 %v90_v61, %v346_v28 }
 0x1aa   :  { %v2645_v34 = vadd.f32 13.957728, %v2517_v32  ;;  %v858_v1 = vsub.f32 %v602_v55, %v730_v60  ;;  %v603_v0 = vmul.f32 0.5, %v347_v24  ;;  %v4442_v41 = vmul.f32 %v4437_v5, %v4437_v5 }
 0x1ab   :  { %v2262_v13 = vmul.f32 %v2134_v25, %v4394_v58  ;;  %v1879_v4 = vadd.f32 -2.6624622, %v1751_v47  ;;  %v1113_v51 = vsub.f32 1.0, %v985_v49  ;;  %v348_v48 = vfloor.f32 %v220_v53 }
 0x1ac   :  { %v2773_v26 = vmul.f32 %v2645_v34, %v4361_v30  ;;  %v986_v12 = vmul.f32 4.0, %v858_v1  ;;  %v731_v29 = vfloor.f32 %v603_v0  ;;  %v1496_v61 = vmul.f32 -0.03274596, %v4442_v41 }
 0x1ad   :  { %v2390_v56 = vadd.f32 -22.959543, %v2262_v13  ;;  %v2007_v3 = vmul.f32 %v1879_v4, %v4417_v37  ;;  %v4447_v7 = vmul.f32 %v1113_v51, %v473_v22  ;;  %v475_v30 = vsub.f32 %v91_v2, %v347_v24  ;;  %v4497_v13 = vld [vmem:[%s5297_s0 + $0x2b8] sm:$0xff] }
 0x1ae   :  { %2901 = vst [vmem:[%s5298_s1 + $0x268] sm:$0xff] %v2773_v26  ;;  %v1114_v35 = vsub.f32 1.0, %v986_v12  ;;  %v859_v10 = vsub.f32 %v603_v0, %v731_v29  ;;  %v604_v59 = vmul.f32 0.5, %v348_v48  ;;  %v1624_v21 = vadd.f32 0.36496454, %v1496_v61 }
 0x1af   :  { %v2518_v39 = vmul.f32 %v2390_v56, %v4394_v58  ;;  %v2135_v43 = vadd.f32 11.33008, %v2007_v3  ;;  %v4458_v46 = vmul.f32 %v4447_v7, %v4447_v7  ;;  %v221_v52 = vadd.f32 0.5, %v93_v57 }
 0x1b0   :  { %v4460_v63 = vmul.f32 %v1114_v35, %v474_v50  ;;  %v987_v15 = vmul.f32 4.0, %v859_v10  ;;  %v732_v42 = vfloor.f32 %v604_v59  ;;  %v1752_v2 = vmul.f32 %v1624_v21, %v4442_v41 }
 0x1b1   :  { %v2646_v45 = vadd.f32 13.957728, %v2518_v39  ;;  %v2263_v62 = vmul.f32 %v2135_v43, %v4417_v37  ;;  %v1497_v18 = vmul.f32 -0.03274596, %v4458_v46  ;;  %v349_v38 = vfloor.f32 %v221_v52 }
 0x1b2   :  { %v4467_v58 = vmul.f32 %v4460_v63, %v4460_v63  ;;  %v1115_v11 = vsub.f32 1.0, %v987_v15  ;;  %v860_v54 = vsub.f32 %v604_v59, %v732_v42  ;;  %v1880_v16 = vadd.f32 -2.6624622, %v1752_v2 }
 0x1b3   :  { %v2774_v28 = vmul.f32 %v2646_v45, %v4386_v23  ;;  %v2391_v6 = vadd.f32 -22.959543, %v2263_v62  ;;  %v1625_v14 = vadd.f32 0.36496454, %v1497_v18  ;;  %v476_v36 = vsub.f32 %v4427_v9, %v348_v48 }
 0x1b4   :  { %v1498_v8 = vmul.f32 -0.03274596, %v4467_v58  ;;  %v4474_v33 = vmul.f32 %v1115_v11, %v475_v30  ;;  %v988_v44 = vmul.f32 4.0, %v860_v54  ;;  %v2008_v55 = vmul.f32 %v1880_v16, %v4442_v41 }
 0x1b5   :  { %2902 = vst [vmem:[%s5298_s1 + $0x270] sm:$0xff] %v2774_v28  ;;  %v2519_v22 = vmul.f32 %v2391_v6, %v4417_v37  ;;  %v1753_v23 = vmul.f32 %v1625_v14, %v4458_v46  ;;  %v605_v27 = vmul.f32 0.5, %v349_v38  ;;  %v222_v32 = vadd.f32 0.5, %v94_v17  ;;  %v96_v14 = vld [vmem:[%s5297_s0 + $0x2c0] sm:$0xff] }
 0x1b6   :  { %v1626_v19 = vadd.f32 0.36496454, %v1498_v8  ;;  %v4485_v40 = vmul.f32 %v4474_v33, %v4474_v33  ;;  %v1116_v31 = vsub.f32 1.0, %v988_v44  ;;  %v2136_v60 = vadd.f32 11.33008, %v2008_v55 }
 0x1b7   :  { %v2647_v9 = vadd.f32 13.957728, %v2519_v22  ;;  %v1881_v24 = vadd.f32 -2.6624622, %v1753_v23  ;;  %v733_v53 = vfloor.f32 %v605_v27  ;;  %v350_v49 = vfloor.f32 %v222_v32 }
 0x1b8   :  { %v1754_v25 = vmul.f32 %v1626_v19, %v4467_v58  ;;  %v1499_v37 = vmul.f32 -0.03274596, %v4485_v40  ;;  %v4489_v47 = vmul.f32 %v1116_v31, %v476_v36  ;;  %v2264_v50 = vmul.f32 %v2136_v60, %v4442_v41  ;;  %v97_v31 = vld [vmem:[%s5297_s0 + $0x2c8] sm:$0xff] }
 0x1b9   :  { %v2775_v34 = vmul.f32 %v2647_v9, %v4407_v20  ;;  %v2009_v1 = vmul.f32 %v1881_v24, %v4458_v46  ;;  %v861_v0 = vsub.f32 %v605_v27, %v733_v53  ;;  %v477_v12 = vsub.f32 %v93_v57, %v349_v38 }
 0x1ba   :  { %v1882_v4 = vadd.f32 -2.6624622, %v1754_v25  ;;  %v1627_v51 = vadd.f32 0.36496454, %v1499_v37  ;;  %v4501_v26 = vmul.f32 %v4489_v47, %v4489_v47  ;;  %v2392_v20 = vadd.f32 -22.959543, %v2264_v50 }
 0x1bb   :  { %2903 = vst [vmem:[%s5298_s1 + $0x278] sm:$0xff] %v2775_v34  ;;  %v2137_v29 = vadd.f32 11.33008, %v2009_v1  ;;  %v989_v48 = vmul.f32 4.0, %v861_v0  ;;  %v606_v56 = vmul.f32 0.5, %v350_v49  ;;  %v223_v30 = vadd.f32 0.5, %v4497_v13 }
 0x1bc   :  { %v2010_v3 = vmul.f32 %v1882_v4, %v4467_v58  ;;  %v1755_v61 = vmul.f32 %v1627_v51, %v4485_v40  ;;  %v1500_v35 = vmul.f32 -0.03274596, %v4501_v26  ;;  %v2520_v10 = vmul.f32 %v2392_v20, %v4442_v41  ;;  %v98_v1 = vld [vmem:[%s5297_s0 + $0x2d0] sm:$0xff] }
 0x1bd   :  { %v2265_v57 = vmul.f32 %v2137_v29, %v4458_v46  ;;  %v1117_v59 = vsub.f32 1.0, %v989_v48  ;;  %v734_v39 = vfloor.f32 %v606_v56  ;;  %v351_v42 = vfloor.f32 %v223_v30 }
 0x1be   :  { %v2138_v43 = vadd.f32 11.33008, %v2010_v3  ;;  %v1883_v21 = vadd.f32 -2.6624622, %v1755_v61  ;;  %v1628_v15 = vadd.f32 0.36496454, %v1500_v35  ;;  %v478_v41 = vsub.f32 %v94_v17, %v350_v49 }
 0x1bf   :  { %v2648_v52 = vadd.f32 13.957728, %v2520_v10  ;;  %v2393_v45 = vadd.f32 -22.959543, %v2265_v57  ;;  %v4512_v62 = vmul.f32 %v1117_v59, %v477_v12  ;;  %v862_v2 = vsub.f32 %v606_v56, %v734_v39 }
 0x1c0   :  { %v2266_v18 = vmul.f32 %v2138_v43, %v4467_v58  ;;  %v2011_v11 = vmul.f32 %v1883_v21, %v4485_v40  ;;  %v1756_v54 = vmul.f32 %v1628_v15, %v4501_v26  ;;  %v607_v22 = vmul.f32 0.5, %v351_v42 }
 0x1c1   :  { %v2776_v38 = vmul.f32 %v2648_v52, %v4437_v5  ;;  %v2521_v28 = vmul.f32 %v2393_v45, %v4458_v46  ;;  %v4521_v6 = vmul.f32 %v4512_v62, %v4512_v62  ;;  %v990_v16 = vmul.f32 4.0, %v862_v2 }
 0x1c2   :  { %v2394_v8 = vadd.f32 -22.959543, %v2266_v18  ;;  %v2139_v36 = vadd.f32 11.33008, %v2011_v11  ;;  %v1884_v44 = vadd.f32 -2.6624622, %v1756_v54  ;;  %v735_v24 = vfloor.f32 %v607_v22 }
 0x1c3   :  { %2904 = vst [vmem:[%s5298_s1 + $0x280] sm:$0xff] %v2776_v38  ;;  %v2649_v17 = vadd.f32 13.957728, %v2521_v28  ;;  %v1501_v5 = vmul.f32 -0.03274596, %v4521_v6  ;;  %v1118_v46 = vsub.f32 1.0, %v990_v16  ;;  %v479_v12 = vsub.f32 %v4497_v13, %v351_v42 }
 0x1c4   :  { %v2522_v55 = vmul.f32 %v2394_v8, %v4467_v58  ;;  %v2267_v23 = vmul.f32 %v2139_v36, %v4485_v40  ;;  %v2012_v27 = vmul.f32 %v1884_v44, %v4501_v26  ;;  %v224_v19 = vadd.f32 0.5, %v96_v14  ;;  %v99_v13 = vld [vmem:[%s5297_s0 + $0x2d8] sm:$0xff]  ;;  %v4578_v28 = vld [vmem:[%s5297_s0 + $0x2e0] sm:$0xff] }
 0x1c5   :  { %v2777_v32 = vmul.f32 %v2649_v17, %v4447_v7  ;;  %v1629_v9 = vadd.f32 0.36496454, %v1501_v5  ;;  %v4537_v60 = vmul.f32 %v1118_v46, %v478_v41  ;;  %v863_v50 = vsub.f32 %v607_v22, %v735_v24 }
 0x1c6   :  { %v2650_v53 = vadd.f32 13.957728, %v2522_v55  ;;  %v2395_v25 = vadd.f32 -22.959543, %v2267_v23  ;;  %v2140_v37 = vadd.f32 11.33008, %v2012_v27  ;;  %v352_v49 = vfloor.f32 %v224_v19 }
 0x1c7   :  { %2905 = vst [vmem:[%s5298_s1 + $0x288] sm:$0xff] %v2777_v32  ;;  %v1757_v58 = vmul.f32 %v1629_v9, %v4521_v6  ;;  %v4545_v34 = vmul.f32 %v4537_v60, %v4537_v60  ;;  %v225_v7 = vadd.f32 0.5, %v97_v31  ;;  %v991_v48 = vmul.f32 4.0, %v863_v50 }
 0x1c8   :  { %v2778_v0 = vmul.f32 %v2650_v53, %v4460_v63  ;;  %v2523_v4 = vmul.f32 %v2395_v25, %v4485_v40  ;;  %v2268_v51 = vmul.f32 %v2140_v37, %v4501_v26  ;;  %v608_v56 = vmul.f32 0.5, %v352_v49 }
 0x1c9   :  { %v1885_v20 = vadd.f32 -2.6624622, %v1757_v58  ;;  %v1502_v29 = vmul.f32 -0.03274596, %v4545_v34  ;;  %v353_v35 = vfloor.f32 %v225_v7  ;;  %v226_v30 = vadd.f32 0.5, %v98_v1 }
 0x1ca   :  { %2906 = vst [vmem:[%s5298_s1 + $0x290] sm:$0xff] %v2778_v0  ;;  %v2651_v3 = vadd.f32 13.957728, %v2523_v4  ;;  %v2396_v61 = vadd.f32 -22.959543, %v2268_v51  ;;  %v1119_v10 = vsub.f32 1.0, %v991_v48  ;;  %v736_v57 = vfloor.f32 %v608_v56 }
 0x1cb   :  { %v2013_v63 = vmul.f32 %v1885_v20, %v4521_v6  ;;  %v1630_v40 = vadd.f32 0.36496454, %v1502_v29  ;;  %v480_v43 = vsub.f32 %v96_v14, %v352_v49  ;;  %v609_v21 = vmul.f32 0.5, %v353_v35 }
 0x1cc   :  { %v2779_v59 = vmul.f32 %v2651_v3, %v4474_v33  ;;  %v2524_v39 = vmul.f32 %v2396_v61, %v4501_v26  ;;  %v4565_v52 = vmul.f32 %v1119_v10, %v479_v12  ;;  %v864_v45 = vsub.f32 %v608_v56, %v736_v57 }
 0x1cd   :  { %v2141_v15 = vadd.f32 11.33008, %v2013_v63  ;;  %v1758_v42 = vmul.f32 %v1630_v40, %v4545_v34  ;;  %v737_v18 = vfloor.f32 %v609_v21  ;;  %v354_v11 = vfloor.f32 %v226_v30 }
 0x1ce   :  { %2907 = vst [vmem:[%s5298_s1 + $0x298] sm:$0xff] %v2779_v59  ;;  %v2652_v2 = vadd.f32 13.957728, %v2524_v39  ;;  %v227_v54 = vadd.f32 0.5, %v99_v13  ;;  %v4573_v26 = vmul.f32 %v4565_v52, %v4565_v52  ;;  %v992_v38 = vmul.f32 4.0, %v864_v45 }
 0x1cf   :  { %v2269_v33 = vmul.f32 %v2141_v15, %v4521_v6  ;;  %v1886_v41 = vadd.f32 -2.6624622, %v1758_v42  ;;  %v481_v14 = vsub.f32 %v97_v31, %v353_v35  ;;  %v865_v8 = vsub.f32 %v609_v21, %v737_v18 }
 0x1d0   :  { %v2780_v16 = vmul.f32 %v2652_v2, %v4489_v47  ;;  %v610_v36 = vmul.f32 0.5, %v354_v11  ;;  %v1503_v5 = vmul.f32 -0.03274596, %v4573_v26  ;;  %v1120_v46 = vsub.f32 1.0, %v992_v38 }
 0x1d1   :  { %v2397_v44 = vadd.f32 -22.959543, %v2269_v33  ;;  %v2014_v17 = vmul.f32 %v1886_v41, %v4545_v34  ;;  %v993_v22 = vmul.f32 4.0, %v865_v8  ;;  %v355_v23 = vfloor.f32 %v227_v54  ;;  %v4625_v33 = vld [vmem:[%s5297_s0 + $0x2f0] sm:$0xff] }
 0x1d2   :  { %2908 = vst [vmem:[%s5298_s1 + $0x2a0] sm:$0xff] %v2780_v16  ;;  %v738_v55 = vfloor.f32 %v610_v36  ;;  %v228_v27 = vadd.f32 0.5, %v4578_v28  ;;  %v1631_v31 = vadd.f32 0.36496454, %v1503_v5  ;;  %v4588_v32 = vmul.f32 %v1120_v46, %v480_v43 }
 0x1d3   :  { %v2525_v47 = vmul.f32 %v2397_v44, %v4521_v6  ;;  %v2142_v19 = vadd.f32 11.33008, %v2014_v17  ;;  %v1121_v9 = vsub.f32 1.0, %v993_v22  ;;  %v482_v24 = vsub.f32 %v98_v1, %v354_v11  ;;  %v101_v1 = vld [vmem:[%s5297_s0 + $0x2e8] sm:$0xff] }
 0x1d4   :  { %v866_v53 = vsub.f32 %v610_v36, %v738_v55  ;;  %v611_v25 = vmul.f32 0.5, %v355_v23  ;;  %v1759_v58 = vmul.f32 %v1631_v31, %v4573_v26  ;;  %v4594_v50 = vmul.f32 %v4588_v32, %v4588_v32 }
 0x1d5   :  { %v2653_v37 = vadd.f32 13.957728, %v2525_v47  ;;  %v2270_v49 = vmul.f32 %v2142_v19, %v4545_v34  ;;  %v4596_v7 = vmul.f32 %v1121_v9, %v481_v14  ;;  %v356_v4 = vfloor.f32 %v228_v27 }
 0x1d6   :  { %v994_v6 = vmul.f32 4.0, %v866_v53  ;;  %v739_v0 = vfloor.f32 %v611_v25  ;;  %v1887_v20 = vadd.f32 -2.6624622, %v1759_v58  ;;  %v1504_v29 = vmul.f32 -0.03274596, %v4594_v50 }
 0x1d7   :  { %v2781_v51 = vmul.f32 %v2653_v37, %v4512_v62  ;;  %v2398_v12 = vadd.f32 -22.959543, %v2270_v49  ;;  %v4605_v48 = vmul.f32 %v4596_v7, %v4596_v7  ;;  %v483_v3 = vsub.f32 %v99_v13, %v355_v23 }
 0x1d8   :  { %v1122_v56 = vsub.f32 1.0, %v994_v6  ;;  %v867_v61 = vsub.f32 %v611_v25, %v739_v0  ;;  %v2015_v30 = vmul.f32 %v1887_v20, %v4573_v26  ;;  %v1632_v62 = vadd.f32 0.36496454, %v1504_v29 }
 0x1d9   :  { %2909 = vst [vmem:[%s5298_s1 + $0x2a8] sm:$0xff] %v2781_v51  ;;  %v2526_v35 = vmul.f32 %v2398_v12, %v4545_v34  ;;  %v612_v63 = vmul.f32 0.5, %v356_v4  ;;  %v1505_v40 = vmul.f32 -0.03274596, %v4605_v48  ;;  %v229_v59 = vadd.f32 0.5, %v101_v1 }
 0x1da   :  { %v4613_v10 = vmul.f32 %v1122_v56, %v482_v24  ;;  %v995_v57 = vmul.f32 4.0, %v867_v61  ;;  %v2143_v43 = vadd.f32 11.33008, %v2015_v30  ;;  %v1760_v13 = vmul.f32 %v1632_v62, %v4594_v50 }
 0x1db   :  { %v2654_v39 = vadd.f32 13.957728, %v2526_v35  ;;  %v740_v21 = vfloor.f32 %v612_v63  ;;  %v1633_v15 = vadd.f32 0.36496454, %v1505_v40  ;;  %v357_v45 = vfloor.f32 %v229_v59 }
 0x1dc   :  { %v4618_v42 = vmul.f32 %v4613_v10, %v4613_v10  ;;  %v1123_v34 = vsub.f32 1.0, %v995_v57  ;;  %v2271_v18 = vmul.f32 %v2143_v43, %v4573_v26  ;;  %v1888_v11 = vadd.f32 -2.6624622, %v1760_v13 }
 0x1dd   :  { %v2782_v2 = vmul.f32 %v2654_v39, %v4537_v60  ;;  %v868_v54 = vsub.f32 %v612_v63, %v740_v21  ;;  %v1761_v41 = vmul.f32 %v1633_v15, %v4605_v48  ;;  %v484_v14 = vsub.f32 %v4578_v28, %v356_v4 }
 0x1de   :  { %v1506_v38 = vmul.f32 -0.03274596, %v4618_v42  ;;  %v4629_v16 = vmul.f32 %v1123_v34, %v483_v3  ;;  %v2399_v60 = vadd.f32 -22.959543, %v2271_v18  ;;  %v2016_v8 = vmul.f32 %v1888_v11, %v4594_v50  ;;  %v104_v11 = vld [vmem:[%s5297_s0 + $0x300] sm:$0xff] }
 0x1df   :  { %2910 = vst [vmem:[%s5298_s1 + $0x2b0] sm:$0xff] %v2782_v2  ;;  %v996_v36 = vmul.f32 4.0, %v868_v54  ;;  %v613_v44 = vmul.f32 0.5, %v357_v45  ;;  %v1889_v17 = vadd.f32 -2.6624622, %v1761_v41  ;;  %v230_v22 = vadd.f32 0.5, %v4625_v33 }
 0x1e0   :  { %v1634_v5 = vadd.f32 0.36496454, %v1506_v38  ;;  %v4638_v46 = vmul.f32 %v4629_v16, %v4629_v16  ;;  %v2527_v55 = vmul.f32 %v2399_v60, %v4573_v26  ;;  %v2144_v28 = vadd.f32 11.33008, %v2016_v8  ;;  %v4651_v26 = vld [vmem:[%s5297_s0 + $0x2f8] sm:$0xff] }
 0x1e1   :  { %v1124_v23 = vsub.f32 1.0, %v996_v36  ;;  %v741_v27 = vfloor.f32 %v613_v44  ;;  %v2017_v47 = vmul.f32 %v1889_v17, %v4605_v48  ;;  %v358_v9 = vfloor.f32 %v230_v22 }
 0x1e2   :  { %v1762_v19 = vmul.f32 %v1634_v5, %v4618_v42  ;;  %v1507_v31 = vmul.f32 -0.03274596, %v4638_v46  ;;  %v2655_v24 = vadd.f32 13.957728, %v2527_v55  ;;  %v2272_v53 = vmul.f32 %v2144_v28, %v4594_v50 }
 0x1e3   :  { %v4646_v25 = vmul.f32 %v1124_v23, %v484_v14  ;;  %v869_v37 = vsub.f32 %v613_v44, %v741_v27  ;;  %v2145_v49 = vadd.f32 11.33008, %v2017_v47  ;;  %v485_v0 = vsub.f32 %v101_v1, %v357_v45 }
 0x1e4   :  { %v1890_v58 = vadd.f32 -2.6624622, %v1762_v19  ;;  %v1635_v6 = vadd.f32 0.36496454, %v1507_v31  ;;  %v2783_v4 = vmul.f32 %v2655_v24, %v4565_v52  ;;  %v2400_v51 = vadd.f32 -22.959543, %v2272_v53 }
 0x1e5   :  { %v4656_v12 = vmul.f32 %v4646_v25, %v4646_v25  ;;  %v997_v20 = vmul.f32 4.0, %v869_v37  ;;  %v2273_v29 = vmul.f32 %v2145_v49, %v4605_v48  ;;  %v614_v61 = vmul.f32 0.5, %v358_v9  ;;  %v106_v53 = vld [vmem:[%s5297_s0 + $0x310] sm:$0xff] }
 0x1e6   :  { %v2018_v56 = vmul.f32 %v1890_v58, %v4618_v42  ;;  %v1763_v3 = vmul.f32 %v1635_v6, %v4638_v46  ;;  %2911 = vst [vmem:[%s5298_s1 + $0x2b8] sm:$0xff] %v2783_v4  ;;  %v2528_v1 = vmul.f32 %v2400_v51, %v4594_v50  ;;  %v231_v30 = vadd.f32 0.5, %v4651_v26 }
 0x1e7   :  { %v1508_v52 = vmul.f32 -0.03274596, %v4656_v12  ;;  %v1125_v35 = vsub.f32 1.0, %v997_v20  ;;  %v2401_v62 = vadd.f32 -22.959543, %v2273_v29  ;;  %v742_v57 = vfloor.f32 %v614_v61 }
 0x1e8   :  { %v2146_v63 = vadd.f32 11.33008, %v2018_v56  ;;  %v1891_v40 = vadd.f32 -2.6624622, %v1763_v3  ;;  %v2656_v59 = vadd.f32 13.957728, %v2528_v1  ;;  %v359_v13 = vfloor.f32 %v231_v30 }
 0x1e9   :  { %v1636_v39 = vadd.f32 0.36496454, %v1508_v52  ;;  %v4667_v43 = vmul.f32 %v1125_v35, %v485_v0  ;;  %v2529_v21 = vmul.f32 %v2401_v62, %v4605_v48  ;;  %v870_v34 = vsub.f32 %v614_v61, %v742_v57  ;;  %v4684_v48 = vld [vmem:[%s5297_s0 + $0x308] sm:$0xff]  ;;  %v107_v52 = vld [vmem:[%s5297_s0 + $0x318] sm:$0xff] }
 0x1ea   :  { %v2274_v15 = vmul.f32 %v2146_v63, %v4618_v42  ;;  %v2019_v50 = vmul.f32 %v1891_v40, %v4638_v46  ;;  %v2784_v45 = vmul.f32 %v2656_v59, %v4588_v32  ;;  %v486_v32 = vsub.f32 %v4625_v33, %v358_v9 }
 0x1eb   :  { %v1764_v2 = vmul.f32 %v1636_v39, %v4656_v12  ;;  %v4676_v18 = vmul.f32 %v4667_v43, %v4667_v43  ;;  %v2657_v54 = vadd.f32 13.957728, %v2529_v21  ;;  %v998_v8 = vmul.f32 4.0, %v870_v34 }
 0x1ec   :  { %v2402_v41 = vadd.f32 -22.959543, %v2274_v15  ;;  %v2147_v38 = vadd.f32 11.33008, %v2019_v50  ;;  %2912 = vst [vmem:[%s5298_s1 + $0x2c0] sm:$0xff] %v2784_v45  ;;  %v615_v36 = vmul.f32 0.5, %v359_v13  ;;  %v487_v58 = vsub.f32 %v4651_v26, %v359_v13 }
 0x1ed   :  { %v1892_v14 = vadd.f32 -2.6624622, %v1764_v2  ;;  %v1509_v60 = vmul.f32 -0.03274596, %v4676_v18  ;;  %v2785_v44 = vmul.f32 %v2657_v54, %v4596_v7  ;;  %v232_v22 = vadd.f32 0.5, %v104_v11 }
 0x1ee   :  { %v2530_v17 = vmul.f32 %v2402_v41, %v4618_v42  ;;  %v2275_v5 = vmul.f32 %v2147_v38, %v4638_v46  ;;  %v1126_v33 = vsub.f32 1.0, %v998_v8  ;;  %v743_v23 = vfloor.f32 %v615_v36  ;;  %v108_v38 = vld [vmem:[%s5297_s0 + $0x320] sm:$0xff] }
 0x1ef   :  { %v2020_v55 = vmul.f32 %v1892_v14, %v4656_v12  ;;  %v1637_v28 = vadd.f32 0.36496454, %v1509_v60  ;;  %2913 = vst [vmem:[%s5298_s1 + $0x2c8] sm:$0xff] %v2785_v44  ;;  %v360_v19 = vfloor.f32 %v232_v22  ;;  %v233_v31 = vadd.f32 0.5, %v4684_v48 }
 0x1f0   :  { %v2658_v27 = vadd.f32 13.957728, %v2530_v17  ;;  %v2403_v47 = vadd.f32 -22.959543, %v2275_v5  ;;  %v4700_v9 = vmul.f32 %v1126_v33, %v486_v32  ;;  %v871_v24 = vsub.f32 %v615_v36, %v743_v23 }
 0x1f1   :  { %v2148_v7 = vadd.f32 11.33008, %v2020_v55  ;;  %v1765_v42 = vmul.f32 %v1637_v28, %v4676_v18  ;;  %v616_v6 = vmul.f32 0.5, %v360_v19  ;;  %v234_v3 = vadd.f32 0.5, %v106_v53 }
 0x1f2   :  { %v2786_v37 = vmul.f32 %v2658_v27, %v4613_v10  ;;  %v2531_v49 = vmul.f32 %v2403_v47, %v4638_v46  ;;  %v4711_v51 = vmul.f32 %v4700_v9, %v4700_v9  ;;  %v999_v20 = vmul.f32 4.0, %v871_v24 }
 0x1f3   :  { %v2276_v0 = vmul.f32 %v2148_v7, %v4656_v12  ;;  %v1893_v4 = vadd.f32 -2.6624622, %v1765_v42  ;;  %v744_v56 = vfloor.f32 %v616_v6  ;;  %v361_v10 = vfloor.f32 %v233_v31 }
 0x1f4   :  { %2914 = vst [vmem:[%s5298_s1 + $0x2d0] sm:$0xff] %v2786_v37  ;;  %v2659_v29 = vadd.f32 13.957728, %v2531_v49  ;;  %v1510_v61 = vmul.f32 -0.03274596, %v4711_v51  ;;  %v1127_v1 = vsub.f32 1.0, %v999_v20  ;;  %v488_v30 = vsub.f32 %v104_v11, %v360_v19 }
 0x1f5   :  { %v2404_v46 = vadd.f32 -22.959543, %v2276_v0  ;;  %v2021_v26 = vmul.f32 %v1893_v4, %v4676_v18  ;;  %v872_v62 = vsub.f32 %v616_v6, %v744_v56  ;;  %v617_v63 = vmul.f32 0.5, %v361_v10 }
 0x1f6   :  { %v2787_v35 = vmul.f32 %v2659_v29, %v4629_v16  ;;  %v1638_v59 = vadd.f32 0.36496454, %v1510_v61  ;;  %v4723_v39 = vmul.f32 %v1127_v1, %v487_v58  ;;  %v362_v15 = vfloor.f32 %v234_v3 }
 0x1f7   :  { %v2532_v40 = vmul.f32 %v2404_v46, %v4656_v12  ;;  %v2149_v57 = vadd.f32 11.33008, %v2021_v26  ;;  %v1000_v13 = vmul.f32 4.0, %v872_v62  ;;  %v745_v21 = vfloor.f32 %v617_v63 }
 0x1f8   :  { %2915 = vst [vmem:[%s5298_s1 + $0x2d8] sm:$0xff] %v2787_v35  ;;  %v235_v50 = vadd.f32 0.5, %v107_v52  ;;  %v1766_v45 = vmul.f32 %v1638_v59, %v4711_v51  ;;  %v4732_v12 = vmul.f32 %v4723_v39, %v4723_v39  ;;  %v489_v11 = vsub.f32 %v4684_v48, %v361_v10 }
 0x1f9   :  { %v2660_v34 = vadd.f32 13.957728, %v2532_v40  ;;  %v2277_v16 = vmul.f32 %v2149_v57, %v4676_v18  ;;  %v1128_v2 = vsub.f32 1.0, %v1000_v13  ;;  %v873_v54 = vsub.f32 %v617_v63, %v745_v21 }
 0x1fa   :  { %v618_v41 = vmul.f32 0.5, %v362_v15  ;;  %v1894_v60 = vadd.f32 -2.6624622, %v1766_v45  ;;  %v1511_v8 = vmul.f32 -0.03274596, %v4732_v12  ;;  %v363_v5 = vfloor.f32 %v235_v50 }
 0x1fb   :  { %v2788_v32 = vmul.f32 %v2660_v34, %v4646_v25  ;;  %v2405_v14 = vadd.f32 -22.959543, %v2277_v16  ;;  %v4740_v36 = vmul.f32 %v1128_v2, %v488_v30  ;;  %v1001_v44 = vmul.f32 4.0, %v873_v54 }
 0x1fc   :  { %v746_v17 = vfloor.f32 %v618_v41  ;;  %v2022_v22 = vmul.f32 %v1894_v60, %v4711_v51  ;;  %v1639_v55 = vadd.f32 0.36496454, %v1511_v8  ;;  %v236_v28 = vadd.f32 0.5, %v108_v38 }
 0x1fd   :  { %2916 = vst [vmem:[%s5298_s1 + $0x2e0] sm:$0xff] %v2788_v32  ;;  %v2533_v48 = vmul.f32 %v2405_v14, %v4676_v18  ;;  %v4749_v25 = vmul.f32 %v4740_v36, %v4740_v36  ;;  %v1129_v33 = vsub.f32 1.0, %v1001_v44  ;;  %v490_v23 = vsub.f32 %v106_v53, %v362_v15  ;;  %v109_v53 = vld [vmem:[%s5297_s0 + $0x328] sm:$0xff]  ;;  %v110_v14 = vld [vmem:[%s5297_s0 + $0x330] sm:$0xff] }
 0x1fe   :  { %v874_v27 = vsub.f32 %v618_v41, %v746_v17  ;;  %v2150_v19 = vadd.f32 11.33008, %v2022_v22  ;;  %v1767_v31 = vmul.f32 %v1639_v55, %v4732_v12  ;;  %v619_v7 = vmul.f32 0.5, %v363_v5 }
 0x1ff   :  { %v2661_v47 = vadd.f32 13.957728, %v2533_v48  ;;  %v1512_v42 = vmul.f32 -0.03274596, %v4749_v25  ;;  %v4753_v24 = vmul.f32 %v1129_v33, %v489_v11  ;;  %v364_v37 = vfloor.f32 %v236_v28 }
 0x200   :  { %v1002_v18 = vmul.f32 4.0, %v874_v27  ;;  %v2278_v58 = vmul.f32 %v2150_v19, %v4711_v51  ;;  %v1895_v6 = vadd.f32 -2.6624622, %v1767_v31  ;;  %v747_v0 = vfloor.f32 %v619_v7 }
 0x201   :  { %v2789_v49 = vmul.f32 %v2661_v47, %v4667_v43  ;;  %v1640_v4 = vadd.f32 0.36496454, %v1512_v42  ;;  %v4762_v20 = vmul.f32 %v4753_v24, %v4753_v24  ;;  %v491_v56 = vsub.f32 %v107_v52, %v363_v5 }
 0x202   :  { %v1130_v29 = vsub.f32 1.0, %v1002_v18  ;;  %v2406_v43 = vadd.f32 -22.959543, %v2278_v58  ;;  %v2023_v10 = vmul.f32 %v1895_v6, %v4732_v12  ;;  %v875_v3 = vsub.f32 %v619_v7, %v747_v0 }
 0x203   :  { %2917 = vst [vmem:[%s5298_s1 + $0x2e8] sm:$0xff] %v2789_v49  ;;  %v620_v46 = vmul.f32 0.5, %v364_v37  ;;  %v1768_v26 = vmul.f32 %v1640_v4, %v4749_v25  ;;  %v1513_v61 = vmul.f32 -0.03274596, %v4762_v20  ;;  %v237_v35 = vadd.f32 0.5, %v109_v53 }
 0x204   :  { %v4770_v1 = vmul.f32 %v1130_v29, %v490_v23  ;;  %v2534_v30 = vmul.f32 %v2406_v43, %v4711_v51  ;;  %v2151_v62 = vadd.f32 11.33008, %v2023_v10  ;;  %v1003_v52 = vmul.f32 4.0, %v875_v3  ;;  %v111_v10 = vld [vmem:[%s5297_s0 + $0x338] sm:$0xff] }
 0x205   :  { %v748_v63 = vfloor.f32 %v620_v46  ;;  %v1896_v40 = vadd.f32 -2.6624622, %v1768_v26  ;;  %v1641_v57 = vadd.f32 0.36496454, %v1513_v61  ;;  %v365_v13 = vfloor.f32 %v237_v35 }
 0x206   :  { %v4775_v59 = vmul.f32 %v4770_v1, %v4770_v1  ;;  %v2662_v21 = vadd.f32 13.957728, %v2534_v30  ;;  %v2279_v15 = vmul.f32 %v2151_v62, %v4732_v12  ;;  %v1131_v50 = vsub.f32 1.0, %v1003_v52  ;;  %v112_v62 = vld [vmem:[%s5297_s0 + $0x340] sm:$0xff] }
 0x207   :  { %v876_v34 = vsub.f32 %v620_v46, %v748_v63  ;;  %v2024_v16 = vmul.f32 %v1896_v40, %v4749_v25  ;;  %v1769_v45 = vmul.f32 %v1641_v57, %v4762_v20  ;;  %v492_v2 = vsub.f32 %v108_v38, %v364_v37 }
 0x208   :  { %v1514_v51 = vmul.f32 -0.03274596, %v4775_v59  ;;  %v2790_v11 = vmul.f32 %v2662_v21, %v4700_v9  ;;  %v2407_v54 = vadd.f32 -22.959543, %v2279_v15  ;;  %v4782_v41 = vmul.f32 %v1131_v50, %v491_v56 }
 0x209   :  { %v1004_v32 = vmul.f32 4.0, %v876_v34  ;;  %v2152_v60 = vadd.f32 11.33008, %v2024_v16  ;;  %v1897_v8 = vadd.f32 -2.6624622, %v1769_v45  ;;  %v621_v5 = vmul.f32 0.5, %v365_v13 }
 0x20a   :  { %v1642_v44 = vadd.f32 0.36496454, %v1514_v51  ;;  %2918 = vst [vmem:[%s5298_s1 + $0x2f0] sm:$0xff] %v2790_v11  ;;  %v2535_v17 = vmul.f32 %v2407_v54, %v4732_v12  ;;  %v4793_v9 = vmul.f32 %v4782_v41, %v4782_v41  ;;  %v238_v28 = vadd.f32 0.5, %v110_v14  ;;  %v113_v54 = vld [vmem:[%s5297_s0 + $0x348] sm:$0xff] }
 0x20b   :  { %v1132_v38 = vsub.f32 1.0, %v1004_v32  ;;  %v2280_v48 = vmul.f32 %v2152_v60, %v4749_v25  ;;  %v2025_v22 = vmul.f32 %v1897_v8, %v4762_v20  ;;  %v749_v47 = vfloor.f32 %v621_v5 }
 0x20c   :  { %v1770_v55 = vmul.f32 %v1642_v44, %v4775_v59  ;;  %v2663_v33 = vadd.f32 13.957728, %v2535_v17  ;;  %v1515_v23 = vmul.f32 -0.03274596, %v4793_v9  ;;  %v366_v7 = vfloor.f32 %v238_v28 }
 0x20d   :  { %v4799_v27 = vmul.f32 %v1132_v38, %v492_v2  ;;  %v2408_v12 = vadd.f32 -22.959543, %v2280_v48  ;;  %v2153_v19 = vadd.f32 11.33008, %v2025_v22  ;;  %v877_v49 = vsub.f32 %v621_v5, %v749_v47 }
 0x20e   :  { %v1898_v31 = vadd.f32 -2.6624622, %v1770_v55  ;;  %v2791_v42 = vmul.f32 %v2663_v33, %v4723_v39  ;;  %v1643_v18 = vadd.f32 0.36496454, %v1515_v23  ;;  %v493_v4 = vsub.f32 %v109_v53, %v365_v13 }
 0x20f   :  { %v4804_v37 = vmul.f32 %v4799_v27, %v4799_v27  ;;  %v2536_v58 = vmul.f32 %v2408_v12, %v4749_v25  ;;  %v2281_v6 = vmul.f32 %v2153_v19, %v4762_v20  ;;  %v1005_v56 = vmul.f32 4.0, %v877_v49 }
 0x210   :  { %v2026_v0 = vmul.f32 %v1898_v31, %v4775_v59  ;;  %2919 = vst [vmem:[%s5298_s1 + $0x2f8] sm:$0xff] %v2791_v42  ;;  %v1771_v29 = vmul.f32 %v1643_v18, %v4793_v9  ;;  %v622_v43 = vmul.f32 0.5, %v366_v7  ;;  %v494_v26 = vsub.f32 %v110_v14, %v366_v7 }
 0x211   :  { %v1516_v39 = vmul.f32 -0.03274596, %v4804_v37  ;;  %v2664_v25 = vadd.f32 13.957728, %v2536_v58  ;;  %v2409_v3 = vadd.f32 -22.959543, %v2281_v6 }
 0x212   :  { %v2154_v46 = vadd.f32 11.33008, %v2026_v0  ;;  %v1899_v61 = vadd.f32 -2.6624622, %v1771_v29  ;;  %v1133_v35 = vsub.f32 1.0, %v1005_v56  ;;  %v750_v30 = vfloor.f32 %v622_v43 }
 0x213   :  { %v1644_v53 = vadd.f32 0.36496454, %v1516_v39  ;;  %v2792_v52 = vmul.f32 %v2664_v25, %v4740_v36  ;;  %v2537_v63 = vmul.f32 %v2409_v3, %v4762_v20  ;;  %v239_v57 = vadd.f32 0.5, %v111_v10  ;;  %v115_v25 = vld [vmem:[%s5297_s0 + $0x358] sm:$0xff] }
 0x214   :  { %v2282_v40 = vmul.f32 %v2154_v46, %v4775_v59  ;;  %v2027_v13 = vmul.f32 %v1899_v61, %v4793_v9  ;;  %v4825_v15 = vmul.f32 %v1133_v35, %v493_v4  ;;  %v878_v50 = vsub.f32 %v622_v43, %v750_v30 }
 0x215   :  { %v1772_v21 = vmul.f32 %v1644_v53, %v4804_v37  ;;  %2920 = vst [vmem:[%s5298_s1 + $0x300] sm:$0xff] %v2792_v52  ;;  %v2665_v34 = vadd.f32 13.957728, %v2537_v63  ;;  %v367_v45 = vfloor.f32 %v239_v57  ;;  %v240_v36 = vadd.f32 0.5, %v112_v62 }
 0x216   :  { %v2410_v16 = vadd.f32 -22.959543, %v2282_v40  ;;  %v2155_v51 = vadd.f32 11.33008, %v2027_v13  ;;  %v4832_v2 = vmul.f32 %v4825_v15, %v4825_v15  ;;  %v1006_v11 = vmul.f32 4.0, %v878_v50  ;;  %v4881_v50 = vld [vmem:[%s5297_s0 + $0x360] sm:$0xff] }
 0x217   :  { %v1900_v20 = vadd.f32 -2.6624622, %v1772_v21  ;;  %v2793_v32 = vmul.f32 %v2665_v34, %v4753_v24  ;;  %v623_v60 = vmul.f32 0.5, %v367_v45  ;;  %v368_v22 = vfloor.f32 %v240_v36  ;;  %v114_v24 = vld [vmem:[%s5297_s0 + $0x350] sm:$0xff] }
 0x218   :  { %v2538_v14 = vmul.f32 %v2410_v16, %v4775_v59  ;;  %v2283_v8 = vmul.f32 %v2155_v51, %v4793_v9  ;;  %v1517_v17 = vmul.f32 -0.03274596, %v4832_v2  ;;  %v1134_v38 = vsub.f32 1.0, %v1006_v11 }
 0x219   :  { %v2028_v44 = vmul.f32 %v1900_v20, %v4804_v37  ;;  %2921 = vst [vmem:[%s5298_s1 + $0x308] sm:$0xff] %v2793_v32  ;;  %v751_v48 = vfloor.f32 %v623_v60  ;;  %v241_v55 = vadd.f32 0.5, %v113_v54  ;;  %v495_v12 = vsub.f32 %v111_v10, %v367_v45 }
 0x21a   :  { %v2666_v5 = vadd.f32 13.957728, %v2538_v14  ;;  %v2411_v59 = vadd.f32 -22.959543, %v2283_v8  ;;  %v1645_v33 = vadd.f32 0.36496454, %v1517_v17  ;;  %v4848_v23 = vmul.f32 %v1134_v38, %v494_v26 }
 0x21b   :  { %v2156_v28 = vadd.f32 11.33008, %v2028_v44  ;;  %v879_v19 = vsub.f32 %v623_v60, %v751_v48  ;;  %v624_v31 = vmul.f32 0.5, %v368_v22  ;;  %v242_v0 = vadd.f32 0.5, %v114_v24 }
 0x21c   :  { %v2794_v47 = vmul.f32 %v2666_v5, %v4770_v1  ;;  %v2539_v7 = vmul.f32 %v2411_v59, %v4793_v9  ;;  %v1773_v18 = vmul.f32 %v1645_v33, %v4832_v2  ;;  %v4856_v49 = vmul.f32 %v4848_v23, %v4848_v23 }
 0x21d   :  { %v2284_v42 = vmul.f32 %v2156_v28, %v4804_v37  ;;  %v1007_v58 = vmul.f32 4.0, %v879_v19  ;;  %v752_v6 = vfloor.f32 %v624_v31  ;;  %v369_v1 = vfloor.f32 %v241_v55 }
 0x21e   :  { %2922 = vst [vmem:[%s5298_s1 + $0x310] sm:$0xff] %v2794_v47  ;;  %v2667_v4 = vadd.f32 13.957728, %v2539_v7  ;;  %v1901_v39 = vadd.f32 -2.6624622, %v1773_v18  ;;  %v496_v43 = vsub.f32 %v112_v62, %v368_v22  ;;  %v370_v52 = vfloor.f32 %v242_v0 }
 0x21f   :  { %v2412_v29 = vadd.f32 -22.959543, %v2284_v42  ;;  %v1518_v9 = vmul.f32 -0.03274596, %v4856_v49  ;;  %v1135_v56 = vsub.f32 1.0, %v1007_v58  ;;  %v880_v10 = vsub.f32 %v624_v31, %v752_v6 }
 0x220   :  { %v2795_v3 = vmul.f32 %v2667_v4, %v4782_v41  ;;  %v2029_v26 = vmul.f32 %v1901_v39, %v4832_v2  ;;  %v625_v61 = vmul.f32 0.5, %v369_v1  ;;  %v243_v57 = vadd.f32 0.5, %v115_v25 }
 0x221   :  { %v2540_v46 = vmul.f32 %v2412_v29, %v4804_v37  ;;  %v1646_v53 = vadd.f32 0.36496454, %v1518_v9  ;;  %v4868_v35 = vmul.f32 %v1135_v56, %v495_v12  ;;  %v1008_v30 = vmul.f32 4.0, %v880_v10 }
 0x222   :  { %2923 = vst [vmem:[%s5298_s1 + $0x318] sm:$0xff] %v2795_v3  ;;  %v2157_v63 = vadd.f32 11.33008, %v2029_v26  ;;  %v753_v40 = vfloor.f32 %v625_v61  ;;  %v497_v21 = vsub.f32 %v113_v54, %v369_v1  ;;  %v626_v36 = vmul.f32 0.5, %v370_v52 }
 0x223   :  { %v2668_v62 = vadd.f32 13.957728, %v2540_v46  ;;  %v1774_v41 = vmul.f32 %v1646_v53, %v4856_v49  ;;  %v4876_v37 = vmul.f32 %v4868_v35, %v4868_v35  ;;  %v1136_v13 = vsub.f32 1.0, %v1008_v30 }
 0x224   :  { %v2285_v16 = vmul.f32 %v2157_v63, %v4832_v2  ;;  %v881_v45 = vsub.f32 %v625_v61, %v753_v40  ;;  %v371_v32 = vfloor.f32 %v243_v57  ;;  %v754_v60 = vfloor.f32 %v626_v36 }
 0x225   :  { %v2796_v34 = vmul.f32 %v2668_v62, %v4799_v27  ;;  %v1902_v51 = vadd.f32 -2.6624622, %v1774_v41  ;;  %v1519_v20 = vmul.f32 -0.03274596, %v4876_v37  ;;  %v4886_v11 = vmul.f32 %v1136_v13, %v496_v43 }
 0x226   :  { %v2413_v54 = vadd.f32 -22.959543, %v2285_v16  ;;  %v1009_v14 = vmul.f32 4.0, %v881_v45  ;;  %v244_v8 = vadd.f32 0.5, %v4881_v50  ;;  %v498_v38 = vsub.f32 %v114_v24, %v370_v52  ;;  %v118_v16 = vld [vmem:[%s5297_s0 + $0x370] sm:$0xff] }
 0x227   :  { %2924 = vst [vmem:[%s5298_s1 + $0x320] sm:$0xff] %v2796_v34  ;;  %v2030_v27 = vmul.f32 %v1902_v51, %v4856_v49  ;;  %v1647_v44 = vadd.f32 0.36496454, %v1519_v20  ;;  %v4895_v17 = vmul.f32 %v4886_v11, %v4886_v11  ;;  %v882_v22 = vsub.f32 %v626_v36, %v754_v60 }
 0x228   :  { %v2541_v5 = vmul.f32 %v2413_v54, %v4832_v2  ;;  %v1137_v48 = vsub.f32 1.0, %v1009_v14  ;;  %v627_v55 = vmul.f32 0.5, %v371_v32  ;;  %v372_v47 = vfloor.f32 %v244_v8  ;;  %v117_v2 = vld [vmem:[%s5297_s0 + $0x368] sm:$0xff] }
 0x229   :  { %v2158_v59 = vadd.f32 11.33008, %v2030_v27  ;;  %v1775_v28 = vmul.f32 %v1647_v44, %v4876_v37  ;;  %v1520_v33 = vmul.f32 -0.03274596, %v4895_v17  ;;  %v1010_v31 = vmul.f32 4.0, %v882_v22 }
 0x22a   :  { %v2669_v12 = vadd.f32 13.957728, %v2541_v5  ;;  %v4900_v19 = vmul.f32 %v1137_v48, %v497_v21  ;;  %v755_v7 = vfloor.f32 %v627_v55  ;;  %v499_v58 = vsub.f32 %v115_v25, %v371_v32 }
 0x22b   :  { %v2286_v42 = vmul.f32 %v2158_v59, %v4856_v49  ;;  %v1903_v18 = vadd.f32 -2.6624622, %v1775_v28  ;;  %v1648_v24 = vadd.f32 0.36496454, %v1520_v33  ;;  %v1138_v0 = vsub.f32 1.0, %v1010_v31 }
 0x22c   :  { %v2797_v6 = vmul.f32 %v2669_v12, %v4825_v15  ;;  %v4909_v1 = vmul.f32 %v4900_v19, %v4900_v19  ;;  %v883_v4 = vsub.f32 %v627_v55, %v755_v7  ;;  %v628_v56 = vmul.f32 0.5, %v372_v47 }
 0x22d   :  { %v2414_v29 = vadd.f32 -22.959543, %v2286_v42  ;;  %v2031_v39 = vmul.f32 %v1903_v18, %v4876_v37  ;;  %v1776_v9 = vmul.f32 %v1648_v24, %v4895_v17  ;;  %v4917_v10 = vmul.f32 %v1138_v0, %v498_v38 }
 0x22e   :  { %2925 = vst [vmem:[%s5298_s1 + $0x328] sm:$0xff] %v2797_v6  ;;  %v1521_v43 = vmul.f32 -0.03274596, %v4909_v1  ;;  %v1011_v15 = vmul.f32 4.0, %v883_v4  ;;  %v245_v25 = vadd.f32 0.5, %v117_v2  ;;  %v756_v61 = vfloor.f32 %v628_v56 }
 0x22f   :  { %v2542_v3 = vmul.f32 %v2414_v29, %v4856_v49  ;;  %v2159_v46 = vadd.f32 11.33008, %v2031_v39  ;;  %v1904_v26 = vadd.f32 -2.6624622, %v1776_v9  ;;  %v4922_v30 = vmul.f32 %v4917_v10, %v4917_v10  ;;  %v4964_v29 = vld [vmem:[%s5297_s0 + $0x380] sm:$0xff] }
 0x230   :  { %v1649_v53 = vadd.f32 0.36496454, %v1521_v43  ;;  %v1139_v52 = vsub.f32 1.0, %v1011_v15  ;;  %v373_v62 = vfloor.f32 %v245_v25  ;;  %v884_v41 = vsub.f32 %v628_v56, %v756_v61 }
 0x231   :  { %v2670_v63 = vadd.f32 13.957728, %v2542_v3  ;;  %v2287_v40 = vmul.f32 %v2159_v46, %v4876_v37  ;;  %v2032_v57 = vmul.f32 %v1904_v26, %v4895_v17  ;;  %v1522_v49 = vmul.f32 -0.03274596, %v4922_v30 }
 0x232   :  { %v1777_v13 = vmul.f32 %v1649_v53, %v4909_v1  ;;  %v4928_v21 = vmul.f32 %v1139_v52, %v499_v58  ;;  %v500_v34 = vsub.f32 %v4881_v50, %v372_v47  ;;  %v1012_v20 = vmul.f32 4.0, %v884_v41 }
 0x233   :  { %v2798_v45 = vmul.f32 %v2670_v63, %v4848_v23  ;;  %v2415_v36 = vadd.f32 -22.959543, %v2287_v40  ;;  %v2160_v51 = vadd.f32 11.33008, %v2032_v57  ;;  %v1650_v54 = vadd.f32 0.36496454, %v1522_v49 }
 0x234   :  { %v1905_v32 = vadd.f32 -2.6624622, %v1777_v13  ;;  %v4937_v14 = vmul.f32 %v4928_v21, %v4928_v21  ;;  %v629_v60 = vmul.f32 0.5, %v373_v62  ;;  %v1140_v27 = vsub.f32 1.0, %v1012_v20 }
 0x235   :  { %2926 = vst [vmem:[%s5298_s1 + $0x330] sm:$0xff] %v2798_v45  ;;  %v2543_v50 = vmul.f32 %v2415_v36, %v4876_v37  ;;  %v2288_v8 = vmul.f32 %v2160_v51, %v4895_v17  ;;  %v246_v23 = vadd.f32 0.5, %v118_v16  ;;  %v1778_v38 = vmul.f32 %v1650_v54, %v4922_v30  ;;  %v119_v37 = vld [vmem:[%s5297_s0 + $0x378] sm:$0xff] }
 0x236   :  { %v2033_v44 = vmul.f32 %v1905_v32, %v4909_v1  ;;  %v1523_v5 = vmul.f32 -0.03274596, %v4937_v14  ;;  %v757_v48 = vfloor.f32 %v629_v60  ;;  %v4947_v59 = vmul.f32 %v1140_v27, %v500_v34  ;;  %v121_v27 = vld [vmem:[%s5297_s0 + $0x388] sm:$0xff] }
 0x237   :  { %v2671_v22 = vadd.f32 13.957728, %v2543_v50  ;;  %v2416_v55 = vadd.f32 -22.959543, %v2288_v8  ;;  %v374_v28 = vfloor.f32 %v246_v23  ;;  %v1906_v47 = vadd.f32 -2.6624622, %v1778_v38 }
 0x238   :  { %v2161_v33 = vadd.f32 11.33008, %v2033_v44  ;;  %v1651_v12 = vadd.f32 0.36496454, %v1523_v5  ;;  %v885_v31 = vsub.f32 %v629_v60, %v757_v48  ;;  %v4956_v18 = vmul.f32 %v4947_v59, %v4947_v59 }
 0x239   :  { %v2799_v7 = vmul.f32 %v2671_v22, %v4868_v35  ;;  %v2544_v42 = vmul.f32 %v2416_v55, %v4895_v17  ;;  %v501_v24 = vsub.f32 %v117_v2, %v373_v62  ;;  %v2034_v6 = vmul.f32 %v1906_v47, %v4922_v30  ;;  %v122_v55 = vld [vmem:[%s5297_s0 + $0x390] sm:$0xff] }
 0x23a   :  { %v2289_v58 = vmul.f32 %v2161_v33, %v4909_v1  ;;  %v1779_v0 = vmul.f32 %v1651_v12, %v4937_v14  ;;  %v1013_v4 = vmul.f32 4.0, %v885_v31  ;;  %v1524_v17 = vmul.f32 -0.03274596, %v4956_v18 }
 0x23b   :  { %2927 = vst [vmem:[%s5298_s1 + $0x338] sm:$0xff] %v2799_v7  ;;  %v2672_v35 = vadd.f32 13.957728, %v2544_v42  ;;  %v630_v2 = vmul.f32 0.5, %v374_v28  ;;  %v247_v39 = vadd.f32 0.5, %v119_v37  ;;  %v249_v12 = vadd.f32 0.5, %v121_v27 }
 0x23c   :  { %v2417_v9 = vadd.f32 -22.959543, %v2289_v58  ;;  %v2162_v56 = vadd.f32 11.33008, %v2034_v6  ;;  %v1907_v43 = vadd.f32 -2.6624622, %v1779_v0 }
 0x23d   :  { %v2800_v15 = vmul.f32 %v2672_v35, %v4886_v11  ;;  %v1652_v25 = vadd.f32 0.36496454, %v1524_v17  ;;  %v1141_v3 = vsub.f32 1.0, %v1013_v4  ;;  %v758_v46 = vfloor.f32 %v630_v2 }
 0x23e   :  { %v2545_v26 = vmul.f32 %v2417_v9, %v4909_v1  ;;  %v2290_v61 = vmul.f32 %v2162_v56, %v4922_v30  ;;  %v2035_v53 = vmul.f32 %v1907_v43, %v4937_v14  ;;  %v375_v52 = vfloor.f32 %v247_v39 }
 0x23f   :  { %2928 = vst [vmem:[%s5298_s1 + $0x340] sm:$0xff] %v2800_v15  ;;  %v1780_v62 = vmul.f32 %v1652_v25, %v4956_v18  ;;  %v4978_v63 = vmul.f32 %v1141_v3, %v501_v24  ;;  %v886_v40 = vsub.f32 %v630_v2, %v758_v46  ;;  %v248_v11 = vadd.f32 0.5, %v4964_v29 }
 0x240   :  { %v2673_v57 = vadd.f32 13.957728, %v2545_v26  ;;  %v2418_v41 = vadd.f32 -22.959543, %v2290_v61  ;;  %v2163_v13 = vadd.f32 11.33008, %v2035_v53  ;;  %v502_v1 = vsub.f32 %v118_v16, %v374_v28 }
 0x241   :  { %v1908_v49 = vadd.f32 -2.6624622, %v1780_v62  ;;  %v4983_v34 = vmul.f32 %v4978_v63, %v4978_v63  ;;  %v1014_v45 = vmul.f32 4.0, %v886_v40  ;;  %v631_v36 = vmul.f32 0.5, %v375_v52 }
 0x242   :  { %v2801_v51 = vmul.f32 %v2673_v57, %v4900_v19  ;;  %v2546_v20 = vmul.f32 %v2418_v41, %v4922_v30  ;;  %v2291_v32 = vmul.f32 %v2163_v13, %v4937_v14  ;;  %v376_v54 = vfloor.f32 %v248_v11  ;;  %v5035_v57 = vld [vmem:[%s5297_s0 + $0x3a0] sm:$0xff] }
 0x243   :  { %v2036_v60 = vmul.f32 %v1908_v49, %v4956_v18  ;;  %v1525_v50 = vmul.f32 -0.03274596, %v4983_v34  ;;  %v1142_v8 = vsub.f32 1.0, %v1014_v45  ;;  %v759_v16 = vfloor.f32 %v631_v36 }
 0x244   :  { %2929 = vst [vmem:[%s5298_s1 + $0x348] sm:$0xff] %v2801_v51  ;;  %v2674_v19 = vadd.f32 13.957728, %v2546_v20  ;;  %v2419_v23 = vadd.f32 -22.959543, %v2291_v32  ;;  %v503_v30 = vsub.f32 %v119_v37, %v375_v52  ;;  %v632_v44 = vmul.f32 0.5, %v376_v54 }
 0x245   :  { %v2164_v38 = vadd.f32 11.33008, %v2036_v60  ;;  %v1653_v5 = vadd.f32 0.36496454, %v1525_v50  ;;  %v4996_v48 = vmul.f32 %v1142_v8, %v502_v1  ;;  %v887_v22 = vsub.f32 %v631_v36, %v759_v16 }
 0x246   :  { %v2802_v28 = vmul.f32 %v2674_v19, %v4917_v10  ;;  %v2547_v33 = vmul.f32 %v2419_v23, %v4937_v14  ;;  %v760_v47 = vfloor.f32 %v632_v44  ;;  %v377_v10 = vfloor.f32 %v249_v12  ;;  %v123_v14 = vld [vmem:[%s5297_s0 + $0x398] sm:$0xff] }
 0x247   :  { %v2292_v31 = vmul.f32 %v2164_v38, %v4956_v18  ;;  %v1781_v37 = vmul.f32 %v1653_v5, %v4983_v34  ;;  %v5007_v7 = vmul.f32 %v4996_v48, %v4996_v48  ;;  %v1015_v42 = vmul.f32 4.0, %v887_v22 }
 0x248   :  { %2930 = vst [vmem:[%s5298_s1 + $0x350] sm:$0xff] %v2802_v28  ;;  %v2675_v24 = vadd.f32 13.957728, %v2547_v33  ;;  %v888_v58 = vsub.f32 %v632_v44, %v760_v47  ;;  %v250_v6 = vadd.f32 0.5, %v122_v55  ;;  %v504_v39 = vsub.f32 %v4964_v29, %v376_v54 }
 0x249   :  { %v2420_v0 = vadd.f32 -22.959543, %v2292_v31  ;;  %v1909_v4 = vadd.f32 -2.6624622, %v1781_v37  ;;  %v1526_v35 = vmul.f32 -0.03274596, %v5007_v7  ;;  %v505_v40 = vsub.f32 %v121_v27, %v377_v10 }
 0x24a   :  { %v2803_v17 = vmul.f32 %v2675_v24, %v4928_v21  ;;  %v1143_v2 = vsub.f32 1.0, %v1015_v42  ;;  %v1016_v9 = vmul.f32 4.0, %v888_v58  ;;  %v633_v25 = vmul.f32 0.5, %v377_v10 }
 0x24b   :  { %v2548_v56 = vmul.f32 %v2420_v0, %v4956_v18  ;;  %v2037_v43 = vmul.f32 %v1909_v4, %v4983_v34  ;;  %v1654_v15 = vadd.f32 0.36496454, %v1526_v35  ;;  %v378_v26 = vfloor.f32 %v250_v6 }
 0x24c   :  { %2931 = vst [vmem:[%s5298_s1 + $0x358] sm:$0xff] %v2803_v17  ;;  %v5023_v3 = vmul.f32 %v1143_v2, %v503_v30  ;;  %v1144_v46 = vsub.f32 1.0, %v1016_v9  ;;  %v251_v61 = vadd.f32 0.5, %v123_v14  ;;  %v761_v52 = vfloor.f32 %v633_v25 }
 0x24d   :  { %v2676_v21 = vadd.f32 13.957728, %v2548_v56  ;;  %v2165_v53 = vadd.f32 11.33008, %v2037_v43  ;;  %v1782_v29 = vmul.f32 %v1654_v15, %v5007_v7  ;;  %v634_v11 = vmul.f32 0.5, %v378_v26 }
 0x24e   :  { %v5028_v18 = vmul.f32 %v5023_v3, %v5023_v3  ;;  %v5030_v62 = vmul.f32 %v1144_v46, %v504_v39  ;;  %v889_v49 = vsub.f32 %v633_v25, %v761_v52  ;;  %v379_v20 = vfloor.f32 %v251_v61 }
 0x24f   :  { %v2804_v41 = vmul.f32 %v2676_v21, %v4947_v59  ;;  %v2293_v13 = vmul.f32 %v2165_v53, %v4983_v34  ;;  %v1910_v1 = vadd.f32 -2.6624622, %v1782_v29  ;;  %v762_v51 = vfloor.f32 %v634_v11 }
 0x250   :  { %v1527_v45 = vmul.f32 -0.03274596, %v5028_v18  ;;  %v5042_v36 = vmul.f32 %v5030_v62, %v5030_v62  ;;  %v1017_v59 = vmul.f32 4.0, %v889_v49  ;;  %v252_v60 = vadd.f32 0.5, %v5035_v57 }
 0x251   :  { %2932 = vst [vmem:[%s5298_s1 + $0x360] sm:$0xff] %v2804_v41  ;;  %v2421_v32 = vadd.f32 -22.959543, %v2293_v13  ;;  %v2038_v54 = vmul.f32 %v1910_v1, %v5007_v7  ;;  %v506_v16 = vsub.f32 %v122_v55, %v378_v26  ;;  %v890_v27 = vsub.f32 %v634_v11, %v762_v51 }
 0x252   :  { %v1655_v50 = vadd.f32 0.36496454, %v1527_v45  ;;  %v1528_v8 = vmul.f32 -0.03274596, %v5042_v36  ;;  %v1145_v30 = vsub.f32 1.0, %v1017_v59  ;;  %v635_v44 = vmul.f32 0.5, %v379_v20 }
 0x253   :  { %v2549_v19 = vmul.f32 %v2421_v32, %v4983_v34  ;;  %v2166_v23 = vadd.f32 11.33008, %v2038_v54  ;;  %v1018_v22 = vmul.f32 4.0, %v890_v27  ;;  %v380_v28 = vfloor.f32 %v252_v60  ;;  %v125_v34 = vld [vmem:[%s5297_s0 + $0x3a8] sm:$0xff] }
 0x254   :  { %v1783_v38 = vmul.f32 %v1655_v50, %v5028_v18  ;;  %v1656_v5 = vadd.f32 0.36496454, %v1528_v8  ;;  %v5053_v12 = vmul.f32 %v1145_v30, %v505_v40  ;;  %v763_v31 = vfloor.f32 %v635_v44  ;;  %v126_v40 = vld [vmem:[%s5297_s0 + $0x3b0] sm:$0xff] }
 0x255   :  { %v2677_v33 = vadd.f32 13.957728, %v2549_v19  ;;  %v2294_v47 = vmul.f32 %v2166_v23, %v5007_v7  ;;  %v1146_v42 = vsub.f32 1.0, %v1018_v22  ;;  %v507_v24 = vsub.f32 %v123_v14, %v379_v20 }
 0x256   :  { %v1911_v37 = vadd.f32 -2.6624622, %v1783_v38  ;;  %v1784_v55 = vmul.f32 %v1656_v5, %v5042_v36  ;;  %v5062_v6 = vmul.f32 %v5053_v12, %v5053_v12  ;;  %v891_v0 = vsub.f32 %v635_v44, %v763_v31 }
 0x257   :  { %v2805_v58 = vmul.f32 %v2677_v33, %v4978_v63  ;;  %v2422_v10 = vadd.f32 -22.959543, %v2294_v47  ;;  %v5065_v17 = vmul.f32 %v1146_v42, %v506_v16  ;;  %v636_v2 = vmul.f32 0.5, %v380_v28  ;;  %v127_v47 = vld [vmem:[%s5297_s0 + $0x3b8] sm:$0xff] }
 0x258   :  { %v2039_v4 = vmul.f32 %v1911_v37, %v5028_v18  ;;  %v1912_v35 = vadd.f32 -2.6624622, %v1784_v55  ;;  %v1529_v63 = vmul.f32 -0.03274596, %v5062_v6  ;;  %v1019_v39 = vmul.f32 4.0, %v891_v0 }
 0x259   :  { %2933 = vst [vmem:[%s5298_s1 + $0x368] sm:$0xff] %v2805_v58  ;;  %v2550_v14 = vmul.f32 %v2422_v10, %v5007_v7  ;;  %v253_v9 = vadd.f32 0.5, %v125_v34  ;;  %v5075_v15 = vmul.f32 %v5065_v17, %v5065_v17  ;;  %v764_v25 = vfloor.f32 %v636_v2  ;;  %v5116_v10 = vld [vmem:[%s5297_s0 + $0x3c0] sm:$0xff] }
 0x25a   :  { %v2167_v56 = vadd.f32 11.33008, %v2039_v4  ;;  %v2040_v43 = vmul.f32 %v1912_v35, %v5042_v36  ;;  %v1657_v26 = vadd.f32 0.36496454, %v1529_v63  ;;  %v1147_v61 = vsub.f32 1.0, %v1019_v39 }
 0x25b   :  { %v2678_v46 = vadd.f32 13.957728, %v2550_v14  ;;  %v381_v21 = vfloor.f32 %v253_v9  ;;  %v1530_v7 = vmul.f32 -0.03274596, %v5075_v15  ;;  %v892_v52 = vsub.f32 %v636_v2, %v764_v25 }
 0x25c   :  { %v2295_v53 = vmul.f32 %v2167_v56, %v5028_v18  ;;  %v2168_v29 = vadd.f32 11.33008, %v2040_v43  ;;  %v1785_v41 = vmul.f32 %v1657_v26, %v5062_v6  ;;  %v5084_v13 = vmul.f32 %v1147_v61, %v507_v24 }
 0x25d   :  { %v2806_v11 = vmul.f32 %v2678_v46, %v4996_v48  ;;  %v508_v1 = vsub.f32 %v5035_v57, %v380_v28  ;;  %v1658_v51 = vadd.f32 0.36496454, %v1530_v7  ;;  %v1020_v20 = vmul.f32 4.0, %v892_v52 }
 0x25e   :  { %v2423_v49 = vadd.f32 -22.959543, %v2295_v53  ;;  %v2296_v45 = vmul.f32 %v2168_v29, %v5042_v36  ;;  %v1913_v32 = vadd.f32 -2.6624622, %v1785_v41  ;;  %v5093_v54 = vmul.f32 %v5084_v13, %v5084_v13 }
 0x25f   :  { %2934 = vst [vmem:[%s5298_s1 + $0x370] sm:$0xff] %v2806_v11  ;;  %v637_v48 = vmul.f32 0.5, %v381_v21  ;;  %v254_v59 = vadd.f32 0.5, %v126_v40  ;;  %v1786_v57 = vmul.f32 %v1658_v51, %v5075_v15  ;;  %v1148_v8 = vsub.f32 1.0, %v1020_v20 }
 0x260   :  { %v2551_v60 = vmul.f32 %v2423_v49, %v5028_v18  ;;  %v2424_v50 = vadd.f32 -22.959543, %v2296_v45  ;;  %v2041_v16 = vmul.f32 %v1913_v32, %v5062_v6  ;;  %v1531_v27 = vmul.f32 -0.03274596, %v5093_v54 }
 0x261   :  { %v765_v19 = vfloor.f32 %v637_v48  ;;  %v382_v23 = vfloor.f32 %v254_v59  ;;  %v1914_v38 = vadd.f32 -2.6624622, %v1786_v57  ;;  %v5100_v5 = vmul.f32 %v1148_v8, %v508_v1  ;;  %v129_v59 = vld [vmem:[%s5297_s0 + $0x3c8] sm:$0xff] }
 0x262   :  { %v2679_v30 = vadd.f32 13.957728, %v2551_v60  ;;  %v2552_v44 = vmul.f32 %v2424_v50, %v5042_v36  ;;  %v2169_v22 = vadd.f32 11.33008, %v2041_v16  ;;  %v1659_v28 = vadd.f32 0.36496454, %v1531_v27 }
 0x263   :  { %v509_v33 = vsub.f32 %v125_v34, %v381_v21  ;;  %v893_v18 = vsub.f32 %v637_v48, %v765_v19  ;;  %v2042_v55 = vmul.f32 %v1914_v38, %v5075_v15  ;;  %v5109_v42 = vmul.f32 %v5100_v5, %v5100_v5  ;;  %v130_v19 = vld [vmem:[%s5297_s0 + $0x3d0] sm:$0xff] }
 0x264   :  { %v2807_v31 = vmul.f32 %v2679_v30, %v5023_v3  ;;  %v2680_v37 = vadd.f32 13.957728, %v2552_v44  ;;  %v2297_v36 = vmul.f32 %v2169_v22, %v5062_v6  ;;  %v1787_v24 = vmul.f32 %v1659_v28, %v5093_v54 }
 0x265   :  { %v1021_v58 = vmul.f32 4.0, %v893_v18  ;;  %v638_v34 = vmul.f32 0.5, %v382_v23  ;;  %v2170_v0 = vadd.f32 11.33008, %v2042_v55  ;;  %v1532_v4 = vmul.f32 -0.03274596, %v5109_v42 }
 0x266   :  { %2935 = vst [vmem:[%s5298_s1 + $0x378] sm:$0xff] %v2807_v31  ;;  %v2808_v3 = vmul.f32 %v2680_v37, %v5030_v62  ;;  %v255_v35 = vadd.f32 0.5, %v127_v47  ;;  %v2425_v2 = vadd.f32 -22.959543, %v2297_v36  ;;  %v1915_v14 = vadd.f32 -2.6624622, %v1787_v24 }
 0x267   :  { %v1149_v63 = vsub.f32 1.0, %v1021_v58  ;;  %v766_v39 = vfloor.f32 %v638_v34  ;;  %v2298_v9 = vmul.f32 %v2170_v0, %v5075_v15  ;;  %v1660_v56 = vadd.f32 0.36496454, %v1532_v4  ;;  %v131_v4 = vld [vmem:[%s5297_s0 + $0x3d8] sm:$0xff] }
 0x268   :  { %2936 = vst [vmem:[%s5298_s1 + $0x380] sm:$0xff] %v2808_v3  ;;  %v383_v43 = vfloor.f32 %v255_v35  ;;  %v256_v25 = vadd.f32 0.5, %v5116_v10  ;;  %v2553_v62 = vmul.f32 %v2425_v2, %v5062_v6  ;;  %v2043_v46 = vmul.f32 %v1915_v14, %v5093_v54 }
 0x269   :  { %v5130_v26 = vmul.f32 %v1149_v63, %v509_v33  ;;  %v894_v61 = vsub.f32 %v638_v34, %v766_v39  ;;  %v2426_v21 = vadd.f32 -22.959543, %v2298_v9  ;;  %v1788_v53 = vmul.f32 %v1660_v56, %v5109_v42 }
 0x26a   :  { %v510_v29 = vsub.f32 %v126_v40, %v382_v23  ;;  %v639_v7 = vmul.f32 0.5, %v383_v43  ;;  %v2681_v52 = vadd.f32 13.957728, %v2553_v62  ;;  %v2171_v11 = vadd.f32 11.33008, %v2043_v46 }
 0x26b   :  { %v5135_v41 = vmul.f32 %v5130_v26, %v5130_v26  ;;  %v1022_v1 = vmul.f32 4.0, %v894_v61  ;;  %v2554_v49 = vmul.f32 %v2426_v21, %v5075_v15  ;;  %v1916_v6 = vadd.f32 -2.6624622, %v1788_v53 }
 0x26c   :  { %v767_v45 = vfloor.f32 %v639_v7  ;;  %v384_v51 = vfloor.f32 %v256_v25  ;;  %v2809_v20 = vmul.f32 %v2681_v52, %v5053_v12  ;;  %v2299_v32 = vmul.f32 %v2171_v11, %v5093_v54 }
 0x26d   :  { %v1533_v48 = vmul.f32 -0.03274596, %v5135_v41  ;;  %v1150_v40 = vsub.f32 1.0, %v1022_v1  ;;  %v2682_v60 = vadd.f32 13.957728, %v2554_v49  ;;  %v2044_v50 = vmul.f32 %v1916_v6, %v5109_v42 }
 0x26e   :  { %v511_v57 = vsub.f32 %v127_v47, %v383_v43  ;;  %v895_v8 = vsub.f32 %v639_v7, %v767_v45  ;;  %2937 = vst [vmem:[%s5298_s1 + $0x388] sm:$0xff] %v2809_v20  ;;  %v2427_v15 = vadd.f32 -22.959543, %v2299_v32  ;;  %v640_v27 = vmul.f32 0.5, %v384_v51 }
 0x26f   :  { %v1661_v12 = vadd.f32 0.36496454, %v1533_v48  ;;  %v5148_v16 = vmul.f32 %v1150_v40, %v510_v29  ;;  %v2810_v23 = vmul.f32 %v2682_v60, %v5065_v17  ;;  %v2172_v30 = vadd.f32 11.33008, %v2044_v50  ;;  %v132_v48 = vld [vmem:[%s5297_s0 + $0x3e0] sm:$0xff] }
 0x270   :  { %v1023_v44 = vmul.f32 4.0, %v895_v8  ;;  %v257_v38 = vadd.f32 0.5, %v129_v59  ;;  %v2555_v22 = vmul.f32 %v2427_v15, %v5093_v54  ;;  %v768_v18 = vfloor.f32 %v640_v27 }
 0x271   :  { %v1789_v28 = vmul.f32 %v1661_v12, %v5135_v41  ;;  %v5158_v33 = vmul.f32 %v5148_v16, %v5148_v16  ;;  %2938 = vst [vmem:[%s5298_s1 + $0x390] sm:$0xff] %v2810_v23  ;;  %v2300_v47 = vmul.f32 %v2172_v30, %v5109_v42  ;;  %v258_v37 = vadd.f32 0.5, %v130_v19 }
 0x272   :  { %v1151_v31 = vsub.f32 1.0, %v1023_v44  ;;  %v385_v17 = vfloor.f32 %v257_v38  ;;  %v2683_v55 = vadd.f32 13.957728, %v2555_v22  ;;  %v896_v24 = vsub.f32 %v640_v27, %v768_v18 }
 0x273   :  { %v1917_v36 = vadd.f32 -2.6624622, %v1789_v28  ;;  %v1534_v54 = vmul.f32 -0.03274596, %v5158_v33  ;;  %v2428_v58 = vadd.f32 -22.959543, %v2300_v47  ;;  %v512_v3 = vsub.f32 %v5116_v10, %v384_v51 }
 0x274   :  { %v5165_v34 = vmul.f32 %v1151_v31, %v511_v57  ;;  %v641_v0 = vmul.f32 0.5, %v385_v17  ;;  %v2811_v35 = vmul.f32 %v2683_v55, %v5084_v13  ;;  %v1024_v63 = vmul.f32 4.0, %v896_v24 }
 0x275   :  { %v2045_v2 = vmul.f32 %v1917_v36, %v5135_v41  ;;  %v1662_v14 = vadd.f32 0.36496454, %v1534_v54  ;;  %v2556_v39 = vmul.f32 %v2428_v58, %v5109_v42  ;;  %v386_v43 = vfloor.f32 %v258_v37  ;;  %v133_v36 = vld [vmem:[%s5297_s0 + $0x3e8] sm:$0xff] }
 0x276   :  { %v5176_v9 = vmul.f32 %v5165_v34, %v5165_v34  ;;  %v769_v56 = vfloor.f32 %v641_v0  ;;  %2939 = vst [vmem:[%s5298_s1 + $0x398] sm:$0xff] %v2811_v35  ;;  %v1152_v13 = vsub.f32 1.0, %v1024_v63  ;;  %v259_v62 = vadd.f32 0.5, %v131_v4 }
 0x277   :  { %v2173_v10 = vadd.f32 11.33008, %v2045_v2  ;;  %v1790_v25 = vmul.f32 %v1662_v14, %v5158_v33  ;;  %v2684_v46 = vadd.f32 13.957728, %v2556_v39  ;;  %v513_v21 = vsub.f32 %v129_v59, %v385_v17 }
 0x278   :  { %v1535_v61 = vmul.f32 -0.03274596, %v5176_v9  ;;  %v897_v42 = vsub.f32 %v641_v0, %v769_v56  ;;  %v5184_v7 = vmul.f32 %v1152_v13, %v512_v3  ;;  %v642_v52 = vmul.f32 0.5, %v386_v43 }
 0x279   :  { %v2301_v53 = vmul.f32 %v2173_v10, %v5135_v41  ;;  %v1918_v29 = vadd.f32 -2.6624622, %v1790_v25  ;;  %v2812_v11 = vmul.f32 %v2684_v46, %v5100_v5  ;;  %v387_v6 = vfloor.f32 %v259_v62 }
 0x27a   :  { %v1663_v1 = vadd.f32 0.36496454, %v1535_v61  ;;  %v1025_v49 = vmul.f32 4.0, %v897_v42  ;;  %v5190_v20 = vmul.f32 %v5184_v7, %v5184_v7  ;;  %v770_v32 = vfloor.f32 %v642_v52 }
 0x27b   :  { %v2429_v45 = vadd.f32 -22.959543, %v2301_v53  ;;  %v2046_v51 = vmul.f32 %v1918_v29, %v5158_v33  ;;  %2940 = vst [vmem:[%s5298_s1 + $0x3a0] sm:$0xff] %v2812_v11  ;;  %v514_v59 = vsub.f32 %v130_v19, %v386_v43  ;;  %v643_v60 = vmul.f32 0.5, %v387_v6  ;;  %v134_v29 = vld [vmem:[%s5297_s0 + $0x3f0] sm:$0xff] }
 0x27c   :  { %v1791_v5 = vmul.f32 %v1663_v1, %v5176_v9  ;;  %v1153_v40 = vsub.f32 1.0, %v1025_v49  ;;  %v1536_v8 = vmul.f32 -0.03274596, %v5190_v20  ;;  %v898_v15 = vsub.f32 %v642_v52, %v770_v32 }
 0x27d   :  { %v2557_v50 = vmul.f32 %v2429_v45, %v5135_v41  ;;  %v2174_v57 = vadd.f32 11.33008, %v2046_v51  ;;  %v771_v23 = vfloor.f32 %v643_v60  ;;  %v260_v30 = vadd.f32 0.5, %v132_v48 }
 0x27e   :  { %v1919_v12 = vadd.f32 -2.6624622, %v1791_v5  ;;  %v5201_v27 = vmul.f32 %v1153_v40, %v513_v21  ;;  %v1664_v22 = vadd.f32 0.36496454, %v1536_v8  ;;  %v1026_v28 = vmul.f32 4.0, %v898_v15 }
 0x27f   :  { %v2685_v44 = vadd.f32 13.957728, %v2557_v50  ;;  %v2302_v38 = vmul.f32 %v2174_v57, %v5158_v33  ;;  %v899_v41 = vsub.f32 %v643_v60, %v771_v23  ;;  %v388_v47 = vfloor.f32 %v260_v30 }
 0x280   :  { %v2047_v18 = vmul.f32 %v1919_v12, %v5176_v9  ;;  %v5207_v19 = vmul.f32 %v5201_v27, %v5201_v27  ;;  %v1792_v37 = vmul.f32 %v1664_v22, %v5190_v20  ;;  %v1154_v55 = vsub.f32 1.0, %v1026_v28  ;;  %v135_v22 = vld [vmem:[%s5297_s0 + $0x3f8] sm:$0xff] }
 0x281   :  { %v2813_v31 = vmul.f32 %v2685_v44, %v5130_v26  ;;  %v2430_v17 = vadd.f32 -22.959543, %v2302_v38  ;;  %v515_v58 = vsub.f32 %v131_v4, %v387_v6  ;;  %v1027_v3 = vmul.f32 4.0, %v899_v41 }
 0x282   :  { %v2175_v54 = vadd.f32 11.33008, %v2047_v18  ;;  %v1537_v24 = vmul.f32 -0.03274596, %v5207_v19  ;;  %v1920_v26 = vadd.f32 -2.6624622, %v1792_v37  ;;  %v5219_v35 = vmul.f32 %v1154_v55, %v514_v59 }
 0x283   :  { %2941 = vst [vmem:[%s5298_s1 + $0x3a8] sm:$0xff] %v2813_v31  ;;  %v2558_v0 = vmul.f32 %v2430_v17, %v5158_v33  ;;  %v644_v2 = vmul.f32 0.5, %v388_v47  ;;  %v1155_v39 = vsub.f32 1.0, %v1027_v3  ;;  %v261_v56 = vadd.f32 0.5, %v133_v36 }
 0x284   :  { %v2303_v14 = vmul.f32 %v2175_v54, %v5176_v9  ;;  %v1665_v63 = vadd.f32 0.36496454, %v1537_v24  ;;  %v2048_v10 = vmul.f32 %v1920_v26, %v5190_v20  ;;  %v5225_v4 = vmul.f32 %v5219_v35, %v5219_v35 }
 0x285   :  { %v2686_v43 = vadd.f32 13.957728, %v2558_v0  ;;  %v772_v25 = vfloor.f32 %v644_v2  ;;  %v5228_v62 = vmul.f32 %v1155_v39, %v515_v58  ;;  %v389_v46 = vfloor.f32 %v261_v56 }
 0x286   :  { %v2431_v13 = vadd.f32 -22.959543, %v2303_v14  ;;  %v1793_v33 = vmul.f32 %v1665_v63, %v5207_v19  ;;  %v2176_v21 = vadd.f32 11.33008, %v2048_v10  ;;  %v1538_v42 = vmul.f32 -0.03274596, %v5225_v4 }
 0x287   :  { %v2814_v61 = vmul.f32 %v2686_v43, %v5148_v16  ;;  %v900_v53 = vsub.f32 %v644_v2, %v772_v25  ;;  %v5238_v1 = vmul.f32 %v5228_v62, %v5228_v62  ;;  %v516_v49 = vsub.f32 %v132_v48, %v388_v47 }
 0x288   :  { %v2559_v52 = vmul.f32 %v2431_v13, %v5176_v9  ;;  %v1921_v11 = vadd.f32 -2.6624622, %v1793_v33  ;;  %v2304_v16 = vmul.f32 %v2176_v21, %v5190_v20  ;;  %v1666_v6 = vadd.f32 0.36496454, %v1538_v42 }
 0x289   :  { %2942 = vst [vmem:[%s5298_s1 + $0x3b0] sm:$0xff] %v2814_v61  ;;  %v1028_v45 = vmul.f32 4.0, %v900_v53  ;;  %v645_v51 = vmul.f32 0.5, %v389_v46  ;;  %v1539_v9 = vmul.f32 -0.03274596, %v5238_v1  ;;  %v262_v40 = vadd.f32 0.5, %v134_v29 }
 0x28a   :  { %v2687_v32 = vadd.f32 13.957728, %v2559_v52  ;;  %v2049_v5 = vmul.f32 %v1921_v11, %v5207_v19  ;;  %v2432_v59 = vadd.f32 -22.959543, %v2304_v16  ;;  %v1794_v60 = vmul.f32 %v1666_v6, %v5225_v4 }
 0x28b   :  { %v1156_v50 = vsub.f32 1.0, %v1028_v45  ;;  %v773_v48 = vfloor.f32 %v645_v51  ;;  %v1667_v15 = vadd.f32 0.36496454, %v1539_v9  ;;  %v390_v12 = vfloor.f32 %v262_v40 }
 0x28c   :  { %v2815_v57 = vmul.f32 %v2687_v32, %v5165_v34  ;;  %v2177_v8 = vadd.f32 11.33008, %v2049_v5  ;;  %v2560_v23 = vmul.f32 %v2432_v59, %v5190_v20  ;;  %v1922_v30 = vadd.f32 -2.6624622, %v1794_v60 }
 0x28d   :  { %v5249_v44 = vmul.f32 %v1156_v50, %v516_v49  ;;  %v901_v38 = vsub.f32 %v645_v51, %v773_v48  ;;  %v1795_v34 = vmul.f32 %v1667_v15, %v5238_v1  ;;  %v517_v18 = vsub.f32 %v133_v36, %v389_v46 }
 0x28e   :  { %2943 = vst [vmem:[%s5298_s1 + $0x3b8] sm:$0xff] %v2815_v57  ;;  %v2305_v28 = vmul.f32 %v2177_v8, %v5207_v19  ;;  %v646_v41 = vmul.f32 0.5, %v390_v12  ;;  %v2688_v47 = vadd.f32 13.957728, %v2560_v23  ;;  %v2050_v20 = vmul.f32 %v1922_v30, %v5225_v4 }
 0x28f   :  { %v1412_v31 = vmul.f32 %v5249_v44, %v5249_v44  ;;  %v1029_v17 = vmul.f32 4.0, %v901_v38  ;;  %v1923_v55 = vadd.f32 -2.6624622, %v1795_v34  ;;  %v263_v24 = vadd.f32 0.5, %v135_v22 }
 0x290   :  { %v2433_v37 = vadd.f32 -22.959543, %v2305_v28  ;;  %v774_v54 = vfloor.f32 %v646_v41  ;;  %v2816_v58 = vmul.f32 %v2688_v47, %v5184_v7  ;;  %v2178_v3 = vadd.f32 11.33008, %v2050_v20 }
 0x291   :  { %v1540_v0 = vmul.f32 -0.03274596, %v1412_v31  ;;  %v1157_v26 = vsub.f32 1.0, %v1029_v17  ;;  %v2051_v36 = vmul.f32 %v1923_v55, %v5238_v1  ;;  %v391_v63 = vfloor.f32 %v263_v24 }
 0x292   :  { %v2561_v2 = vmul.f32 %v2433_v37, %v5207_v19  ;;  %v902_v14 = vsub.f32 %v646_v41, %v774_v54  ;;  %2944 = vst [vmem:[%s5298_s1 + $0x3c0] sm:$0xff] %v2816_v58  ;;  %v2306_v39 = vmul.f32 %v2178_v3, %v5225_v4  ;;  %v518_v7 = vsub.f32 %v134_v29, %v390_v12 }
 0x293   :  { %v1668_v56 = vadd.f32 0.36496454, %v1540_v0  ;;  %v1285_v43 = vmul.f32 %v1157_v26, %v517_v18  ;;  %v2179_v25 = vadd.f32 11.33008, %v2051_v36  ;;  %v647_v19 = vmul.f32 0.5, %v391_v63 }
 0x294   :  { %v2689_v10 = vadd.f32 13.957728, %v2561_v2  ;;  %v1030_v13 = vmul.f32 4.0, %v902_v14  ;;  %v2434_v33 = vadd.f32 -22.959543, %v2306_v39  ;;  %v519_v40 = vsub.f32 %v135_v22, %v391_v63 }
 0x295   :  { %v1796_v46 = vmul.f32 %v1668_v56, %v1412_v31  ;;  %v1413_v61 = vmul.f32 %v1285_v43, %v1285_v43  ;;  %v2307_v42 = vmul.f32 %v2179_v25, %v5238_v1  ;;  %v775_v16 = vfloor.f32 %v647_v19 }
 0x296   :  { %v2817_v21 = vmul.f32 %v2689_v10, %v5201_v27  ;;  %v1158_v53 = vsub.f32 1.0, %v1030_v13  ;;  %v2562_v52 = vmul.f32 %v2434_v33, %v5225_v4 }
 0x297   :  { %v1924_v11 = vadd.f32 -2.6624622, %v1796_v46  ;;  %v1541_v49 = vmul.f32 -0.03274596, %v1413_v61  ;;  %v2435_v29 = vadd.f32 -22.959543, %v2307_v42  ;;  %v903_v5 = vsub.f32 %v647_v19, %v775_v16 }
 0x298   :  { %2945 = vst [vmem:[%s5298_s1 + $0x3c8] sm:$0xff] %v2817_v21  ;;  %v1286_v6 = vmul.f32 %v1158_v53, %v518_v7  ;;  %v2690_v45 = vadd.f32 13.957728, %v2562_v52 }
 0x299   :  { %v2052_v51 = vmul.f32 %v1924_v11, %v1412_v31  ;;  %v1669_v32 = vadd.f32 0.36496454, %v1541_v49  ;;  %v2563_v27 = vmul.f32 %v2435_v29, %v5238_v1  ;;  %v1031_v50 = vmul.f32 4.0, %v903_v5 }
 0x29a   :  { %v1414_v9 = vmul.f32 %v1286_v6, %v1286_v6  ;;  %v2818_v59 = vmul.f32 %v2690_v45, %v5219_v35 }
 0x29b   :  { %v2180_v4 = vadd.f32 11.33008, %v2052_v51  ;;  %v1797_v60 = vmul.f32 %v1669_v32, %v1413_v61  ;;  %v2691_v48 = vadd.f32 13.957728, %v2563_v27  ;;  %v1159_v12 = vsub.f32 1.0, %v1031_v50 }
 0x29c   :  { %v1542_v57 = vmul.f32 -0.03274596, %v1414_v9  ;;  %2946 = vst [vmem:[%s5298_s1 + $0x3d0] sm:$0xff] %v2818_v59 }
 0x29d   :  { %v2308_v8 = vmul.f32 %v2180_v4, %v1412_v31  ;;  %v1925_v15 = vadd.f32 -2.6624622, %v1797_v60  ;;  %v2819_v23 = vmul.f32 %v2691_v48, %v5228_v62  ;;  %v1287_v22 = vmul.f32 %v1159_v12, %v519_v40 }
 0x29e   :  { %v1670_v30 = vadd.f32 0.36496454, %v1542_v57 }
 0x29f   :  { %v2436_v1 = vadd.f32 -22.959543, %v2308_v8  ;;  %v2053_v38 = vmul.f32 %v1925_v15, %v1413_v61  ;;  %2947 = vst [vmem:[%s5298_s1 + $0x3d8] sm:$0xff] %v2819_v23  ;;  %v1415_v18 = vmul.f32 %v1287_v22, %v1287_v22 }
 0x2a0   :  { %v1798_v35 = vmul.f32 %v1670_v30, %v1414_v9 }
 0x2a1   :  { %v2564_v28 = vmul.f32 %v2436_v1, %v1412_v31  ;;  %v2181_v34 = vadd.f32 11.33008, %v2053_v38  ;;  %v1543_v17 = vmul.f32 -0.03274596, %v1415_v18 }
 0x2a2   :  { %v1926_v41 = vadd.f32 -2.6624622, %v1798_v35 }
 0x2a3   :  { %v2692_v47 = vadd.f32 13.957728, %v2564_v28  ;;  %v2309_v20 = vmul.f32 %v2181_v34, %v1413_v61  ;;  %v1671_v54 = vadd.f32 0.36496454, %v1543_v17 }
 0x2a4   :  { %v2054_v37 = vmul.f32 %v1926_v41, %v1414_v9 }
 0x2a5   :  { %v2820_v55 = vmul.f32 %v2692_v47, %v5249_v44  ;;  %v2437_v62 = vadd.f32 -22.959543, %v2309_v20  ;;  %v1799_v3 = vmul.f32 %v1671_v54, %v1415_v18 }
 0x2a6   :  { %v2182_v24 = vadd.f32 11.33008, %v2054_v37 }
 0x2a7   :  { %2948 = vst [vmem:[%s5298_s1 + $0x3e0] sm:$0xff] %v2820_v55  ;;  %v2565_v58 = vmul.f32 %v2437_v62, %v1413_v61  ;;  %v1927_v26 = vadd.f32 -2.6624622, %v1799_v3 }
 0x2a8   :  { %v2310_v0 = vmul.f32 %v2182_v24, %v1414_v9 }
 0x2a9   :  { %v2693_v31 = vadd.f32 13.957728, %v2565_v58  ;;  %v2055_v14 = vmul.f32 %v1927_v26, %v1415_v18 }
 0x2aa   :  { %v2438_v2 = vadd.f32 -22.959543, %v2310_v0 }
 0x2ab   :  { %v2821_v36 = vmul.f32 %v2693_v31, %v1285_v43  ;;  %v2183_v44 = vadd.f32 11.33008, %v2055_v14 }
 0x2ac   :  { %v2566_v63 = vmul.f32 %v2438_v2, %v1414_v9 }
 0x2ad   :  { %2949 = vst [vmem:[%s5298_s1 + $0x3e8] sm:$0xff] %v2821_v36  ;;  %v2311_v56 = vmul.f32 %v2183_v44, %v1415_v18 }
 0x2ae   :  { %v2694_v39 = vadd.f32 13.957728, %v2566_v63 }
 0x2af   :  { %v2439_v25 = vadd.f32 -22.959543, %v2311_v56 }
 0x2b0   :  { %v2822_v10 = vmul.f32 %v2694_v39, %v1286_v6 }
 0x2b1   :  { %v2567_v7 = vmul.f32 %v2439_v25, %v1415_v18 }
 0x2b2   :  { %2950 = vst [vmem:[%s5298_s1 + $0x3f0] sm:$0xff] %v2822_v10 }
 0x2b3   :  { %v2695_v13 = vadd.f32 13.957728, %v2567_v7 }
 0x2b5   :  { %v2823_v33 = vmul.f32 %v2695_v13, %v1287_v22 }
 0x2b7   :  { %2951 = vst [vmem:[%s5298_s1 + $0x3f8] sm:$0xff] %v2823_v33 }

</bundles_post_ra>
